<compile_context>
chip_gen: v7x
topology: tpu7x:2x2x1
jax: 0.10.0
libtpu: 0.0.40
codegen_flags: <defaults>
</compile_context>

<pallas_src>
import math
import functools

import jax
import jax.numpy as jnp
from jax import lax
from jax.experimental import pallas as pl
from jax.experimental.pallas import tpu as pltpu


# ----------------------------------------------------------------------------
# small helpers used inside the kernel
# ----------------------------------------------------------------------------
def _erf_approx(x):
    # Abramowitz & Stegun 7.1.26 (|err| <= 1.5e-7); exp-only (EUP-friendly).
    a1, a2, a3, a4, a5 = 0.254829592, -0.284496736, 1.421413741, -1.453152027, 1.061405429
    p = 0.3275911
    sgn = jnp.where(x >= 0.0, 1.0, -1.0)
    ax = jnp.abs(x)
    t = 1.0 / (1.0 + p * ax)
    poly = ((((a5 * t + a4) * t + a3) * t + a2) * t + a1) * t
    return sgn * (1.0 - poly * jnp.exp(-ax * ax))


def _gelu_exact(x):
    # matches torch.nn.GELU() (erf formulation), up to ~1e-7 from the erf poly
    return 0.5 * x * (1.0 + _erf_approx(x * (1.0 / math.sqrt(2.0))))


def _ln(x, g, b, eps=1e-5):
    mu = jnp.mean(x, axis=-1, keepdims=True)
    var = jnp.mean((x - mu) ** 2, axis=-1, keepdims=True)
    return (x - mu) * lax.rsqrt(var + eps) * g + b


# ----------------------------------------------------------------------------
# the single fused kernel: embed -> e_layers x transformer layer -> generator
# ----------------------------------------------------------------------------
def _fused_kernel(inp_ref, spec_ref, pos_ref, ew_ref, eb_ref, sw_ref, sb_ref,
                  ln1g_ref, ln1b_ref,
                  wq_ref, bq_ref, wk_ref, bk_ref, wv_ref, bv_ref,
                  wo_ref, bo_ref,
                  ln2g_ref, ln2b_ref, w1_ref, b1_ref, w2_ref, b2_ref,
                  gg_ref, gb_ref, gw_ref, gwb_ref,
                  out_ref, attn_ref,
                  x_scr,
                  *, batch, seq, n_pad, tok_len, spec_len, heads, scale):
    l = pl.program_id(0)
    n_layers = pl.num_programs(0)

    # ---- layer 0 only: fused input + spec embedding + positional adds ------
    @pl.when(l == 0)
    def _():
        # zero the scratch (also covers the padded rows seq..n_pad-1)
        x_scr[...] = jnp.zeros(x_scr.shape, x_scr.dtype)
        ew, eb = ew_ref[...], eb_ref[...]
        sw, sb = sw_ref[...], sb_ref[...]
        pos = pos_ref[...]
        for b in range(batch):
            # nn.Linear(1, d_model) per scalar + agent/time encodings
            tok = inp_ref[b] * ew + eb + pos               # (tok_len, D)
            # TODO(synk): SpecEmbedding source not provided; modeled as
            # nn.Linear(1, d_model) applied per spec scalar (one token each).
            stok = spec_ref[b] * sw + sb                   # (spec_len, D)
            base = b * n_pad
            x_scr[base:base + tok_len, :] = tok
            x_scr[base + tok_len:base + tok_len + spec_len, :] = stok
        # dropout: identity in eval mode

    # ---- one transformer layer per grid step --------------------------------
    x = x_scr[...]                                          # (B*n_pad, D) f32

    # mask for padded key columns of the softmax
    key_mask = lax.broadcasted_iota(jnp.int32, (1, n_pad), 1) < seq
    neg = jnp.where(key_mask, 0.0, -1e30).astype(jnp.float32)

    # PreNorm + multi-head attention + residual
    # TODO(synk): Attention source not provided; modeled as ViT-style MHA
    # (qkv linear with bias, per-head softmax(QK^T/sqrt(dh)) V, output linear).
    h = _ln(x, ln1g_ref[...], ln1b_ref[...])
    hb = h.astype(jnp.bfloat16)

    attn_out = jnp.zeros_like(x)
    for hh in range(heads):
        # per-head projections; weights indexed on a leading (non-lane) axis
        q = jnp.dot(hb, wq_ref[hh], preferred_element_type=jnp.float32) + bq_ref[hh]
        k = jnp.dot(hb, wk_ref[hh], preferred_element_type=jnp.float32) + bk_ref[hh]
        v = jnp.dot(hb, wv_ref[hh], preferred_element_type=jnp.float32) + bv_ref[hh]
        qb = q.astype(jnp.bfloat16)
        kb = k.astype(jnp.bfloat16)
        vb = v.astype(jnp.bfloat16)
        o_parts = []
        for b in range(batch):
            r0 = b * n_pad                                  # aligned (n_pad % 8 == 0)
            s = lax.dot_general(qb[r0:r0 + n_pad], kb[r0:r0 + n_pad],
                                (((1,), (1,)), ((), ())),
                                preferred_element_type=jnp.float32) * scale
            s = s + neg                                     # mask padded keys
            s = s - jnp.max(s, axis=-1, keepdims=True)
            e = jnp.exp(s)
            p = e / jnp.sum(e, axis=-1, keepdims=True)      # exact divide
            # attention map written in place (real rows/cols only)
            attn_ref[b * heads + hh] = p[:seq, :seq].astype(attn_ref.dtype)
            o_parts.append(jnp.dot(p.astype(jnp.bfloat16), vb[r0:r0 + n_pad],
                                   preferred_element_type=jnp.float32))
        o_h = jnp.concatenate(o_parts, axis=0)              # (B*n_pad, Dh)
        # out-projection folded per head: sum_h o_h @ Wo[h]
        attn_out = attn_out + jnp.dot(o_h.astype(jnp.bfloat16), wo_ref[hh],
                                      preferred_element_type=jnp.float32)
    x = x + attn_out + bo_ref[...]

    # PreNorm + FeedForward (Linear -> GELU -> Linear) + residual
    h2 = _ln(x, ln2g_ref[...], ln2b_ref[...])
    f = jnp.dot(h2.astype(jnp.bfloat16), w1_ref[...],
                preferred_element_type=jnp.float32) + b1_ref[...]
    f = _gelu_exact(f)
    f = jnp.dot(f.astype(jnp.bfloat16), w2_ref[...],
                preferred_element_type=jnp.float32) + b2_ref[...]
    x = x + f

    x_scr[...] = x                                          # carry to next layer

    # ---- last layer only: generator = mean over sequence + LN + Linear ------
    @pl.when(l == n_layers - 1)
    def _():
        rows = [jnp.sum(x[b * n_pad:b * n_pad + seq], axis=0, keepdims=True)
                * (1.0 / seq) for b in range(batch)]
        pooled = jnp.concatenate(rows, axis=0)              # (B, D)
        g = _ln(pooled, gg_ref[...], gb_ref[...])
        y = jnp.dot(g.astype(jnp.bfloat16), gw_ref[...],
                    preferred_element_type=jnp.float32) + gwb_ref[...]
        out_ref[...] = y.astype(out_ref.dtype)


# ----------------------------------------------------------------------------
# BlockSpec helpers
# ----------------------------------------------------------------------------
def _full_spec(a):
    nd = a.ndim
    return pl.BlockSpec(tuple(a.shape), lambda l, nd=nd: (0,) * nd)


def _layer_spec(a):
    nd = a.ndim
    return pl.BlockSpec((pl.Squeezed(),) + tuple(a.shape[1:]),
                        lambda l, nd=nd: (l,) + (0,) * (nd - 1))


# ----------------------------------------------------------------------------
# forward orchestration
# ----------------------------------------------------------------------------
def sinusoid_table(n, d_model):
    pos = jnp.arange(n, dtype=jnp.float32)[:, None]
    div = jnp.exp(jnp.arange(0, d_model, 2, dtype=jnp.float32)
                  * (-(math.log(10000.0) / d_model)))
    tab = jnp.zeros((n, d_model), jnp.float32)
    tab = tab.at[:, 0::2].set(jnp.sin(pos * div))
    tab = tab.at[:, 1::2].set(jnp.cos(pos * div))
    return tab


def init_params(key, *, d_model, d_ff, heads, e_layers, num_pred):
    def dense(k, shape):
        return jax.random.normal(k, shape, jnp.float32) * 0.02

    ks = jax.random.split(key, 8)
    D, E = d_model, e_layers
    return {
        "emb_w": dense(ks[0], (1, D)),
        "emb_b": jnp.zeros((1, D), jnp.float32),
        "spec_w": dense(ks[1], (1, D)),
        "spec_b": jnp.zeros((1, D), jnp.float32),
        "gen_ln_g": jnp.ones((1, D), jnp.float32),
        "gen_ln_b": jnp.zeros((1, D), jnp.float32),
        "gen_w": dense(ks[2], (D, num_pred)),
        "gen_b": jnp.zeros((1, num_pred), jnp.float32),
        "layers": {   # all layer weights stacked on a leading e_layers axis
            "ln1_g": jnp.ones((E, 1, D), jnp.float32),
            "ln1_b": jnp.zeros((E, 1, D), jnp.float32),
            "w_qkv": dense(ks[3], (E, D, 3 * D)),
            "b_qkv": jnp.zeros((E, 1, 3 * D), jnp.float32),
            "w_o": dense(ks[4], (E, D, D)),
            "b_o": jnp.zeros((E, 1, D), jnp.float32),
            "ln2_g": jnp.ones((E, 1, D), jnp.float32),
            "ln2_b": jnp.zeros((E, 1, D), jnp.float32),
            "w1": dense(ks[5], (E, D, d_ff)),
            "b1": jnp.zeros((E, 1, d_ff), jnp.float32),
            "w2": dense(ks[6], (E, d_ff, D)),
            "b2": jnp.zeros((E, 1, D), jnp.float32),
        },
    }


def base_transformer_forward(params, inp, spec, *, in_len, heads):
    B, T, F = inp.shape
    D = params["emb_w"].shape[1]
    L = T * F
    S = spec.shape[1]
    N = L + S
    n_pad = ((N + 7) // 8) * 8                  # sublane-aligned sequence length
    lp = params["layers"]
    E = lp["w_qkv"].shape[0]
    d_ff = lp["w1"].shape[2]
    H = heads
    Dh = D // H
    P = params["gen_w"].shape[1]
    scale = Dh ** -0.5

    # agent + time positional encodings (exact AgentEncoding/TimeEncoding sums)
    num_a = L // in_len
    table = sinusoid_table(max(num_a, in_len), D)
    idx = jnp.arange(L)
    pos = table[idx // in_len] + table[idx % in_len]            # (L, D)

    # --- per-head weight layout (head split on a leading axis) + bf16 cast ---
    mm = jnp.bfloat16
    wqkv = lp["w_qkv"].reshape(E, D, 3, H, Dh)                  # cols = (qkv, h, d)
    wq = wqkv[:, :, 0].transpose(0, 2, 1, 3).astype(mm)         # (E, H, D, Dh)
    wk = wqkv[:, :, 1].transpose(0, 2, 1, 3).astype(mm)
    wv = wqkv[:, :, 2].transpose(0, 2, 1, 3).astype(mm)
    bqkv = lp["b_qkv"].reshape(E, 3, H, 1, Dh)
    bq, bk, bv = bqkv[:, 0], bqkv[:, 1], bqkv[:, 2]             # (E, H, 1, Dh) f32
    wo = lp["w_o"].reshape(E, H, Dh, D).astype(mm)              # (E, H, Dh, D)
    w1 = lp["w1"].astype(mm)
    w2 = lp["w2"].astype(mm)
    gw = params["gen_w"].astype(mm)

    inp3 = inp.reshape(B, L, 1)
    spec3 = spec.reshape(B, S, 1)

    embed_args = (inp3, spec3, pos, params["emb_w"], params["emb_b"],
                  params["spec_w"], params["spec_b"])
    layer_args = (lp["ln1_g"], lp["ln1_b"], wq, bq, wk, bk, wv, bv, wo,
                  lp["b_o"], lp["ln2_g"], lp["ln2_b"], w1, lp["b1"], w2, lp["b2"])
    gen_args = (params["gen_ln_g"], params["gen_ln_b"], gw, params["gen_b"])
    args = embed_args + layer_args + gen_args

    in_specs = ([_full_spec(a) for a in embed_args]
                + [_layer_spec(a) for a in layer_args]
                + [_full_spec(a) for a in gen_args])

    out_shape = (jax.ShapeDtypeStruct((B, P), jnp.float32),
                 jax.ShapeDtypeStruct((E, B * H, N, N), jnp.float32))
    out_specs = (pl.BlockSpec((B, P), lambda l: (0, 0)),
                 pl.BlockSpec((pl.Squeezed(), B * H, N, N),
                              lambda l: (l, 0, 0, 0)))

    flops = 2 * B * E * (3 * n_pad * D * D                      # qkv projections
                         + 2 * H * n_pad * n_pad * Dh           # scores + PV
                         + n_pad * D * D                        # out projection
                         + 2 * n_pad * D * d_ff)                # FFN
    bytes_accessed = int(sum(a.size * a.dtype.itemsize
                             for a in jax.tree_util.tree_leaves(args)))
    bytes_accessed += (B * P + E * B * H * N * N) * 4
    cost = pl.CostEstimate(flops=flops,
                           transcendentals=B * E * H * n_pad * n_pad,
                           bytes_accessed=bytes_accessed)

    kernel = functools.partial(_fused_kernel, batch=B, seq=N, n_pad=n_pad,
                               tok_len=L, spec_len=S, heads=H, scale=scale)

    out, attn = pl.pallas_call(
        kernel,
        out_shape=out_shape,
        grid=(E,),
        in_specs=in_specs,
        out_specs=out_specs,
        scratch_shapes=[pltpu.VMEM((B * n_pad, D), jnp.float32)],
        compiler_params=pltpu.CompilerParams(
            dimension_semantics=("arbitrary",),
            vmem_limit_bytes=32 * 1024 * 1024),
        cost_estimate=cost,
    )(*args)

    # (E, B*H, N, N) -> (E*B, H, N, N): contiguous re-split, free, matches the
    # torch layer-major concatenation of the per-layer attention maps.
    return out, attn.reshape(E * B, H, N, N)


# ----------------------------------------------------------------------------
if __name__ == "__main__":
    batch = 2
    in_len = 4              # args.in_len (look_back)
    num_all_features = 6    # ts_dim of the time-series input
    num_spec = 4            # cfg.NUM_CONTROL_FEATURES
    num_pred = 3            # cfg.NUM_PRED_FEATURES
    d_model = 32
    d_ff = 64
    heads = 4
    e_layers = 2

    key = jax.random.PRNGKey(0)
    k_inp, k_spec, k_par = jax.random.split(key, 3)
    inp = jax.random.normal(k_inp, (batch, in_len, num_all_features), jnp.float32)
    spec = jax.random.normal(k_spec, (batch, num_spec), jnp.float32)

    params = init_params(k_par, d_model=d_model, d_ff=d_ff, heads=heads,
                         e_layers=e_layers, num_pred=num_pred)

    fwd = jax.jit(functools.partial(base_transformer_forward,
                                    in_len=in_len, heads=heads))
    out, attn = fwd(params, inp, spec)
    jax.block_until_ready(out)
    jax.block_until_ready(attn)

    seq = in_len * num_all_features + num_spec
    assert out.shape == (batch, num_pred)
    assert attn.shape == (e_layers * batch, heads, seq, seq)
    assert bool(jnp.all(jnp.isfinite(out))) and bool(jnp.all(jnp.isfinite(attn)))
    print("KERNEL_OK")
</pallas_src>

<mosaic_0001>
module attributes {stable_mosaic.version = 11 : i64} {
  func.func @_fused_kernel(%arg0: i32, %arg1: memref<2x24x1xf32, #tpu.memory_space<vmem>>, %arg2: memref<2x4x1xf32, #tpu.memory_space<vmem>>, %arg3: memref<24x32xf32, #tpu.memory_space<vmem>>, %arg4: memref<1x32xf32, #tpu.memory_space<vmem>>, %arg5: memref<1x32xf32, #tpu.memory_space<vmem>>, %arg6: memref<1x32xf32, #tpu.memory_space<vmem>>, %arg7: memref<1x32xf32, #tpu.memory_space<vmem>>, %arg8: memref<1x1x32xf32, #tpu.memory_space<vmem>>, %arg9: memref<1x1x32xf32, #tpu.memory_space<vmem>>, %arg10: memref<1x4x32x8xbf16, #tpu.memory_space<vmem>>, %arg11: memref<1x4x1x8xf32, #tpu.memory_space<vmem>>, %arg12: memref<1x4x32x8xbf16, #tpu.memory_space<vmem>>, %arg13: memref<1x4x1x8xf32, #tpu.memory_space<vmem>>, %arg14: memref<1x4x32x8xbf16, #tpu.memory_space<vmem>>, %arg15: memref<1x4x1x8xf32, #tpu.memory_space<vmem>>, %arg16: memref<1x4x8x32xbf16, #tpu.memory_space<vmem>>, %arg17: memref<1x1x32xf32, #tpu.memory_space<vmem>>, %arg18: memref<1x1x32xf32, #tpu.memory_space<vmem>>, %arg19: memref<1x1x32xf32, #tpu.memory_space<vmem>>, %arg20: memref<1x32x64xbf16, #tpu.memory_space<vmem>>, %arg21: memref<1x1x64xf32, #tpu.memory_space<vmem>>, %arg22: memref<1x64x32xbf16, #tpu.memory_space<vmem>>, %arg23: memref<1x1x32xf32, #tpu.memory_space<vmem>>, %arg24: memref<1x32xf32, #tpu.memory_space<vmem>>, %arg25: memref<1x32xf32, #tpu.memory_space<vmem>>, %arg26: memref<32x3xbf16, #tpu.memory_space<vmem>>, %arg27: memref<1x3xf32, #tpu.memory_space<vmem>>, %arg28: memref<2x3xf32, #tpu.memory_space<vmem>>, %arg29: memref<1x8x28x28xf32, #tpu.memory_space<vmem>>, %arg30: memref<64x32xf32, #tpu.memory_space<vmem>>) attributes {dimension_semantics = [#tpu.dimension_semantics<arbitrary>], iteration_bounds = array<i64: 2>, scalar_prefetch = 0 : i64, scratch_operands = 1 : i64, tpu.core_type = #tpu.core_type<tc>, window_params = [{pipeline_mode = #tpu.pipeline_mode<synchronous>, transform_indices = @transform_0, window_bounds = array<i64: 2, 24, 1>}, {pipeline_mode = #tpu.pipeline_mode<synchronous>, transform_indices = @transform_1, window_bounds = array<i64: 2, 4, 1>}, {pipeline_mode = #tpu.pipeline_mode<synchronous>, transform_indices = @transform_2, window_bounds = array<i64: 24, 32>}, {pipeline_mode = #tpu.pipeline_mode<synchronous>, transform_indices = @transform_3, window_bounds = array<i64: 1, 32>}, {pipeline_mode = #tpu.pipeline_mode<synchronous>, transform_indices = @transform_4, window_bounds = array<i64: 1, 32>}, {pipeline_mode = #tpu.pipeline_mode<synchronous>, transform_indices = @transform_5, window_bounds = array<i64: 1, 32>}, {pipeline_mode = #tpu.pipeline_mode<synchronous>, transform_indices = @transform_6, window_bounds = array<i64: 1, 32>}, {transform_indices = @transform_7, window_bounds = array<i64: 1, 1, 32>}, {transform_indices = @transform_8, window_bounds = array<i64: 1, 1, 32>}, {transform_indices = @transform_9, window_bounds = array<i64: 1, 4, 32, 8>}, {transform_indices = @transform_10, window_bounds = array<i64: 1, 4, 1, 8>}, {transform_indices = @transform_11, window_bounds = array<i64: 1, 4, 32, 8>}, {transform_indices = @transform_12, window_bounds = array<i64: 1, 4, 1, 8>}, {transform_indices = @transform_13, window_bounds = array<i64: 1, 4, 32, 8>}, {transform_indices = @transform_14, window_bounds = array<i64: 1, 4, 1, 8>}, {transform_indices = @transform_15, window_bounds = array<i64: 1, 4, 8, 32>}, {transform_indices = @transform_16, window_bounds = array<i64: 1, 1, 32>}, {transform_indices = @transform_17, window_bounds = array<i64: 1, 1, 32>}, {transform_indices = @transform_18, window_bounds = array<i64: 1, 1, 32>}, {transform_indices = @transform_19, window_bounds = array<i64: 1, 32, 64>}, {transform_indices = @transform_20, window_bounds = array<i64: 1, 1, 64>}, {transform_indices = @transform_21, window_bounds = array<i64: 1, 64, 32>}, {transform_indices = @transform_22, window_bounds = array<i64: 1, 1, 32>}, {pipeline_mode = #tpu.pipeline_mode<synchronous>, transform_indices = @transform_23, window_bounds = array<i64: 1, 32>}, {pipeline_mode = #tpu.pipeline_mode<synchronous>, transform_indices = @transform_24, window_bounds = array<i64: 1, 32>}, {pipeline_mode = #tpu.pipeline_mode<synchronous>, transform_indices = @transform_25, window_bounds = array<i64: 32, 3>}, {pipeline_mode = #tpu.pipeline_mode<synchronous>, transform_indices = @transform_26, window_bounds = array<i64: 1, 3>}, {pipeline_mode = #tpu.pipeline_mode<synchronous>, transform_indices = @transform_27, window_bounds = array<i64: 2, 3>}, {transform_indices = @transform_28, window_bounds = array<i64: 1, 8, 28, 28>}]} {
    %c0_i32 = arith.constant 0 : i32
    %0 = arith.cmpi eq, %arg0, %c0_i32 : i32
    %1 = arith.extui %0 : i1 to i32
    %c0_i32_0 = arith.constant 0 : i32
    %2 = arith.cmpi ne, %1, %c0_i32_0 : i32
    scf.if %2 {
      %cst_255 = arith.constant 0.000000e+00 : f32
      %435 = vector.broadcast %cst_255 : f32 to vector<64x32xf32>
      %c0_256 = arith.constant 0 : index
      %c0_257 = arith.constant 0 : index
      %436 = vector.load %arg30[%c0_256, %c0_257] : memref<64x32xf32, #tpu.memory_space<vmem>>, vector<64x32xf32>
      tpu.vector_store %arg30[%c0_256, %c0_257], %435 {strides = array<i32>} : memref<64x32xf32, #tpu.memory_space<vmem>>, vector<64x32xf32>,
      %c0_258 = arith.constant 0 : index
      %c0_259 = arith.constant 0 : index
      %437 = vector.load %arg4[%c0_258, %c0_259] : memref<1x32xf32, #tpu.memory_space<vmem>>, vector<1x32xf32>
      %c0_260 = arith.constant 0 : index
      %c0_261 = arith.constant 0 : index
      %438 = vector.load %arg5[%c0_260, %c0_261] : memref<1x32xf32, #tpu.memory_space<vmem>>, vector<1x32xf32>
      %c0_262 = arith.constant 0 : index
      %c0_263 = arith.constant 0 : index
      %439 = vector.load %arg6[%c0_262, %c0_263] : memref<1x32xf32, #tpu.memory_space<vmem>>, vector<1x32xf32>
      %c0_264 = arith.constant 0 : index
      %c0_265 = arith.constant 0 : index
      %440 = vector.load %arg7[%c0_264, %c0_265] : memref<1x32xf32, #tpu.memory_space<vmem>>, vector<1x32xf32>
      %c0_266 = arith.constant 0 : index
      %c0_267 = arith.constant 0 : index
      %441 = vector.load %arg3[%c0_266, %c0_267] : memref<24x32xf32, #tpu.memory_space<vmem>>, vector<24x32xf32>
      %c0_268 = arith.constant 0 : index
      %c0_269 = arith.constant 0 : index
      %c0_270 = arith.constant 0 : index
      %442 = vector.load %arg1[%c0_268, %c0_269, %c0_270] : memref<2x24x1xf32, #tpu.memory_space<vmem>>, vector<1x24x1xf32>
      %443 = vector.shape_cast %442 : vector<1x24x1xf32> to vector<24x1xf32>
      %444 = vector.broadcast %443 : vector<24x1xf32> to vector<24x32xf32>
      %445 = vector.broadcast %437 : vector<1x32xf32> to vector<24x32xf32>
      %446 = arith.mulf %444, %445 : vector<24x32xf32>
      %447 = vector.broadcast %438 : vector<1x32xf32> to vector<24x32xf32>
      %448 = arith.addf %446, %447 : vector<24x32xf32>
      %449 = arith.addf %448, %441 : vector<24x32xf32>
      %c0_271 = arith.constant 0 : index
      %c0_272 = arith.constant 0 : index
      %c0_273 = arith.constant 0 : index
      %450 = vector.load %arg2[%c0_271, %c0_272, %c0_273] : memref<2x4x1xf32, #tpu.memory_space<vmem>>, vector<1x4x1xf32>
      %451 = vector.shape_cast %450 : vector<1x4x1xf32> to vector<4x1xf32>
      %452 = vector.broadcast %451 : vector<4x1xf32> to vector<4x32xf32>
      %453 = vector.broadcast %439 : vector<1x32xf32> to vector<4x32xf32>
      %454 = arith.mulf %452, %453 : vector<4x32xf32>
      %455 = vector.broadcast %440 : vector<1x32xf32> to vector<4x32xf32>
      %456 = arith.addf %454, %455 : vector<4x32xf32>
      %c0_274 = arith.constant 0 : index
      %c0_275 = arith.constant 0 : index
      %457 = vector.load %arg30[%c0_274, %c0_275] : memref<64x32xf32, #tpu.memory_space<vmem>>, vector<24x32xf32>
      tpu.vector_store %arg30[%c0_274, %c0_275], %449 {strides = array<i32>} : memref<64x32xf32, #tpu.memory_space<vmem>>, vector<24x32xf32>,
      %c24 = arith.constant 24 : index
      %c0_276 = arith.constant 0 : index
      %458 = vector.load %arg30[%c24, %c0_276] : memref<64x32xf32, #tpu.memory_space<vmem>>, vector<4x32xf32>
      tpu.vector_store %arg30[%c24, %c0_276], %456 {strides = array<i32>} : memref<64x32xf32, #tpu.memory_space<vmem>>, vector<4x32xf32>,
      %c1_277 = arith.constant 1 : index
      %c0_278 = arith.constant 0 : index
      %c0_279 = arith.constant 0 : index
      %459 = vector.load %arg1[%c1_277, %c0_278, %c0_279] : memref<2x24x1xf32, #tpu.memory_space<vmem>>, vector<1x24x1xf32>
      %460 = vector.shape_cast %459 : vector<1x24x1xf32> to vector<24x1xf32>
      %461 = vector.broadcast %460 : vector<24x1xf32> to vector<24x32xf32>
      %462 = vector.broadcast %437 : vector<1x32xf32> to vector<24x32xf32>
      %463 = arith.mulf %461, %462 : vector<24x32xf32>
      %464 = vector.broadcast %438 : vector<1x32xf32> to vector<24x32xf32>
      %465 = arith.addf %463, %464 : vector<24x32xf32>
      %466 = arith.addf %465, %441 : vector<24x32xf32>
      %c1_280 = arith.constant 1 : index
      %c0_281 = arith.constant 0 : index
      %c0_282 = arith.constant 0 : index
      %467 = vector.load %arg2[%c1_280, %c0_281, %c0_282] : memref<2x4x1xf32, #tpu.memory_space<vmem>>, vector<1x4x1xf32>
      %468 = vector.shape_cast %467 : vector<1x4x1xf32> to vector<4x1xf32>
      %469 = vector.broadcast %468 : vector<4x1xf32> to vector<4x32xf32>
      %470 = vector.broadcast %439 : vector<1x32xf32> to vector<4x32xf32>
      %471 = arith.mulf %469, %470 : vector<4x32xf32>
      %472 = vector.broadcast %440 : vector<1x32xf32> to vector<4x32xf32>
      %473 = arith.addf %471, %472 : vector<4x32xf32>
      %c32 = arith.constant 32 : index
      %c0_283 = arith.constant 0 : index
      %474 = vector.load %arg30[%c32, %c0_283] : memref<64x32xf32, #tpu.memory_space<vmem>>, vector<24x32xf32>
      tpu.vector_store %arg30[%c32, %c0_283], %466 {strides = array<i32>} : memref<64x32xf32, #tpu.memory_space<vmem>>, vector<24x32xf32>,
      %c56 = arith.constant 56 : index
      %c0_284 = arith.constant 0 : index
      %475 = vector.load %arg30[%c56, %c0_284] : memref<64x32xf32, #tpu.memory_space<vmem>>, vector<4x32xf32>
      tpu.vector_store %arg30[%c56, %c0_284], %473 {strides = array<i32>} : memref<64x32xf32, #tpu.memory_space<vmem>>, vector<4x32xf32>,
    } else {
    }
    %c0 = arith.constant 0 : index
    %c0_1 = arith.constant 0 : index
    %3 = vector.load %arg30[%c0, %c0_1] : memref<64x32xf32, #tpu.memory_space<vmem>>, vector<64x32xf32>
    %4 = tpu.iota {dimensions = array<i32: 1>} : vector<1x32xi32>
    %c28_i32 = arith.constant 28 : i32
    %5 = vector.broadcast %c28_i32 : i32 to vector<1x32xi32>
    %6 = arith.cmpi slt, %4, %5 : vector<1x32xi32>
    %cst = arith.constant 0.000000e+00 : f32
    %cst_2 = arith.constant -1.000000e+30 : f32
    %7 = vector.broadcast %cst : f32 to vector<1x32xf32>
    %8 = vector.broadcast %cst_2 : f32 to vector<1x32xf32>
    %9 = arith.select %6, %7, %8 : vector<1x32xi1>, vector<1x32xf32>
    %c0_3 = arith.constant 0 : index
    %c0_4 = arith.constant 0 : index
    %c0_5 = arith.constant 0 : index
    %10 = vector.load %arg8[%c0_3, %c0_4, %c0_5] : memref<1x1x32xf32, #tpu.memory_space<vmem>>, vector<1x1x32xf32>
    %11 = vector.shape_cast %10 : vector<1x1x32xf32> to vector<1x32xf32>
    %c0_6 = arith.constant 0 : index
    %c0_7 = arith.constant 0 : index
    %c0_8 = arith.constant 0 : index
    %12 = vector.load %arg9[%c0_6, %c0_7, %c0_8] : memref<1x1x32xf32, #tpu.memory_space<vmem>>, vector<1x1x32xf32>
    %13 = vector.shape_cast %12 : vector<1x1x32xf32> to vector<1x32xf32>
    %cst_9 = arith.constant dense<0.000000e+00> : vector<64xf32>
    %14 = vector.multi_reduction <add>, %3, %cst_9 [1] : vector<64x32xf32> to vector<64xf32>
    %15 = vector.shape_cast %14 : vector<64xf32> to vector<64x1xf32>
    %cst_10 = arith.constant 3.200000e+01 : f32
    %16 = vector.broadcast %cst_10 : f32 to vector<64x1xf32>
    %17 = arith.divf %15, %16 : vector<64x1xf32>
    %18 = vector.broadcast %17 : vector<64x1xf32> to vector<64x32xf32>
    %19 = arith.subf %3, %18 : vector<64x32xf32>
    %20 = arith.mulf %19, %19 : vector<64x32xf32>
    %cst_11 = arith.constant dense<0.000000e+00> : vector<64xf32>
    %21 = vector.multi_reduction <add>, %20, %cst_11 [1] : vector<64x32xf32> to vector<64xf32>
    %22 = vector.shape_cast %21 : vector<64xf32> to vector<64x1xf32>
    %cst_12 = arith.constant 3.200000e+01 : f32
    %23 = vector.broadcast %cst_12 : f32 to vector<64x1xf32>
    %24 = arith.divf %22, %23 : vector<64x1xf32>
    %25 = vector.broadcast %17 : vector<64x1xf32> to vector<64x32xf32>
    %26 = arith.subf %3, %25 : vector<64x32xf32>
    %cst_13 = arith.constant 9.99999974E-6 : f32
    %27 = vector.broadcast %cst_13 : f32 to vector<64x1xf32>
    %28 = arith.addf %24, %27 : vector<64x1xf32>
    %29 = math.rsqrt %28 : vector<64x1xf32>
    %30 = vector.broadcast %29 : vector<64x1xf32> to vector<64x32xf32>
    %31 = arith.mulf %26, %30 : vector<64x32xf32>
    %32 = vector.broadcast %11 : vector<1x32xf32> to vector<64x32xf32>
    %33 = arith.mulf %31, %32 : vector<64x32xf32>
    %34 = vector.broadcast %13 : vector<1x32xf32> to vector<64x32xf32>
    %35 = arith.addf %33, %34 : vector<64x32xf32>
    %36 = arith.truncf %35 : vector<64x32xf32> to vector<64x32xbf16>
    %cst_14 = arith.constant 0.000000e+00 : f32
    %37 = vector.broadcast %cst_14 : f32 to vector<64x32xf32>
    %c0_15 = arith.constant 0 : index
    %c0_16 = arith.constant 0 : index
    %c0_17 = arith.constant 0 : index
    %c0_18 = arith.constant 0 : index
    %38 = vector.load %arg10[%c0_15, %c0_16, %c0_17, %c0_18] : memref<1x4x32x8xbf16, #tpu.memory_space<vmem>>, vector<1x1x32x8xbf16>
    %39 = vector.shape_cast %38 : vector<1x1x32x8xbf16> to vector<32x8xbf16>
    %cst_19 = arith.constant dense<0.000000e+00> : vector<64x8xf32>
    %40 = tpu.matmul %36, %39, %cst_19 {dimension_numbers = #tpu.dot_dimension_numbers<[1], [0], [0], [1], [0, 0, 1, 1], [], []>} : vector<64x32xbf16>, vector<32x8xbf16>, vector<64x8xf32> -> vector<64x8xf32>
    %c0_20 = arith.constant 0 : index
    %c0_21 = arith.constant 0 : index
    %c0_22 = arith.constant 0 : index
    %c0_23 = arith.constant 0 : index
    %41 = vector.load %arg11[%c0_20, %c0_21, %c0_22, %c0_23] : memref<1x4x1x8xf32, #tpu.memory_space<vmem>>, vector<1x1x1x8xf32>
    %42 = vector.shape_cast %41 : vector<1x1x1x8xf32> to vector<1x8xf32>
    %43 = vector.broadcast %42 : vector<1x8xf32> to vector<64x8xf32>
    %44 = arith.addf %40, %43 : vector<64x8xf32>
    %c0_24 = arith.constant 0 : index
    %c0_25 = arith.constant 0 : index
    %c0_26 = arith.constant 0 : index
    %c0_27 = arith.constant 0 : index
    %45 = vector.load %arg12[%c0_24, %c0_25, %c0_26, %c0_27] : memref<1x4x32x8xbf16, #tpu.memory_space<vmem>>, vector<1x1x32x8xbf16>
    %46 = vector.shape_cast %45 : vector<1x1x32x8xbf16> to vector<32x8xbf16>
    %cst_28 = arith.constant dense<0.000000e+00> : vector<64x8xf32>
    %47 = tpu.matmul %36, %46, %cst_28 {dimension_numbers = #tpu.dot_dimension_numbers<[1], [0], [0], [1], [0, 0, 1, 1], [], []>} : vector<64x32xbf16>, vector<32x8xbf16>, vector<64x8xf32> -> vector<64x8xf32>
    %c0_29 = arith.constant 0 : index
    %c0_30 = arith.constant 0 : index
    %c0_31 = arith.constant 0 : index
    %c0_32 = arith.constant 0 : index
    %48 = vector.load %arg13[%c0_29, %c0_30, %c0_31, %c0_32] : memref<1x4x1x8xf32, #tpu.memory_space<vmem>>, vector<1x1x1x8xf32>
    %49 = vector.shape_cast %48 : vector<1x1x1x8xf32> to vector<1x8xf32>
    %50 = vector.broadcast %49 : vector<1x8xf32> to vector<64x8xf32>
    %51 = arith.addf %47, %50 : vector<64x8xf32>
    %c0_33 = arith.constant 0 : index
    %c0_34 = arith.constant 0 : index
    %c0_35 = arith.constant 0 : index
    %c0_36 = arith.constant 0 : index
    %52 = vector.load %arg14[%c0_33, %c0_34, %c0_35, %c0_36] : memref<1x4x32x8xbf16, #tpu.memory_space<vmem>>, vector<1x1x32x8xbf16>
    %53 = vector.shape_cast %52 : vector<1x1x32x8xbf16> to vector<32x8xbf16>
    %cst_37 = arith.constant dense<0.000000e+00> : vector<64x8xf32>
    %54 = tpu.matmul %36, %53, %cst_37 {dimension_numbers = #tpu.dot_dimension_numbers<[1], [0], [0], [1], [0, 0, 1, 1], [], []>} : vector<64x32xbf16>, vector<32x8xbf16>, vector<64x8xf32> -> vector<64x8xf32>
    %c0_38 = arith.constant 0 : index
    %c0_39 = arith.constant 0 : index
    %c0_40 = arith.constant 0 : index
    %c0_41 = arith.constant 0 : index
    %55 = vector.load %arg15[%c0_38, %c0_39, %c0_40, %c0_41] : memref<1x4x1x8xf32, #tpu.memory_space<vmem>>, vector<1x1x1x8xf32>
    %56 = vector.shape_cast %55 : vector<1x1x1x8xf32> to vector<1x8xf32>
    %57 = vector.broadcast %56 : vector<1x8xf32> to vector<64x8xf32>
    %58 = arith.addf %54, %57 : vector<64x8xf32>
    %59 = arith.truncf %44 : vector<64x8xf32> to vector<64x8xbf16>
    %60 = arith.truncf %51 : vector<64x8xf32> to vector<64x8xbf16>
    %61 = arith.truncf %58 : vector<64x8xf32> to vector<64x8xbf16>
    %62 = vector.extract_strided_slice %59 {offsets = [0, 0], sizes = [32, 8], strides = [1, 1]} : vector<64x8xbf16> to vector<32x8xbf16>
    %63 = vector.extract_strided_slice %60 {offsets = [0, 0], sizes = [32, 8], strides = [1, 1]} : vector<64x8xbf16> to vector<32x8xbf16>
    %cst_42 = arith.constant dense<0.000000e+00> : vector<32x32xf32>
    %64 = tpu.matmul %62, %63, %cst_42 {dimension_numbers = #tpu.dot_dimension_numbers<[1], [1], [0], [0], [0, 0, 1, 0], [], []>} : vector<32x8xbf16>, vector<32x8xbf16>, vector<32x32xf32> -> vector<32x32xf32>
    %cst_43 = arith.constant 0.353553385 : f32
    %65 = vector.broadcast %cst_43 : f32 to vector<32x32xf32>
    %66 = arith.mulf %64, %65 : vector<32x32xf32>
    %67 = vector.broadcast %9 : vector<1x32xf32> to vector<32x32xf32>
    %68 = arith.addf %66, %67 : vector<32x32xf32>
    %cst_44 = arith.constant dense<0xFF800000> : vector<32xf32>
    %69 = vector.multi_reduction <maximumf>, %68, %cst_44 [1] : vector<32x32xf32> to vector<32xf32>
    %70 = vector.shape_cast %69 : vector<32xf32> to vector<32x1xf32>
    %71 = vector.broadcast %70 : vector<32x1xf32> to vector<32x32xf32>
    %72 = arith.subf %68, %71 : vector<32x32xf32>
    %73 = math.exp %72 : vector<32x32xf32>
    %cst_45 = arith.constant dense<0.000000e+00> : vector<32xf32>
    %74 = vector.multi_reduction <add>, %73, %cst_45 [1] : vector<32x32xf32> to vector<32xf32>
    %75 = vector.shape_cast %74 : vector<32xf32> to vector<32x1xf32>
    %76 = vector.broadcast %75 : vector<32x1xf32> to vector<32x32xf32>
    %77 = arith.divf %73, %76 : vector<32x32xf32>
    %78 = vector.extract_strided_slice %77 {offsets = [0, 0], sizes = [28, 28], strides = [1, 1]} : vector<32x32xf32> to vector<28x28xf32>
    %c0_46 = arith.constant 0 : index
    %c0_47 = arith.constant 0 : index
    %c0_48 = arith.constant 0 : index
    %c0_49 = arith.constant 0 : index
    %79 = vector.load %arg29[%c0_46, %c0_47, %c0_48, %c0_49] : memref<1x8x28x28xf32, #tpu.memory_space<vmem>>, vector<1x1x28x28xf32>
    %80 = vector.shape_cast %79 : vector<1x1x28x28xf32> to vector<28x28xf32>
    %81 = vector.shape_cast %78 : vector<28x28xf32> to vector<1x1x28x28xf32>
    tpu.vector_store %arg29[%c0_46, %c0_47, %c0_48, %c0_49], %81 {strides = array<i32>} : memref<1x8x28x28xf32, #tpu.memory_space<vmem>>, vector<1x1x28x28xf32>,
    %82 = arith.truncf %77 : vector<32x32xf32> to vector<32x32xbf16>
    %83 = vector.extract_strided_slice %61 {offsets = [0, 0], sizes = [32, 8], strides = [1, 1]} : vector<64x8xbf16> to vector<32x8xbf16>
    %cst_50 = arith.constant dense<0.000000e+00> : vector<32x8xf32>
    %84 = tpu.matmul %82, %83, %cst_50 {dimension_numbers = #tpu.dot_dimension_numbers<[1], [0], [0], [1], [0, 0, 1, 1], [], []>} : vector<32x32xbf16>, vector<32x8xbf16>, vector<32x8xf32> -> vector<32x8xf32>
    %85 = vector.extract_strided_slice %59 {offsets = [32, 0], sizes = [32, 8], strides = [1, 1]} : vector<64x8xbf16> to vector<32x8xbf16>
    %86 = vector.extract_strided_slice %60 {offsets = [32, 0], sizes = [32, 8], strides = [1, 1]} : vector<64x8xbf16> to vector<32x8xbf16>
    %cst_51 = arith.constant dense<0.000000e+00> : vector<32x32xf32>
    %87 = tpu.matmul %85, %86, %cst_51 {dimension_numbers = #tpu.dot_dimension_numbers<[1], [1], [0], [0], [0, 0, 1, 0], [], []>} : vector<32x8xbf16>, vector<32x8xbf16>, vector<32x32xf32> -> vector<32x32xf32>
    %cst_52 = arith.constant 0.353553385 : f32
    %88 = vector.broadcast %cst_52 : f32 to vector<32x32xf32>
    %89 = arith.mulf %87, %88 : vector<32x32xf32>
    %90 = vector.broadcast %9 : vector<1x32xf32> to vector<32x32xf32>
    %91 = arith.addf %89, %90 : vector<32x32xf32>
    %cst_53 = arith.constant dense<0xFF800000> : vector<32xf32>
    %92 = vector.multi_reduction <maximumf>, %91, %cst_53 [1] : vector<32x32xf32> to vector<32xf32>
    %93 = vector.shape_cast %92 : vector<32xf32> to vector<32x1xf32>
    %94 = vector.broadcast %93 : vector<32x1xf32> to vector<32x32xf32>
    %95 = arith.subf %91, %94 : vector<32x32xf32>
    %96 = math.exp %95 : vector<32x32xf32>
    %cst_54 = arith.constant dense<0.000000e+00> : vector<32xf32>
    %97 = vector.multi_reduction <add>, %96, %cst_54 [1] : vector<32x32xf32> to vector<32xf32>
    %98 = vector.shape_cast %97 : vector<32xf32> to vector<32x1xf32>
    %99 = vector.broadcast %98 : vector<32x1xf32> to vector<32x32xf32>
    %100 = arith.divf %96, %99 : vector<32x32xf32>
    %101 = vector.extract_strided_slice %100 {offsets = [0, 0], sizes = [28, 28], strides = [1, 1]} : vector<32x32xf32> to vector<28x28xf32>
    %c0_55 = arith.constant 0 : index
    %c4 = arith.constant 4 : index
    %c0_56 = arith.constant 0 : index
    %c0_57 = arith.constant 0 : index
    %102 = vector.load %arg29[%c0_55, %c4, %c0_56, %c0_57] : memref<1x8x28x28xf32, #tpu.memory_space<vmem>>, vector<1x1x28x28xf32>
    %103 = vector.shape_cast %102 : vector<1x1x28x28xf32> to vector<28x28xf32>
    %104 = vector.shape_cast %101 : vector<28x28xf32> to vector<1x1x28x28xf32>
    tpu.vector_store %arg29[%c0_55, %c4, %c0_56, %c0_57], %104 {strides = array<i32>} : memref<1x8x28x28xf32, #tpu.memory_space<vmem>>, vector<1x1x28x28xf32>,
    %105 = arith.truncf %100 : vector<32x32xf32> to vector<32x32xbf16>
    %106 = vector.extract_strided_slice %61 {offsets = [32, 0], sizes = [32, 8], strides = [1, 1]} : vector<64x8xbf16> to vector<32x8xbf16>
    %cst_58 = arith.constant dense<0.000000e+00> : vector<32x8xf32>
    %107 = tpu.matmul %105, %106, %cst_58 {dimension_numbers = #tpu.dot_dimension_numbers<[1], [0], [0], [1], [0, 0, 1, 1], [], []>} : vector<32x32xbf16>, vector<32x8xbf16>, vector<32x8xf32> -> vector<32x8xf32>
    %108 = tpu.concatenate %84, %107 in 0 : vector<32x8xf32>, vector<32x8xf32> -> vector<64x8xf32>
    %109 = arith.truncf %108 : vector<64x8xf32> to vector<64x8xbf16>
    %c0_59 = arith.constant 0 : index
    %c0_60 = arith.constant 0 : index
    %c0_61 = arith.constant 0 : index
    %c0_62 = arith.constant 0 : index
    %110 = vector.load %arg16[%c0_59, %c0_60, %c0_61, %c0_62] : memref<1x4x8x32xbf16, #tpu.memory_space<vmem>>, vector<1x1x8x32xbf16>
    %111 = vector.shape_cast %110 : vector<1x1x8x32xbf16> to vector<8x32xbf16>
    %cst_63 = arith.constant dense<0.000000e+00> : vector<64x32xf32>
    %112 = tpu.matmul %109, %111, %cst_63 {dimension_numbers = #tpu.dot_dimension_numbers<[1], [0], [0], [1], [0, 0, 1, 1], [], []>} : vector<64x8xbf16>, vector<8x32xbf16>, vector<64x32xf32> -> vector<64x32xf32>
    %113 = arith.addf %37, %112 : vector<64x32xf32>
    %c0_64 = arith.constant 0 : index
    %c1 = arith.constant 1 : index
    %c0_65 = arith.constant 0 : index
    %c0_66 = arith.constant 0 : index
    %114 = vector.load %arg10[%c0_64, %c1, %c0_65, %c0_66] : memref<1x4x32x8xbf16, #tpu.memory_space<vmem>>, vector<1x1x32x8xbf16>
    %115 = vector.shape_cast %114 : vector<1x1x32x8xbf16> to vector<32x8xbf16>
    %cst_67 = arith.constant dense<0.000000e+00> : vector<64x8xf32>
    %116 = tpu.matmul %36, %115, %cst_67 {dimension_numbers = #tpu.dot_dimension_numbers<[1], [0], [0], [1], [0, 0, 1, 1], [], []>} : vector<64x32xbf16>, vector<32x8xbf16>, vector<64x8xf32> -> vector<64x8xf32>
    %c0_68 = arith.constant 0 : index
    %c1_69 = arith.constant 1 : index
    %c0_70 = arith.constant 0 : index
    %c0_71 = arith.constant 0 : index
    %117 = vector.load %arg11[%c0_68, %c1_69, %c0_70, %c0_71] : memref<1x4x1x8xf32, #tpu.memory_space<vmem>>, vector<1x1x1x8xf32>
    %118 = vector.shape_cast %117 : vector<1x1x1x8xf32> to vector<1x8xf32>
    %119 = vector.broadcast %118 : vector<1x8xf32> to vector<64x8xf32>
    %120 = arith.addf %116, %119 : vector<64x8xf32>
    %c0_72 = arith.constant 0 : index
    %c1_73 = arith.constant 1 : index
    %c0_74 = arith.constant 0 : index
    %c0_75 = arith.constant 0 : index
    %121 = vector.load %arg12[%c0_72, %c1_73, %c0_74, %c0_75] : memref<1x4x32x8xbf16, #tpu.memory_space<vmem>>, vector<1x1x32x8xbf16>
    %122 = vector.shape_cast %121 : vector<1x1x32x8xbf16> to vector<32x8xbf16>
    %cst_76 = arith.constant dense<0.000000e+00> : vector<64x8xf32>
    %123 = tpu.matmul %36, %122, %cst_76 {dimension_numbers = #tpu.dot_dimension_numbers<[1], [0], [0], [1], [0, 0, 1, 1], [], []>} : vector<64x32xbf16>, vector<32x8xbf16>, vector<64x8xf32> -> vector<64x8xf32>
    %c0_77 = arith.constant 0 : index
    %c1_78 = arith.constant 1 : index
    %c0_79 = arith.constant 0 : index
    %c0_80 = arith.constant 0 : index
    %124 = vector.load %arg13[%c0_77, %c1_78, %c0_79, %c0_80] : memref<1x4x1x8xf32, #tpu.memory_space<vmem>>, vector<1x1x1x8xf32>
    %125 = vector.shape_cast %124 : vector<1x1x1x8xf32> to vector<1x8xf32>
    %126 = vector.broadcast %125 : vector<1x8xf32> to vector<64x8xf32>
    %127 = arith.addf %123, %126 : vector<64x8xf32>
    %c0_81 = arith.constant 0 : index
    %c1_82 = arith.constant 1 : index
    %c0_83 = arith.constant 0 : index
    %c0_84 = arith.constant 0 : index
    %128 = vector.load %arg14[%c0_81, %c1_82, %c0_83, %c0_84] : memref<1x4x32x8xbf16, #tpu.memory_space<vmem>>, vector<1x1x32x8xbf16>
    %129 = vector.shape_cast %128 : vector<1x1x32x8xbf16> to vector<32x8xbf16>
    %cst_85 = arith.constant dense<0.000000e+00> : vector<64x8xf32>
    %130 = tpu.matmul %36, %129, %cst_85 {dimension_numbers = #tpu.dot_dimension_numbers<[1], [0], [0], [1], [0, 0, 1, 1], [], []>} : vector<64x32xbf16>, vector<32x8xbf16>, vector<64x8xf32> -> vector<64x8xf32>
    %c0_86 = arith.constant 0 : index
    %c1_87 = arith.constant 1 : index
    %c0_88 = arith.constant 0 : index
    %c0_89 = arith.constant 0 : index
    %131 = vector.load %arg15[%c0_86, %c1_87, %c0_88, %c0_89] : memref<1x4x1x8xf32, #tpu.memory_space<vmem>>, vector<1x1x1x8xf32>
    %132 = vector.shape_cast %131 : vector<1x1x1x8xf32> to vector<1x8xf32>
    %133 = vector.broadcast %132 : vector<1x8xf32> to vector<64x8xf32>
    %134 = arith.addf %130, %133 : vector<64x8xf32>
    %135 = arith.truncf %120 : vector<64x8xf32> to vector<64x8xbf16>
    %136 = arith.truncf %127 : vector<64x8xf32> to vector<64x8xbf16>
    %137 = arith.truncf %134 : vector<64x8xf32> to vector<64x8xbf16>
    %138 = vector.extract_strided_slice %135 {offsets = [0, 0], sizes = [32, 8], strides = [1, 1]} : vector<64x8xbf16> to vector<32x8xbf16>
    %139 = vector.extract_strided_slice %136 {offsets = [0, 0], sizes = [32, 8], strides = [1, 1]} : vector<64x8xbf16> to vector<32x8xbf16>
    %cst_90 = arith.constant dense<0.000000e+00> : vector<32x32xf32>
    %140 = tpu.matmul %138, %139, %cst_90 {dimension_numbers = #tpu.dot_dimension_numbers<[1], [1], [0], [0], [0, 0, 1, 0], [], []>} : vector<32x8xbf16>, vector<32x8xbf16>, vector<32x32xf32> -> vector<32x32xf32>
    %cst_91 = arith.constant 0.353553385 : f32
    %141 = vector.broadcast %cst_91 : f32 to vector<32x32xf32>
    %142 = arith.mulf %140, %141 : vector<32x32xf32>
    %143 = vector.broadcast %9 : vector<1x32xf32> to vector<32x32xf32>
    %144 = arith.addf %142, %143 : vector<32x32xf32>
    %cst_92 = arith.constant dense<0xFF800000> : vector<32xf32>
    %145 = vector.multi_reduction <maximumf>, %144, %cst_92 [1] : vector<32x32xf32> to vector<32xf32>
    %146 = vector.shape_cast %145 : vector<32xf32> to vector<32x1xf32>
    %147 = vector.broadcast %146 : vector<32x1xf32> to vector<32x32xf32>
    %148 = arith.subf %144, %147 : vector<32x32xf32>
    %149 = math.exp %148 : vector<32x32xf32>
    %cst_93 = arith.constant dense<0.000000e+00> : vector<32xf32>
    %150 = vector.multi_reduction <add>, %149, %cst_93 [1] : vector<32x32xf32> to vector<32xf32>
    %151 = vector.shape_cast %150 : vector<32xf32> to vector<32x1xf32>
    %152 = vector.broadcast %151 : vector<32x1xf32> to vector<32x32xf32>
    %153 = arith.divf %149, %152 : vector<32x32xf32>
    %154 = vector.extract_strided_slice %153 {offsets = [0, 0], sizes = [28, 28], strides = [1, 1]} : vector<32x32xf32> to vector<28x28xf32>
    %c0_94 = arith.constant 0 : index
    %c1_95 = arith.constant 1 : index
    %c0_96 = arith.constant 0 : index
    %c0_97 = arith.constant 0 : index
    %155 = vector.load %arg29[%c0_94, %c1_95, %c0_96, %c0_97] : memref<1x8x28x28xf32, #tpu.memory_space<vmem>>, vector<1x1x28x28xf32>
    %156 = vector.shape_cast %155 : vector<1x1x28x28xf32> to vector<28x28xf32>
    %157 = vector.shape_cast %154 : vector<28x28xf32> to vector<1x1x28x28xf32>
    tpu.vector_store %arg29[%c0_94, %c1_95, %c0_96, %c0_97], %157 {strides = array<i32>} : memref<1x8x28x28xf32, #tpu.memory_space<vmem>>, vector<1x1x28x28xf32>,
    %158 = arith.truncf %153 : vector<32x32xf32> to vector<32x32xbf16>
    %159 = vector.extract_strided_slice %137 {offsets = [0, 0], sizes = [32, 8], strides = [1, 1]} : vector<64x8xbf16> to vector<32x8xbf16>
    %cst_98 = arith.constant dense<0.000000e+00> : vector<32x8xf32>
    %160 = tpu.matmul %158, %159, %cst_98 {dimension_numbers = #tpu.dot_dimension_numbers<[1], [0], [0], [1], [0, 0, 1, 1], [], []>} : vector<32x32xbf16>, vector<32x8xbf16>, vector<32x8xf32> -> vector<32x8xf32>
    %161 = vector.extract_strided_slice %135 {offsets = [32, 0], sizes = [32, 8], strides = [1, 1]} : vector<64x8xbf16> to vector<32x8xbf16>
    %162 = vector.extract_strided_slice %136 {offsets = [32, 0], sizes = [32, 8], strides = [1, 1]} : vector<64x8xbf16> to vector<32x8xbf16>
    %cst_99 = arith.constant dense<0.000000e+00> : vector<32x32xf32>
    %163 = tpu.matmul %161, %162, %cst_99 {dimension_numbers = #tpu.dot_dimension_numbers<[1], [1], [0], [0], [0, 0, 1, 0], [], []>} : vector<32x8xbf16>, vector<32x8xbf16>, vector<32x32xf32> -> vector<32x32xf32>
    %cst_100 = arith.constant 0.353553385 : f32
    %164 = vector.broadcast %cst_100 : f32 to vector<32x32xf32>
    %165 = arith.mulf %163, %164 : vector<32x32xf32>
    %166 = vector.broadcast %9 : vector<1x32xf32> to vector<32x32xf32>
    %167 = arith.addf %165, %166 : vector<32x32xf32>
    %cst_101 = arith.constant dense<0xFF800000> : vector<32xf32>
    %168 = vector.multi_reduction <maximumf>, %167, %cst_101 [1] : vector<32x32xf32> to vector<32xf32>
    %169 = vector.shape_cast %168 : vector<32xf32> to vector<32x1xf32>
    %170 = vector.broadcast %169 : vector<32x1xf32> to vector<32x32xf32>
    %171 = arith.subf %167, %170 : vector<32x32xf32>
    %172 = math.exp %171 : vector<32x32xf32>
    %cst_102 = arith.constant dense<0.000000e+00> : vector<32xf32>
    %173 = vector.multi_reduction <add>, %172, %cst_102 [1] : vector<32x32xf32> to vector<32xf32>
    %174 = vector.shape_cast %173 : vector<32xf32> to vector<32x1xf32>
    %175 = vector.broadcast %174 : vector<32x1xf32> to vector<32x32xf32>
    %176 = arith.divf %172, %175 : vector<32x32xf32>
    %177 = vector.extract_strided_slice %176 {offsets = [0, 0], sizes = [28, 28], strides = [1, 1]} : vector<32x32xf32> to vector<28x28xf32>
    %c0_103 = arith.constant 0 : index
    %c5 = arith.constant 5 : index
    %c0_104 = arith.constant 0 : index
    %c0_105 = arith.constant 0 : index
    %178 = vector.load %arg29[%c0_103, %c5, %c0_104, %c0_105] : memref<1x8x28x28xf32, #tpu.memory_space<vmem>>, vector<1x1x28x28xf32>
    %179 = vector.shape_cast %178 : vector<1x1x28x28xf32> to vector<28x28xf32>
    %180 = vector.shape_cast %177 : vector<28x28xf32> to vector<1x1x28x28xf32>
    tpu.vector_store %arg29[%c0_103, %c5, %c0_104, %c0_105], %180 {strides = array<i32>} : memref<1x8x28x28xf32, #tpu.memory_space<vmem>>, vector<1x1x28x28xf32>,
    %181 = arith.truncf %176 : vector<32x32xf32> to vector<32x32xbf16>
    %182 = vector.extract_strided_slice %137 {offsets = [32, 0], sizes = [32, 8], strides = [1, 1]} : vector<64x8xbf16> to vector<32x8xbf16>
    %cst_106 = arith.constant dense<0.000000e+00> : vector<32x8xf32>
    %183 = tpu.matmul %181, %182, %cst_106 {dimension_numbers = #tpu.dot_dimension_numbers<[1], [0], [0], [1], [0, 0, 1, 1], [], []>} : vector<32x32xbf16>, vector<32x8xbf16>, vector<32x8xf32> -> vector<32x8xf32>
    %184 = tpu.concatenate %160, %183 in 0 : vector<32x8xf32>, vector<32x8xf32> -> vector<64x8xf32>
    %185 = arith.truncf %184 : vector<64x8xf32> to vector<64x8xbf16>
    %c0_107 = arith.constant 0 : index
    %c1_108 = arith.constant 1 : index
    %c0_109 = arith.constant 0 : index
    %c0_110 = arith.constant 0 : index
    %186 = vector.load %arg16[%c0_107, %c1_108, %c0_109, %c0_110] : memref<1x4x8x32xbf16, #tpu.memory_space<vmem>>, vector<1x1x8x32xbf16>
    %187 = vector.shape_cast %186 : vector<1x1x8x32xbf16> to vector<8x32xbf16>
    %cst_111 = arith.constant dense<0.000000e+00> : vector<64x32xf32>
    %188 = tpu.matmul %185, %187, %cst_111 {dimension_numbers = #tpu.dot_dimension_numbers<[1], [0], [0], [1], [0, 0, 1, 1], [], []>} : vector<64x8xbf16>, vector<8x32xbf16>, vector<64x32xf32> -> vector<64x32xf32>
    %189 = arith.addf %113, %188 : vector<64x32xf32>
    %c0_112 = arith.constant 0 : index
    %c2 = arith.constant 2 : index
    %c0_113 = arith.constant 0 : index
    %c0_114 = arith.constant 0 : index
    %190 = vector.load %arg10[%c0_112, %c2, %c0_113, %c0_114] : memref<1x4x32x8xbf16, #tpu.memory_space<vmem>>, vector<1x1x32x8xbf16>
    %191 = vector.shape_cast %190 : vector<1x1x32x8xbf16> to vector<32x8xbf16>
    %cst_115 = arith.constant dense<0.000000e+00> : vector<64x8xf32>
    %192 = tpu.matmul %36, %191, %cst_115 {dimension_numbers = #tpu.dot_dimension_numbers<[1], [0], [0], [1], [0, 0, 1, 1], [], []>} : vector<64x32xbf16>, vector<32x8xbf16>, vector<64x8xf32> -> vector<64x8xf32>
    %c0_116 = arith.constant 0 : index
    %c2_117 = arith.constant 2 : index
    %c0_118 = arith.constant 0 : index
    %c0_119 = arith.constant 0 : index
    %193 = vector.load %arg11[%c0_116, %c2_117, %c0_118, %c0_119] : memref<1x4x1x8xf32, #tpu.memory_space<vmem>>, vector<1x1x1x8xf32>
    %194 = vector.shape_cast %193 : vector<1x1x1x8xf32> to vector<1x8xf32>
    %195 = vector.broadcast %194 : vector<1x8xf32> to vector<64x8xf32>
    %196 = arith.addf %192, %195 : vector<64x8xf32>
    %c0_120 = arith.constant 0 : index
    %c2_121 = arith.constant 2 : index
    %c0_122 = arith.constant 0 : index
    %c0_123 = arith.constant 0 : index
    %197 = vector.load %arg12[%c0_120, %c2_121, %c0_122, %c0_123] : memref<1x4x32x8xbf16, #tpu.memory_space<vmem>>, vector<1x1x32x8xbf16>
    %198 = vector.shape_cast %197 : vector<1x1x32x8xbf16> to vector<32x8xbf16>
    %cst_124 = arith.constant dense<0.000000e+00> : vector<64x8xf32>
    %199 = tpu.matmul %36, %198, %cst_124 {dimension_numbers = #tpu.dot_dimension_numbers<[1], [0], [0], [1], [0, 0, 1, 1], [], []>} : vector<64x32xbf16>, vector<32x8xbf16>, vector<64x8xf32> -> vector<64x8xf32>
    %c0_125 = arith.constant 0 : index
    %c2_126 = arith.constant 2 : index
    %c0_127 = arith.constant 0 : index
    %c0_128 = arith.constant 0 : index
    %200 = vector.load %arg13[%c0_125, %c2_126, %c0_127, %c0_128] : memref<1x4x1x8xf32, #tpu.memory_space<vmem>>, vector<1x1x1x8xf32>
    %201 = vector.shape_cast %200 : vector<1x1x1x8xf32> to vector<1x8xf32>
    %202 = vector.broadcast %201 : vector<1x8xf32> to vector<64x8xf32>
    %203 = arith.addf %199, %202 : vector<64x8xf32>
    %c0_129 = arith.constant 0 : index
    %c2_130 = arith.constant 2 : index
    %c0_131 = arith.constant 0 : index
    %c0_132 = arith.constant 0 : index
    %204 = vector.load %arg14[%c0_129, %c2_130, %c0_131, %c0_132] : memref<1x4x32x8xbf16, #tpu.memory_space<vmem>>, vector<1x1x32x8xbf16>
    %205 = vector.shape_cast %204 : vector<1x1x32x8xbf16> to vector<32x8xbf16>
    %cst_133 = arith.constant dense<0.000000e+00> : vector<64x8xf32>
    %206 = tpu.matmul %36, %205, %cst_133 {dimension_numbers = #tpu.dot_dimension_numbers<[1], [0], [0], [1], [0, 0, 1, 1], [], []>} : vector<64x32xbf16>, vector<32x8xbf16>, vector<64x8xf32> -> vector<64x8xf32>
    %c0_134 = arith.constant 0 : index
    %c2_135 = arith.constant 2 : index
    %c0_136 = arith.constant 0 : index
    %c0_137 = arith.constant 0 : index
    %207 = vector.load %arg15[%c0_134, %c2_135, %c0_136, %c0_137] : memref<1x4x1x8xf32, #tpu.memory_space<vmem>>, vector<1x1x1x8xf32>
    %208 = vector.shape_cast %207 : vector<1x1x1x8xf32> to vector<1x8xf32>
    %209 = vector.broadcast %208 : vector<1x8xf32> to vector<64x8xf32>
    %210 = arith.addf %206, %209 : vector<64x8xf32>
    %211 = arith.truncf %196 : vector<64x8xf32> to vector<64x8xbf16>
    %212 = arith.truncf %203 : vector<64x8xf32> to vector<64x8xbf16>
    %213 = arith.truncf %210 : vector<64x8xf32> to vector<64x8xbf16>
    %214 = vector.extract_strided_slice %211 {offsets = [0, 0], sizes = [32, 8], strides = [1, 1]} : vector<64x8xbf16> to vector<32x8xbf16>
    %215 = vector.extract_strided_slice %212 {offsets = [0, 0], sizes = [32, 8], strides = [1, 1]} : vector<64x8xbf16> to vector<32x8xbf16>
    %cst_138 = arith.constant dense<0.000000e+00> : vector<32x32xf32>
    %216 = tpu.matmul %214, %215, %cst_138 {dimension_numbers = #tpu.dot_dimension_numbers<[1], [1], [0], [0], [0, 0, 1, 0], [], []>} : vector<32x8xbf16>, vector<32x8xbf16>, vector<32x32xf32> -> vector<32x32xf32>
    %cst_139 = arith.constant 0.353553385 : f32
    %217 = vector.broadcast %cst_139 : f32 to vector<32x32xf32>
    %218 = arith.mulf %216, %217 : vector<32x32xf32>
    %219 = vector.broadcast %9 : vector<1x32xf32> to vector<32x32xf32>
    %220 = arith.addf %218, %219 : vector<32x32xf32>
    %cst_140 = arith.constant dense<0xFF800000> : vector<32xf32>
    %221 = vector.multi_reduction <maximumf>, %220, %cst_140 [1] : vector<32x32xf32> to vector<32xf32>
    %222 = vector.shape_cast %221 : vector<32xf32> to vector<32x1xf32>
    %223 = vector.broadcast %222 : vector<32x1xf32> to vector<32x32xf32>
    %224 = arith.subf %220, %223 : vector<32x32xf32>
    %225 = math.exp %224 : vector<32x32xf32>
    %cst_141 = arith.constant dense<0.000000e+00> : vector<32xf32>
    %226 = vector.multi_reduction <add>, %225, %cst_141 [1] : vector<32x32xf32> to vector<32xf32>
    %227 = vector.shape_cast %226 : vector<32xf32> to vector<32x1xf32>
    %228 = vector.broadcast %227 : vector<32x1xf32> to vector<32x32xf32>
    %229 = arith.divf %225, %228 : vector<32x32xf32>
    %230 = vector.extract_strided_slice %229 {offsets = [0, 0], sizes = [28, 28], strides = [1, 1]} : vector<32x32xf32> to vector<28x28xf32>
    %c0_142 = arith.constant 0 : index
    %c2_143 = arith.constant 2 : index
    %c0_144 = arith.constant 0 : index
    %c0_145 = arith.constant 0 : index
    %231 = vector.load %arg29[%c0_142, %c2_143, %c0_144, %c0_145] : memref<1x8x28x28xf32, #tpu.memory_space<vmem>>, vector<1x1x28x28xf32>
    %232 = vector.shape_cast %231 : vector<1x1x28x28xf32> to vector<28x28xf32>
    %233 = vector.shape_cast %230 : vector<28x28xf32> to vector<1x1x28x28xf32>
    tpu.vector_store %arg29[%c0_142, %c2_143, %c0_144, %c0_145], %233 {strides = array<i32>} : memref<1x8x28x28xf32, #tpu.memory_space<vmem>>, vector<1x1x28x28xf32>,
    %234 = arith.truncf %229 : vector<32x32xf32> to vector<32x32xbf16>
    %235 = vector.extract_strided_slice %213 {offsets = [0, 0], sizes = [32, 8], strides = [1, 1]} : vector<64x8xbf16> to vector<32x8xbf16>
    %cst_146 = arith.constant dense<0.000000e+00> : vector<32x8xf32>
    %236 = tpu.matmul %234, %235, %cst_146 {dimension_numbers = #tpu.dot_dimension_numbers<[1], [0], [0], [1], [0, 0, 1, 1], [], []>} : vector<32x32xbf16>, vector<32x8xbf16>, vector<32x8xf32> -> vector<32x8xf32>
    %237 = vector.extract_strided_slice %211 {offsets = [32, 0], sizes = [32, 8], strides = [1, 1]} : vector<64x8xbf16> to vector<32x8xbf16>
    %238 = vector.extract_strided_slice %212 {offsets = [32, 0], sizes = [32, 8], strides = [1, 1]} : vector<64x8xbf16> to vector<32x8xbf16>
    %cst_147 = arith.constant dense<0.000000e+00> : vector<32x32xf32>
    %239 = tpu.matmul %237, %238, %cst_147 {dimension_numbers = #tpu.dot_dimension_numbers<[1], [1], [0], [0], [0, 0, 1, 0], [], []>} : vector<32x8xbf16>, vector<32x8xbf16>, vector<32x32xf32> -> vector<32x32xf32>
    %cst_148 = arith.constant 0.353553385 : f32
    %240 = vector.broadcast %cst_148 : f32 to vector<32x32xf32>
    %241 = arith.mulf %239, %240 : vector<32x32xf32>
    %242 = vector.broadcast %9 : vector<1x32xf32> to vector<32x32xf32>
    %243 = arith.addf %241, %242 : vector<32x32xf32>
    %cst_149 = arith.constant dense<0xFF800000> : vector<32xf32>
    %244 = vector.multi_reduction <maximumf>, %243, %cst_149 [1] : vector<32x32xf32> to vector<32xf32>
    %245 = vector.shape_cast %244 : vector<32xf32> to vector<32x1xf32>
    %246 = vector.broadcast %245 : vector<32x1xf32> to vector<32x32xf32>
    %247 = arith.subf %243, %246 : vector<32x32xf32>
    %248 = math.exp %247 : vector<32x32xf32>
    %cst_150 = arith.constant dense<0.000000e+00> : vector<32xf32>
    %249 = vector.multi_reduction <add>, %248, %cst_150 [1] : vector<32x32xf32> to vector<32xf32>
    %250 = vector.shape_cast %249 : vector<32xf32> to vector<32x1xf32>
    %251 = vector.broadcast %250 : vector<32x1xf32> to vector<32x32xf32>
    %252 = arith.divf %248, %251 : vector<32x32xf32>
    %253 = vector.extract_strided_slice %252 {offsets = [0, 0], sizes = [28, 28], strides = [1, 1]} : vector<32x32xf32> to vector<28x28xf32>
    %c0_151 = arith.constant 0 : index
    %c6 = arith.constant 6 : index
    %c0_152 = arith.constant 0 : index
    %c0_153 = arith.constant 0 : index
    %254 = vector.load %arg29[%c0_151, %c6, %c0_152, %c0_153] : memref<1x8x28x28xf32, #tpu.memory_space<vmem>>, vector<1x1x28x28xf32>
    %255 = vector.shape_cast %254 : vector<1x1x28x28xf32> to vector<28x28xf32>
    %256 = vector.shape_cast %253 : vector<28x28xf32> to vector<1x1x28x28xf32>
    tpu.vector_store %arg29[%c0_151, %c6, %c0_152, %c0_153], %256 {strides = array<i32>} : memref<1x8x28x28xf32, #tpu.memory_space<vmem>>, vector<1x1x28x28xf32>,
    %257 = arith.truncf %252 : vector<32x32xf32> to vector<32x32xbf16>
    %258 = vector.extract_strided_slice %213 {offsets = [32, 0], sizes = [32, 8], strides = [1, 1]} : vector<64x8xbf16> to vector<32x8xbf16>
    %cst_154 = arith.constant dense<0.000000e+00> : vector<32x8xf32>
    %259 = tpu.matmul %257, %258, %cst_154 {dimension_numbers = #tpu.dot_dimension_numbers<[1], [0], [0], [1], [0, 0, 1, 1], [], []>} : vector<32x32xbf16>, vector<32x8xbf16>, vector<32x8xf32> -> vector<32x8xf32>
    %260 = tpu.concatenate %236, %259 in 0 : vector<32x8xf32>, vector<32x8xf32> -> vector<64x8xf32>
    %261 = arith.truncf %260 : vector<64x8xf32> to vector<64x8xbf16>
    %c0_155 = arith.constant 0 : index
    %c2_156 = arith.constant 2 : index
    %c0_157 = arith.constant 0 : index
    %c0_158 = arith.constant 0 : index
    %262 = vector.load %arg16[%c0_155, %c2_156, %c0_157, %c0_158] : memref<1x4x8x32xbf16, #tpu.memory_space<vmem>>, vector<1x1x8x32xbf16>
    %263 = vector.shape_cast %262 : vector<1x1x8x32xbf16> to vector<8x32xbf16>
    %cst_159 = arith.constant dense<0.000000e+00> : vector<64x32xf32>
    %264 = tpu.matmul %261, %263, %cst_159 {dimension_numbers = #tpu.dot_dimension_numbers<[1], [0], [0], [1], [0, 0, 1, 1], [], []>} : vector<64x8xbf16>, vector<8x32xbf16>, vector<64x32xf32> -> vector<64x32xf32>
    %265 = arith.addf %189, %264 : vector<64x32xf32>
    %c0_160 = arith.constant 0 : index
    %c3 = arith.constant 3 : index
    %c0_161 = arith.constant 0 : index
    %c0_162 = arith.constant 0 : index
    %266 = vector.load %arg10[%c0_160, %c3, %c0_161, %c0_162] : memref<1x4x32x8xbf16, #tpu.memory_space<vmem>>, vector<1x1x32x8xbf16>
    %267 = vector.shape_cast %266 : vector<1x1x32x8xbf16> to vector<32x8xbf16>
    %cst_163 = arith.constant dense<0.000000e+00> : vector<64x8xf32>
    %268 = tpu.matmul %36, %267, %cst_163 {dimension_numbers = #tpu.dot_dimension_numbers<[1], [0], [0], [1], [0, 0, 1, 1], [], []>} : vector<64x32xbf16>, vector<32x8xbf16>, vector<64x8xf32> -> vector<64x8xf32>
    %c0_164 = arith.constant 0 : index
    %c3_165 = arith.constant 3 : index
    %c0_166 = arith.constant 0 : index
    %c0_167 = arith.constant 0 : index
    %269 = vector.load %arg11[%c0_164, %c3_165, %c0_166, %c0_167] : memref<1x4x1x8xf32, #tpu.memory_space<vmem>>, vector<1x1x1x8xf32>
    %270 = vector.shape_cast %269 : vector<1x1x1x8xf32> to vector<1x8xf32>
    %271 = vector.broadcast %270 : vector<1x8xf32> to vector<64x8xf32>
    %272 = arith.addf %268, %271 : vector<64x8xf32>
    %c0_168 = arith.constant 0 : index
    %c3_169 = arith.constant 3 : index
    %c0_170 = arith.constant 0 : index
    %c0_171 = arith.constant 0 : index
    %273 = vector.load %arg12[%c0_168, %c3_169, %c0_170, %c0_171] : memref<1x4x32x8xbf16, #tpu.memory_space<vmem>>, vector<1x1x32x8xbf16>
    %274 = vector.shape_cast %273 : vector<1x1x32x8xbf16> to vector<32x8xbf16>
    %cst_172 = arith.constant dense<0.000000e+00> : vector<64x8xf32>
    %275 = tpu.matmul %36, %274, %cst_172 {dimension_numbers = #tpu.dot_dimension_numbers<[1], [0], [0], [1], [0, 0, 1, 1], [], []>} : vector<64x32xbf16>, vector<32x8xbf16>, vector<64x8xf32> -> vector<64x8xf32>
    %c0_173 = arith.constant 0 : index
    %c3_174 = arith.constant 3 : index
    %c0_175 = arith.constant 0 : index
    %c0_176 = arith.constant 0 : index
    %276 = vector.load %arg13[%c0_173, %c3_174, %c0_175, %c0_176] : memref<1x4x1x8xf32, #tpu.memory_space<vmem>>, vector<1x1x1x8xf32>
    %277 = vector.shape_cast %276 : vector<1x1x1x8xf32> to vector<1x8xf32>
    %278 = vector.broadcast %277 : vector<1x8xf32> to vector<64x8xf32>
    %279 = arith.addf %275, %278 : vector<64x8xf32>
    %c0_177 = arith.constant 0 : index
    %c3_178 = arith.constant 3 : index
    %c0_179 = arith.constant 0 : index
    %c0_180 = arith.constant 0 : index
    %280 = vector.load %arg14[%c0_177, %c3_178, %c0_179, %c0_180] : memref<1x4x32x8xbf16, #tpu.memory_space<vmem>>, vector<1x1x32x8xbf16>
    %281 = vector.shape_cast %280 : vector<1x1x32x8xbf16> to vector<32x8xbf16>
    %cst_181 = arith.constant dense<0.000000e+00> : vector<64x8xf32>
    %282 = tpu.matmul %36, %281, %cst_181 {dimension_numbers = #tpu.dot_dimension_numbers<[1], [0], [0], [1], [0, 0, 1, 1], [], []>} : vector<64x32xbf16>, vector<32x8xbf16>, vector<64x8xf32> -> vector<64x8xf32>
    %c0_182 = arith.constant 0 : index
    %c3_183 = arith.constant 3 : index
    %c0_184 = arith.constant 0 : index
    %c0_185 = arith.constant 0 : index
    %283 = vector.load %arg15[%c0_182, %c3_183, %c0_184, %c0_185] : memref<1x4x1x8xf32, #tpu.memory_space<vmem>>, vector<1x1x1x8xf32>
    %284 = vector.shape_cast %283 : vector<1x1x1x8xf32> to vector<1x8xf32>
    %285 = vector.broadcast %284 : vector<1x8xf32> to vector<64x8xf32>
    %286 = arith.addf %282, %285 : vector<64x8xf32>
    %287 = arith.truncf %272 : vector<64x8xf32> to vector<64x8xbf16>
    %288 = arith.truncf %279 : vector<64x8xf32> to vector<64x8xbf16>
    %289 = arith.truncf %286 : vector<64x8xf32> to vector<64x8xbf16>
    %290 = vector.extract_strided_slice %287 {offsets = [0, 0], sizes = [32, 8], strides = [1, 1]} : vector<64x8xbf16> to vector<32x8xbf16>
    %291 = vector.extract_strided_slice %288 {offsets = [0, 0], sizes = [32, 8], strides = [1, 1]} : vector<64x8xbf16> to vector<32x8xbf16>
    %cst_186 = arith.constant dense<0.000000e+00> : vector<32x32xf32>
    %292 = tpu.matmul %290, %291, %cst_186 {dimension_numbers = #tpu.dot_dimension_numbers<[1], [1], [0], [0], [0, 0, 1, 0], [], []>} : vector<32x8xbf16>, vector<32x8xbf16>, vector<32x32xf32> -> vector<32x32xf32>
    %cst_187 = arith.constant 0.353553385 : f32
    %293 = vector.broadcast %cst_187 : f32 to vector<32x32xf32>
    %294 = arith.mulf %292, %293 : vector<32x32xf32>
    %295 = vector.broadcast %9 : vector<1x32xf32> to vector<32x32xf32>
    %296 = arith.addf %294, %295 : vector<32x32xf32>
    %cst_188 = arith.constant dense<0xFF800000> : vector<32xf32>
    %297 = vector.multi_reduction <maximumf>, %296, %cst_188 [1] : vector<32x32xf32> to vector<32xf32>
    %298 = vector.shape_cast %297 : vector<32xf32> to vector<32x1xf32>
    %299 = vector.broadcast %298 : vector<32x1xf32> to vector<32x32xf32>
    %300 = arith.subf %296, %299 : vector<32x32xf32>
    %301 = math.exp %300 : vector<32x32xf32>
    %cst_189 = arith.constant dense<0.000000e+00> : vector<32xf32>
    %302 = vector.multi_reduction <add>, %301, %cst_189 [1] : vector<32x32xf32> to vector<32xf32>
    %303 = vector.shape_cast %302 : vector<32xf32> to vector<32x1xf32>
    %304 = vector.broadcast %303 : vector<32x1xf32> to vector<32x32xf32>
    %305 = arith.divf %301, %304 : vector<32x32xf32>
    %306 = vector.extract_strided_slice %305 {offsets = [0, 0], sizes = [28, 28], strides = [1, 1]} : vector<32x32xf32> to vector<28x28xf32>
    %c0_190 = arith.constant 0 : index
    %c3_191 = arith.constant 3 : index
    %c0_192 = arith.constant 0 : index
    %c0_193 = arith.constant 0 : index
    %307 = vector.load %arg29[%c0_190, %c3_191, %c0_192, %c0_193] : memref<1x8x28x28xf32, #tpu.memory_space<vmem>>, vector<1x1x28x28xf32>
    %308 = vector.shape_cast %307 : vector<1x1x28x28xf32> to vector<28x28xf32>
    %309 = vector.shape_cast %306 : vector<28x28xf32> to vector<1x1x28x28xf32>
    tpu.vector_store %arg29[%c0_190, %c3_191, %c0_192, %c0_193], %309 {strides = array<i32>} : memref<1x8x28x28xf32, #tpu.memory_space<vmem>>, vector<1x1x28x28xf32>,
    %310 = arith.truncf %305 : vector<32x32xf32> to vector<32x32xbf16>
    %311 = vector.extract_strided_slice %289 {offsets = [0, 0], sizes = [32, 8], strides = [1, 1]} : vector<64x8xbf16> to vector<32x8xbf16>
    %cst_194 = arith.constant dense<0.000000e+00> : vector<32x8xf32>
    %312 = tpu.matmul %310, %311, %cst_194 {dimension_numbers = #tpu.dot_dimension_numbers<[1], [0], [0], [1], [0, 0, 1, 1], [], []>} : vector<32x32xbf16>, vector<32x8xbf16>, vector<32x8xf32> -> vector<32x8xf32>
    %313 = vector.extract_strided_slice %287 {offsets = [32, 0], sizes = [32, 8], strides = [1, 1]} : vector<64x8xbf16> to vector<32x8xbf16>
    %314 = vector.extract_strided_slice %288 {offsets = [32, 0], sizes = [32, 8], strides = [1, 1]} : vector<64x8xbf16> to vector<32x8xbf16>
    %cst_195 = arith.constant dense<0.000000e+00> : vector<32x32xf32>
    %315 = tpu.matmul %313, %314, %cst_195 {dimension_numbers = #tpu.dot_dimension_numbers<[1], [1], [0], [0], [0, 0, 1, 0], [], []>} : vector<32x8xbf16>, vector<32x8xbf16>, vector<32x32xf32> -> vector<32x32xf32>
    %cst_196 = arith.constant 0.353553385 : f32
    %316 = vector.broadcast %cst_196 : f32 to vector<32x32xf32>
    %317 = arith.mulf %315, %316 : vector<32x32xf32>
    %318 = vector.broadcast %9 : vector<1x32xf32> to vector<32x32xf32>
    %319 = arith.addf %317, %318 : vector<32x32xf32>
    %cst_197 = arith.constant dense<0xFF800000> : vector<32xf32>
    %320 = vector.multi_reduction <maximumf>, %319, %cst_197 [1] : vector<32x32xf32> to vector<32xf32>
    %321 = vector.shape_cast %320 : vector<32xf32> to vector<32x1xf32>
    %322 = vector.broadcast %321 : vector<32x1xf32> to vector<32x32xf32>
    %323 = arith.subf %319, %322 : vector<32x32xf32>
    %324 = math.exp %323 : vector<32x32xf32>
    %cst_198 = arith.constant dense<0.000000e+00> : vector<32xf32>
    %325 = vector.multi_reduction <add>, %324, %cst_198 [1] : vector<32x32xf32> to vector<32xf32>
    %326 = vector.shape_cast %325 : vector<32xf32> to vector<32x1xf32>
    %327 = vector.broadcast %326 : vector<32x1xf32> to vector<32x32xf32>
    %328 = arith.divf %324, %327 : vector<32x32xf32>
    %329 = vector.extract_strided_slice %328 {offsets = [0, 0], sizes = [28, 28], strides = [1, 1]} : vector<32x32xf32> to vector<28x28xf32>
    %c0_199 = arith.constant 0 : index
    %c7 = arith.constant 7 : index
    %c0_200 = arith.constant 0 : index
    %c0_201 = arith.constant 0 : index
    %330 = vector.load %arg29[%c0_199, %c7, %c0_200, %c0_201] : memref<1x8x28x28xf32, #tpu.memory_space<vmem>>, vector<1x1x28x28xf32>
    %331 = vector.shape_cast %330 : vector<1x1x28x28xf32> to vector<28x28xf32>
    %332 = vector.shape_cast %329 : vector<28x28xf32> to vector<1x1x28x28xf32>
    tpu.vector_store %arg29[%c0_199, %c7, %c0_200, %c0_201], %332 {strides = array<i32>} : memref<1x8x28x28xf32, #tpu.memory_space<vmem>>, vector<1x1x28x28xf32>,
    %333 = arith.truncf %328 : vector<32x32xf32> to vector<32x32xbf16>
    %334 = vector.extract_strided_slice %289 {offsets = [32, 0], sizes = [32, 8], strides = [1, 1]} : vector<64x8xbf16> to vector<32x8xbf16>
    %cst_202 = arith.constant dense<0.000000e+00> : vector<32x8xf32>
    %335 = tpu.matmul %333, %334, %cst_202 {dimension_numbers = #tpu.dot_dimension_numbers<[1], [0], [0], [1], [0, 0, 1, 1], [], []>} : vector<32x32xbf16>, vector<32x8xbf16>, vector<32x8xf32> -> vector<32x8xf32>
    %336 = tpu.concatenate %312, %335 in 0 : vector<32x8xf32>, vector<32x8xf32> -> vector<64x8xf32>
    %337 = arith.truncf %336 : vector<64x8xf32> to vector<64x8xbf16>
    %c0_203 = arith.constant 0 : index
    %c3_204 = arith.constant 3 : index
    %c0_205 = arith.constant 0 : index
    %c0_206 = arith.constant 0 : index
    %338 = vector.load %arg16[%c0_203, %c3_204, %c0_205, %c0_206] : memref<1x4x8x32xbf16, #tpu.memory_space<vmem>>, vector<1x1x8x32xbf16>
    %339 = vector.shape_cast %338 : vector<1x1x8x32xbf16> to vector<8x32xbf16>
    %cst_207 = arith.constant dense<0.000000e+00> : vector<64x32xf32>
    %340 = tpu.matmul %337, %339, %cst_207 {dimension_numbers = #tpu.dot_dimension_numbers<[1], [0], [0], [1], [0, 0, 1, 1], [], []>} : vector<64x8xbf16>, vector<8x32xbf16>, vector<64x32xf32> -> vector<64x32xf32>
    %341 = arith.addf %265, %340 : vector<64x32xf32>
    %342 = arith.addf %3, %341 : vector<64x32xf32>
    %c0_208 = arith.constant 0 : index
    %c0_209 = arith.constant 0 : index
    %c0_210 = arith.constant 0 : index
    %343 = vector.load %arg17[%c0_208, %c0_209, %c0_210] : memref<1x1x32xf32, #tpu.memory_space<vmem>>, vector<1x1x32xf32>
    %344 = vector.shape_cast %343 : vector<1x1x32xf32> to vector<1x32xf32>
    %345 = vector.broadcast %344 : vector<1x32xf32> to vector<64x32xf32>
    %346 = arith.addf %342, %345 : vector<64x32xf32>
    %c0_211 = arith.constant 0 : index
    %c0_212 = arith.constant 0 : index
    %c0_213 = arith.constant 0 : index
    %347 = vector.load %arg18[%c0_211, %c0_212, %c0_213] : memref<1x1x32xf32, #tpu.memory_space<vmem>>, vector<1x1x32xf32>
    %348 = vector.shape_cast %347 : vector<1x1x32xf32> to vector<1x32xf32>
    %c0_214 = arith.constant 0 : index
    %c0_215 = arith.constant 0 : index
    %c0_216 = arith.constant 0 : index
    %349 = vector.load %arg19[%c0_214, %c0_215, %c0_216] : memref<1x1x32xf32, #tpu.memory_space<vmem>>, vector<1x1x32xf32>
    %350 = vector.shape_cast %349 : vector<1x1x32xf32> to vector<1x32xf32>
    %cst_217 = arith.constant dense<0.000000e+00> : vector<64xf32>
    %351 = vector.multi_reduction <add>, %346, %cst_217 [1] : vector<64x32xf32> to vector<64xf32>
    %352 = vector.shape_cast %351 : vector<64xf32> to vector<64x1xf32>
    %cst_218 = arith.constant 3.200000e+01 : f32
    %353 = vector.broadcast %cst_218 : f32 to vector<64x1xf32>
    %354 = arith.divf %352, %353 : vector<64x1xf32>
    %355 = vector.broadcast %354 : vector<64x1xf32> to vector<64x32xf32>
    %356 = arith.subf %346, %355 : vector<64x32xf32>
    %357 = arith.mulf %356, %356 : vector<64x32xf32>
    %cst_219 = arith.constant dense<0.000000e+00> : vector<64xf32>
    %358 = vector.multi_reduction <add>, %357, %cst_219 [1] : vector<64x32xf32> to vector<64xf32>
    %359 = vector.shape_cast %358 : vector<64xf32> to vector<64x1xf32>
    %cst_220 = arith.constant 3.200000e+01 : f32
    %360 = vector.broadcast %cst_220 : f32 to vector<64x1xf32>
    %361 = arith.divf %359, %360 : vector<64x1xf32>
    %362 = vector.broadcast %354 : vector<64x1xf32> to vector<64x32xf32>
    %363 = arith.subf %346, %362 : vector<64x32xf32>
    %cst_221 = arith.constant 9.99999974E-6 : f32
    %364 = vector.broadcast %cst_221 : f32 to vector<64x1xf32>
    %365 = arith.addf %361, %364 : vector<64x1xf32>
    %366 = math.rsqrt %365 : vector<64x1xf32>
    %367 = vector.broadcast %366 : vector<64x1xf32> to vector<64x32xf32>
    %368 = arith.mulf %363, %367 : vector<64x32xf32>
    %369 = vector.broadcast %348 : vector<1x32xf32> to vector<64x32xf32>
    %370 = arith.mulf %368, %369 : vector<64x32xf32>
    %371 = vector.broadcast %350 : vector<1x32xf32> to vector<64x32xf32>
    %372 = arith.addf %370, %371 : vector<64x32xf32>
    %373 = arith.truncf %372 : vector<64x32xf32> to vector<64x32xbf16>
    %c0_222 = arith.constant 0 : index
    %c0_223 = arith.constant 0 : index
    %c0_224 = arith.constant 0 : index
    %374 = vector.load %arg20[%c0_222, %c0_223, %c0_224] : memref<1x32x64xbf16, #tpu.memory_space<vmem>>, vector<1x32x64xbf16>
    %375 = vector.shape_cast %374 : vector<1x32x64xbf16> to vector<32x64xbf16>
    %cst_225 = arith.constant dense<0.000000e+00> : vector<64x64xf32>
    %376 = tpu.matmul %373, %375, %cst_225 {dimension_numbers = #tpu.dot_dimension_numbers<[1], [0], [0], [1], [0, 0, 1, 1], [], []>} : vector<64x32xbf16>, vector<32x64xbf16>, vector<64x64xf32> -> vector<64x64xf32>
    %c0_226 = arith.constant 0 : index
    %c0_227 = arith.constant 0 : index
    %c0_228 = arith.constant 0 : index
    %377 = vector.load %arg21[%c0_226, %c0_227, %c0_228] : memref<1x1x64xf32, #tpu.memory_space<vmem>>, vector<1x1x64xf32>
    %378 = vector.shape_cast %377 : vector<1x1x64xf32> to vector<1x64xf32>
    %379 = vector.broadcast %378 : vector<1x64xf32> to vector<64x64xf32>
    %380 = arith.addf %376, %379 : vector<64x64xf32>
    %cst_229 = arith.constant 5.000000e-01 : f32
    %381 = vector.broadcast %cst_229 : f32 to vector<64x64xf32>
    %382 = arith.mulf %381, %380 : vector<64x64xf32>
    %cst_230 = arith.constant 0.707106769 : f32
    %383 = vector.broadcast %cst_230 : f32 to vector<64x64xf32>
    %384 = arith.mulf %380, %383 : vector<64x64xf32>
    %cst_231 = arith.constant 0.000000e+00 : f32
    %385 = vector.broadcast %cst_231 : f32 to vector<64x64xf32>
    %386 = arith.cmpf oge, %384, %385 : vector<64x64xf32>
    %cst_232 = arith.constant 1.000000e+00 : f32
    %cst_233 = arith.constant -1.000000e+00 : f32
    %387 = vector.broadcast %cst_232 : f32 to vector<64x64xf32>
    %388 = vector.broadcast %cst_233 : f32 to vector<64x64xf32>
    %389 = arith.select %386, %387, %388 : vector<64x64xi1>, vector<64x64xf32>
    %390 = math.absf %384 : vector<64x64xf32>
    %cst_234 = arith.constant 0.327591091 : f32
    %391 = vector.broadcast %cst_234 : f32 to vector<64x64xf32>
    %392 = arith.mulf %391, %390 : vector<64x64xf32>
    %cst_235 = arith.constant 1.000000e+00 : f32
    %393 = vector.broadcast %cst_235 : f32 to vector<64x64xf32>
    %394 = arith.addf %393, %392 : vector<64x64xf32>
    %cst_236 = arith.constant 1.000000e+00 : f32
    %395 = vector.broadcast %cst_236 : f32 to vector<64x64xf32>
    %396 = arith.divf %395, %394 : vector<64x64xf32>
    %cst_237 = arith.constant 1.06140542 : f32
    %397 = vector.broadcast %cst_237 : f32 to vector<64x64xf32>
    %398 = arith.mulf %397, %396 : vector<64x64xf32>
    %cst_238 = arith.constant -1.45315206 : f32
    %399 = vector.broadcast %cst_238 : f32 to vector<64x64xf32>
    %400 = arith.addf %398, %399 : vector<64x64xf32>
    %401 = arith.mulf %400, %396 : vector<64x64xf32>
    %cst_239 = arith.constant 1.42141378 : f32
    %402 = vector.broadcast %cst_239 : f32 to vector<64x64xf32>
    %403 = arith.addf %401, %402 : vector<64x64xf32>
    %404 = arith.mulf %403, %396 : vector<64x64xf32>
    %cst_240 = arith.constant -0.284496725 : f32
    %405 = vector.broadcast %cst_240 : f32 to vector<64x64xf32>
    %406 = arith.addf %404, %405 : vector<64x64xf32>
    %407 = arith.mulf %406, %396 : vector<64x64xf32>
    %cst_241 = arith.constant 0.254829586 : f32
    %408 = vector.broadcast %cst_241 : f32 to vector<64x64xf32>
    %409 = arith.addf %407, %408 : vector<64x64xf32>
    %410 = arith.mulf %409, %396 : vector<64x64xf32>
    %cst_242 = arith.constant 0.000000e+00 : f32
    %411 = vector.broadcast %cst_242 : f32 to vector<64x64xf32>
    %412 = arith.subf %411, %390 : vector<64x64xf32>
    %413 = arith.mulf %412, %390 : vector<64x64xf32>
    %414 = math.exp %413 : vector<64x64xf32>
    %415 = arith.mulf %410, %414 : vector<64x64xf32>
    %cst_243 = arith.constant 1.000000e+00 : f32
    %416 = vector.broadcast %cst_243 : f32 to vector<64x64xf32>
    %417 = arith.subf %416, %415 : vector<64x64xf32>
    %418 = arith.mulf %389, %417 : vector<64x64xf32>
    %cst_244 = arith.constant 1.000000e+00 : f32
    %419 = vector.broadcast %cst_244 : f32 to vector<64x64xf32>
    %420 = arith.addf %419, %418 : vector<64x64xf32>
    %421 = arith.mulf %382, %420 : vector<64x64xf32>
    %422 = arith.truncf %421 : vector<64x64xf32> to vector<64x64xbf16>
    %c0_245 = arith.constant 0 : index
    %c0_246 = arith.constant 0 : index
    %c0_247 = arith.constant 0 : index
    %423 = vector.load %arg22[%c0_245, %c0_246, %c0_247] : memref<1x64x32xbf16, #tpu.memory_space<vmem>>, vector<1x64x32xbf16>
    %424 = vector.shape_cast %423 : vector<1x64x32xbf16> to vector<64x32xbf16>
    %cst_248 = arith.constant dense<0.000000e+00> : vector<64x32xf32>
    %425 = tpu.matmul %422, %424, %cst_248 {dimension_numbers = #tpu.dot_dimension_numbers<[1], [0], [0], [1], [0, 0, 1, 1], [], []>} : vector<64x64xbf16>, vector<64x32xbf16>, vector<64x32xf32> -> vector<64x32xf32>
    %c0_249 = arith.constant 0 : index
    %c0_250 = arith.constant 0 : index
    %c0_251 = arith.constant 0 : index
    %426 = vector.load %arg23[%c0_249, %c0_250, %c0_251] : memref<1x1x32xf32, #tpu.memory_space<vmem>>, vector<1x1x32xf32>
    %427 = vector.shape_cast %426 : vector<1x1x32xf32> to vector<1x32xf32>
    %428 = vector.broadcast %427 : vector<1x32xf32> to vector<64x32xf32>
    %429 = arith.addf %425, %428 : vector<64x32xf32>
    %430 = arith.addf %346, %429 : vector<64x32xf32>
    %c0_252 = arith.constant 0 : index
    %c0_253 = arith.constant 0 : index
    %431 = vector.load %arg30[%c0_252, %c0_253] : memref<64x32xf32, #tpu.memory_space<vmem>>, vector<64x32xf32>
    tpu.vector_store %arg30[%c0_252, %c0_253], %430 {strides = array<i32>} : memref<64x32xf32, #tpu.memory_space<vmem>>, vector<64x32xf32>,
    %c1_i32 = arith.constant 1 : i32
    %432 = arith.cmpi eq, %arg0, %c1_i32 : i32
    %433 = arith.extui %432 : i1 to i32
    %c0_i32_254 = arith.constant 0 : i32
    %434 = arith.cmpi ne, %433, %c0_i32_254 : i32
    scf.if %434 {
      %435 = vector.extract_strided_slice %430 {offsets = [0, 0], sizes = [28, 32], strides = [1, 1]} : vector<64x32xf32> to vector<28x32xf32>
      %cst_255 = arith.constant dense<0.000000e+00> : vector<32xf32>
      %436 = vector.multi_reduction <add>, %435, %cst_255 [0] : vector<28x32xf32> to vector<32xf32>
      %437 = vector.shape_cast %436 : vector<32xf32> to vector<1x32xf32>
      %cst_256 = arith.constant 0.0357142873 : f32
      %438 = vector.broadcast %cst_256 : f32 to vector<1x32xf32>
      %439 = arith.mulf %437, %438 : vector<1x32xf32>
      %440 = vector.extract_strided_slice %430 {offsets = [32, 0], sizes = [28, 32], strides = [1, 1]} : vector<64x32xf32> to vector<28x32xf32>
      %cst_257 = arith.constant dense<0.000000e+00> : vector<32xf32>
      %441 = vector.multi_reduction <add>, %440, %cst_257 [0] : vector<28x32xf32> to vector<32xf32>
      %442 = vector.shape_cast %441 : vector<32xf32> to vector<1x32xf32>
      %cst_258 = arith.constant 0.0357142873 : f32
      %443 = vector.broadcast %cst_258 : f32 to vector<1x32xf32>
      %444 = arith.mulf %442, %443 : vector<1x32xf32>
      %445 = tpu.concatenate %439, %444 in 0 : vector<1x32xf32>, vector<1x32xf32> -> vector<2x32xf32>
      %c0_259 = arith.constant 0 : index
      %c0_260 = arith.constant 0 : index
      %446 = vector.load %arg24[%c0_259, %c0_260] : memref<1x32xf32, #tpu.memory_space<vmem>>, vector<1x32xf32>
      %c0_261 = arith.constant 0 : index
      %c0_262 = arith.constant 0 : index
      %447 = vector.load %arg25[%c0_261, %c0_262] : memref<1x32xf32, #tpu.memory_space<vmem>>, vector<1x32xf32>
      %cst_263 = arith.constant dense<0.000000e+00> : vector<2xf32>
      %448 = vector.multi_reduction <add>, %445, %cst_263 [1] : vector<2x32xf32> to vector<2xf32>
      %449 = vector.shape_cast %448 : vector<2xf32> to vector<2x1xf32>
      %cst_264 = arith.constant 3.200000e+01 : f32
      %450 = vector.broadcast %cst_264 : f32 to vector<2x1xf32>
      %451 = arith.divf %449, %450 : vector<2x1xf32>
      %452 = vector.broadcast %451 : vector<2x1xf32> to vector<2x32xf32>
      %453 = arith.subf %445, %452 : vector<2x32xf32>
      %454 = arith.mulf %453, %453 : vector<2x32xf32>
      %cst_265 = arith.constant dense<0.000000e+00> : vector<2xf32>
      %455 = vector.multi_reduction <add>, %454, %cst_265 [1] : vector<2x32xf32> to vector<2xf32>
      %456 = vector.shape_cast %455 : vector<2xf32> to vector<2x1xf32>
      %cst_266 = arith.constant 3.200000e+01 : f32
      %457 = vector.broadcast %cst_266 : f32 to vector<2x1xf32>
      %458 = arith.divf %456, %457 : vector<2x1xf32>
      %459 = vector.broadcast %451 : vector<2x1xf32> to vector<2x32xf32>
      %460 = arith.subf %445, %459 : vector<2x32xf32>
      %cst_267 = arith.constant 9.99999974E-6 : f32
      %461 = vector.broadcast %cst_267 : f32 to vector<2x1xf32>
      %462 = arith.addf %458, %461 : vector<2x1xf32>
      %463 = math.rsqrt %462 : vector<2x1xf32>
      %464 = vector.broadcast %463 : vector<2x1xf32> to vector<2x32xf32>
      %465 = arith.mulf %460, %464 : vector<2x32xf32>
      %466 = vector.broadcast %446 : vector<1x32xf32> to vector<2x32xf32>
      %467 = arith.mulf %465, %466 : vector<2x32xf32>
      %468 = vector.broadcast %447 : vector<1x32xf32> to vector<2x32xf32>
      %469 = arith.addf %467, %468 : vector<2x32xf32>
      %470 = arith.truncf %469 : vector<2x32xf32> to vector<2x32xbf16>
      %c0_268 = arith.constant 0 : index
      %c0_269 = arith.constant 0 : index
      %471 = vector.load %arg26[%c0_268, %c0_269] : memref<32x3xbf16, #tpu.memory_space<vmem>>, vector<32x3xbf16>
      %cst_270 = arith.constant dense<0.000000e+00> : vector<2x3xf32>
      %472 = tpu.matmul %470, %471, %cst_270 {dimension_numbers = #tpu.dot_dimension_numbers<[1], [0], [0], [1], [0, 0, 1, 1], [], []>} : vector<2x32xbf16>, vector<32x3xbf16>, vector<2x3xf32> -> vector<2x3xf32>
      %c0_271 = arith.constant 0 : index
      %c0_272 = arith.constant 0 : index
      %473 = vector.load %arg27[%c0_271, %c0_272] : memref<1x3xf32, #tpu.memory_space<vmem>>, vector<1x3xf32>
      %474 = vector.broadcast %473 : vector<1x3xf32> to vector<2x3xf32>
      %475 = arith.addf %472, %474 : vector<2x3xf32>
      %c0_273 = arith.constant 0 : index
      %c0_274 = arith.constant 0 : index
      %476 = vector.load %arg28[%c0_273, %c0_274] : memref<2x3xf32, #tpu.memory_space<vmem>>, vector<2x3xf32>
      tpu.vector_store %arg28[%c0_273, %c0_274], %475 {strides = array<i32>} : memref<2x3xf32, #tpu.memory_space<vmem>>, vector<2x3xf32>,
    } else {
    }
    return
  }
  func.func @transform_0(%arg0: i32) -> (i32, i32, i32) {
    %c0_i32 = arith.constant 0 : i32
    %c0_i32_0 = arith.constant 0 : i32
    %c0_i32_1 = arith.constant 0 : i32
    %c0_i32_2 = arith.constant 0 : i32
    return %c0_i32, %c0_i32_0, %c0_i32_1 : i32, i32, i32
  }
  func.func @transform_1(%arg0: i32) -> (i32, i32, i32) {
    %c0_i32 = arith.constant 0 : i32
    %c0_i32_0 = arith.constant 0 : i32
    %c0_i32_1 = arith.constant 0 : i32
    %c0_i32_2 = arith.constant 0 : i32
    return %c0_i32, %c0_i32_0, %c0_i32_1 : i32, i32, i32
  }
  func.func @transform_2(%arg0: i32) -> (i32, i32) {
    %c0_i32 = arith.constant 0 : i32
    %c0_i32_0 = arith.constant 0 : i32
    %c0_i32_1 = arith.constant 0 : i32
    return %c0_i32, %c0_i32_0 : i32, i32
  }
  func.func @transform_3(%arg0: i32) -> (i32, i32) {
    %c0_i32 = arith.constant 0 : i32
    %c0_i32_0 = arith.constant 0 : i32
    %c0_i32_1 = arith.constant 0 : i32
    return %c0_i32, %c0_i32_0 : i32, i32
  }
  func.func @transform_4(%arg0: i32) -> (i32, i32) {
    %c0_i32 = arith.constant 0 : i32
    %c0_i32_0 = arith.constant 0 : i32
    %c0_i32_1 = arith.constant 0 : i32
    return %c0_i32, %c0_i32_0 : i32, i32
  }
  func.func @transform_5(%arg0: i32) -> (i32, i32) {
    %c0_i32 = arith.constant 0 : i32
    %c0_i32_0 = arith.constant 0 : i32
    %c0_i32_1 = arith.constant 0 : i32
    return %c0_i32, %c0_i32_0 : i32, i32
  }
  func.func @transform_6(%arg0: i32) -> (i32, i32) {
    %c0_i32 = arith.constant 0 : i32
    %c0_i32_0 = arith.constant 0 : i32
    %c0_i32_1 = arith.constant 0 : i32
    return %c0_i32, %c0_i32_0 : i32, i32
  }
  func.func @transform_7(%arg0: i32) -> (i32, i32, i32) {
    %c0_i32 = arith.constant 0 : i32
    %c0_i32_0 = arith.constant 0 : i32
    %c0_i32_1 = arith.constant 0 : i32
    return %arg0, %c0_i32, %c0_i32_0 : i32, i32, i32
  }
  func.func @transform_8(%arg0: i32) -> (i32, i32, i32) {
    %c0_i32 = arith.constant 0 : i32
    %c0_i32_0 = arith.constant 0 : i32
    %c0_i32_1 = arith.constant 0 : i32
    return %arg0, %c0_i32, %c0_i32_0 : i32, i32, i32
  }
  func.func @transform_9(%arg0: i32) -> (i32, i32, i32, i32) {
    %c0_i32 = arith.constant 0 : i32
    %c0_i32_0 = arith.constant 0 : i32
    %c0_i32_1 = arith.constant 0 : i32
    %c0_i32_2 = arith.constant 0 : i32
    return %arg0, %c0_i32, %c0_i32_0, %c0_i32_1 : i32, i32, i32, i32
  }
  func.func @transform_10(%arg0: i32) -> (i32, i32, i32, i32) {
    %c0_i32 = arith.constant 0 : i32
    %c0_i32_0 = arith.constant 0 : i32
    %c0_i32_1 = arith.constant 0 : i32
    %c0_i32_2 = arith.constant 0 : i32
    return %arg0, %c0_i32, %c0_i32_0, %c0_i32_1 : i32, i32, i32, i32
  }
  func.func @transform_11(%arg0: i32) -> (i32, i32, i32, i32) {
    %c0_i32 = arith.constant 0 : i32
    %c0_i32_0 = arith.constant 0 : i32
    %c0_i32_1 = arith.constant 0 : i32
    %c0_i32_2 = arith.constant 0 : i32
    return %arg0, %c0_i32, %c0_i32_0, %c0_i32_1 : i32, i32, i32, i32
  }
  func.func @transform_12(%arg0: i32) -> (i32, i32, i32, i32) {
    %c0_i32 = arith.constant 0 : i32
    %c0_i32_0 = arith.constant 0 : i32
    %c0_i32_1 = arith.constant 0 : i32
    %c0_i32_2 = arith.constant 0 : i32
    return %arg0, %c0_i32, %c0_i32_0, %c0_i32_1 : i32, i32, i32, i32
  }
  func.func @transform_13(%arg0: i32) -> (i32, i32, i32, i32) {
    %c0_i32 = arith.constant 0 : i32
    %c0_i32_0 = arith.constant 0 : i32
    %c0_i32_1 = arith.constant 0 : i32
    %c0_i32_2 = arith.constant 0 : i32
    return %arg0, %c0_i32, %c0_i32_0, %c0_i32_1 : i32, i32, i32, i32
  }
  func.func @transform_14(%arg0: i32) -> (i32, i32, i32, i32) {
    %c0_i32 = arith.constant 0 : i32
    %c0_i32_0 = arith.constant 0 : i32
    %c0_i32_1 = arith.constant 0 : i32
    %c0_i32_2 = arith.constant 0 : i32
    return %arg0, %c0_i32, %c0_i32_0, %c0_i32_1 : i32, i32, i32, i32
  }
  func.func @transform_15(%arg0: i32) -> (i32, i32, i32, i32) {
    %c0_i32 = arith.constant 0 : i32
    %c0_i32_0 = arith.constant 0 : i32
    %c0_i32_1 = arith.constant 0 : i32
    %c0_i32_2 = arith.constant 0 : i32
    return %arg0, %c0_i32, %c0_i32_0, %c0_i32_1 : i32, i32, i32, i32
  }
  func.func @transform_16(%arg0: i32) -> (i32, i32, i32) {
    %c0_i32 = arith.constant 0 : i32
    %c0_i32_0 = arith.constant 0 : i32
    %c0_i32_1 = arith.constant 0 : i32
    return %arg0, %c0_i32, %c0_i32_0 : i32, i32, i32
  }
  func.func @transform_17(%arg0: i32) -> (i32, i32, i32) {
    %c0_i32 = arith.constant 0 : i32
    %c0_i32_0 = arith.constant 0 : i32
    %c0_i32_1 = arith.constant 0 : i32
    return %arg0, %c0_i32, %c0_i32_0 : i32, i32, i32
  }
  func.func @transform_18(%arg0: i32) -> (i32, i32, i32) {
    %c0_i32 = arith.constant 0 : i32
    %c0_i32_0 = arith.constant 0 : i32
    %c0_i32_1 = arith.constant 0 : i32
    return %arg0, %c0_i32, %c0_i32_0 : i32, i32, i32
  }
  func.func @transform_19(%arg0: i32) -> (i32, i32, i32) {
    %c0_i32 = arith.constant 0 : i32
    %c0_i32_0 = arith.constant 0 : i32
    %c0_i32_1 = arith.constant 0 : i32
    return %arg0, %c0_i32, %c0_i32_0 : i32, i32, i32
  }
  func.func @transform_20(%arg0: i32) -> (i32, i32, i32) {
    %c0_i32 = arith.constant 0 : i32
    %c0_i32_0 = arith.constant 0 : i32
    %c0_i32_1 = arith.constant 0 : i32
    return %arg0, %c0_i32, %c0_i32_0 : i32, i32, i32
  }
  func.func @transform_21(%arg0: i32) -> (i32, i32, i32) {
    %c0_i32 = arith.constant 0 : i32
    %c0_i32_0 = arith.constant 0 : i32
    %c0_i32_1 = arith.constant 0 : i32
    return %arg0, %c0_i32, %c0_i32_0 : i32, i32, i32
  }
  func.func @transform_22(%arg0: i32) -> (i32, i32, i32) {
    %c0_i32 = arith.constant 0 : i32
    %c0_i32_0 = arith.constant 0 : i32
    %c0_i32_1 = arith.constant 0 : i32
    return %arg0, %c0_i32, %c0_i32_0 : i32, i32, i32
  }
  func.func @transform_23(%arg0: i32) -> (i32, i32) {
    %c0_i32 = arith.constant 0 : i32
    %c0_i32_0 = arith.constant 0 : i32
    %c0_i32_1 = arith.constant 0 : i32
    return %c0_i32, %c0_i32_0 : i32, i32
  }
  func.func @transform_24(%arg0: i32) -> (i32, i32) {
    %c0_i32 = arith.constant 0 : i32
    %c0_i32_0 = arith.constant 0 : i32
    %c0_i32_1 = arith.constant 0 : i32
    return %c0_i32, %c0_i32_0 : i32, i32
  }
  func.func @transform_25(%arg0: i32) -> (i32, i32) {
    %c0_i32 = arith.constant 0 : i32
    %c0_i32_0 = arith.constant 0 : i32
    %c0_i32_1 = arith.constant 0 : i32
    return %c0_i32, %c0_i32_0 : i32, i32
  }
  func.func @transform_26(%arg0: i32) -> (i32, i32) {
    %c0_i32 = arith.constant 0 : i32
    %c0_i32_0 = arith.constant 0 : i32
    %c0_i32_1 = arith.constant 0 : i32
    return %c0_i32, %c0_i32_0 : i32, i32
  }
  func.func @transform_27(%arg0: i32) -> (i32, i32) {
    %c0_i32 = arith.constant 0 : i32
    %c0_i32_0 = arith.constant 0 : i32
    %c0_i32_1 = arith.constant 0 : i32
    return %c0_i32, %c0_i32_0 : i32, i32
  }
  func.func @transform_28(%arg0: i32) -> (i32, i32, i32, i32) {
    %c0_i32 = arith.constant 0 : i32
    %c0_i32_0 = arith.constant 0 : i32
    %c0_i32_1 = arith.constant 0 : i32
    %c0_i32_2 = arith.constant 0 : i32
    return %arg0, %c0_i32, %c0_i32_0, %c0_i32_1 : i32, i32, i32, i32
  }
}

</mosaic_0001>

<bundles_post_ra>
// kernel: base_transformer_forward.1
= control target key start
LH: loop header
LB: loop body
LE: loop exit
PB: predicated region body
PF: predicated region fallthrough
CT: control target
= control target key end

     0   :  { %s7657_s0 = inlined_call_operand.vmem [shape: f32[2,24,1], index: 0, kind: input, shape index: {}]   ;;  %s7658_s1 = inlined_call_operand.vmem [shape: f32[2,4,1], index: 1, kind: input, shape index: {}]   ;;  %s7659_s2 = inlined_call_operand.vmem [shape: f32[24,32], index: 2, kind: input, shape index: {}]   ;;  %s7660_s3 = inlined_call_operand.vmem [shape: f32[1,32], index: 3, kind: input, shape index: {}]   ;;  %s7661_s4 = inlined_call_operand.vmem [shape: f32[1,32], index: 4, kind: input, shape index: {}]   ;;  %s7662_s5 = inlined_call_operand.vmem [shape: f32[1,32], index: 5, kind: input, shape index: {}]   ;;  %s7663_s6 = inlined_call_operand.vmem [shape: f32[1,32], index: 6, kind: input, shape index: {}]   ;;  %s7664_s7 = inlined_call_operand.vmem [shape: f32[2,1,32], index: 7, kind: input, shape index: {}]   ;;  %s7665_s8 = inlined_call_operand.vmem [shape: f32[2,1,32], index: 8, kind: input, shape index: {}]   ;;  %s7666_s9 = inlined_call_operand.vmem [shape: bf16[2,4,32,8], index: 9, kind: input, shape index: {}]   ;;  %s7667_s10 = inlined_call_operand.vmem [shape: f32[2,4,1,8], index: 10, kind: input, shape index: {}]   ;;  %s7668_s11 = inlined_call_operand.vmem [shape: bf16[2,4,32,8], index: 11, kind: input, shape index: {}]   ;;  %s7669_s12 = inlined_call_operand.vmem [shape: f32[2,4,1,8], index: 12, kind: input, shape index: {}]   ;;  %s7670_s13 = inlined_call_operand.vmem [shape: bf16[2,4,32,8], index: 13, kind: input, shape index: {}]   ;;  %s7671_s14 = inlined_call_operand.vmem [shape: f32[2,4,1,8], index: 14, kind: input, shape index: {}]   ;;  %s7672_s15 = inlined_call_operand.vmem [shape: bf16[2,4,8,32], index: 15, kind: input, shape index: {}]   ;;  %s7673_s16 = inlined_call_operand.vmem [shape: f32[2,1,32], index: 16, kind: input, shape index: {}]   ;;  %s7674_s17 = inlined_call_operand.vmem [shape: f32[2,1,32], index: 17, kind: input, shape index: {}]   ;;  %s7675_s18 = inlined_call_operand.vmem [shape: f32[2,1,32], index: 18, kind: input, shape index: {}]   ;;  %s7676_s19 = inlined_call_operand.vmem [shape: bf16[2,32,64], index: 19, kind: input, shape index: {}]   ;;  %s7677_s20 = inlined_call_operand.vmem [shape: f32[2,1,64], index: 20, kind: input, shape index: {}]   ;;  %s7678_s21 = inlined_call_operand.vmem [shape: bf16[2,64,32], index: 21, kind: input, shape index: {}]   ;;  %s7679_s22 = inlined_call_operand.vmem [shape: f32[2,1,32], index: 22, kind: input, shape index: {}]   ;;  %s7680_s23 = inlined_call_operand.vmem [shape: f32[1,32], index: 23, kind: input, shape index: {}]   ;;  %s7681_s24 = inlined_call_operand.vmem [shape: f32[1,32], index: 24, kind: input, shape index: {}]   ;;  %s7682_s25 = inlined_call_operand.vmem [shape: bf16[32,3], index: 25, kind: input, shape index: {}]   ;;  %s7683_s26 = inlined_call_operand.vmem [shape: f32[1,3], index: 26, kind: input, shape index: {}]   ;;  %s7684_s27 = inlined_call_operand.hbm [shape: f32[2,3], index: 27, kind: output, shape index: {0}]   ;;  %s7685_s28 = inlined_call_operand.vmem [shape: f32[2,8,28,28], index: 28, kind: output, shape index: {1}]  }
   0x1   :  { %7695 = sst [smem:[#allocation10_spill]] %s7657_s0 }
   0x2   :  { %7696 = sst [smem:[#allocation11_spill]] %s7658_s1 }
   0x3   :  { %7697 = sst [smem:[#allocation12_spill]] %s7659_s2 }
   0x4   :  { %7698 = sst [smem:[#allocation13_spill]] %s7660_s3 }
   0x5   :  { %7699 = sst [smem:[#allocation14_spill]] %s7661_s4 }
   0x6   :  { %7700 = sst [smem:[#allocation15_spill]] %s7662_s5 }
   0x7   :  { %7701 = sst [smem:[#allocation16_spill]] %s7663_s6 }
   0x8   :  { %7702 = sst [smem:[#allocation17_spill]] %s7664_s7 }
   0x9   :  { %7703 = sst [smem:[#allocation18_spill]] %s7665_s8 }
   0xa   :  { %7704 = sst [smem:[#allocation19_spill]] %s7666_s9 }
   0xb   :  { %7705 = sst [smem:[#allocation20_spill]] %s7667_s10 }
   0xc   :  { %7706 = sst [smem:[#allocation21_spill]] %s7668_s11 }
   0xd   :  { %7707 = sst [smem:[#allocation22_spill]] %s7669_s12 }
   0xe   :  { %7708 = sst [smem:[#allocation23_spill]] %s7670_s13 }
   0xf   :  { %7709 = sst [smem:[#allocation24_spill]] %s7671_s14 }
  0x10   :  { %7710 = sst [smem:[#allocation25_spill]] %s7672_s15 }
  0x11   :  { %7711 = sst [smem:[#allocation26_spill]] %s7680_s23 }
  0x12   :  { %7712 = sst [smem:[#allocation27_spill]] %s7681_s24 }
  0x13   :  { %7713 = sst [smem:[#allocation28_spill]] %s7682_s25 }
  0x14   :  { %7714 = sst [smem:[#allocation29_spill]] %s7683_s26 }
  0x15   :  { %7715 = sst [smem:[#allocation30_spill]] %s7684_s27 }
  0x16   :  { %34 = vsyncpa [#allocation4], 0  ;;  %s6544_s8 = smov 0  }
  0x17 LB: > { %7716 = sst [smem:[#allocation6_spill]] %s6390_s8  ;;  %s6550_s5 = sadd.s32 4294967295, %s6390_s8   ;;  %s6390_s8 = sphi %s6544_s8, %s40_s8  }
  0x18   : > { %p5258_p0 = scmp.ge.s32.totalorder %s6390_s8, 1  ;;  %p894_p1 = scmp.lt.s32.totalorder %s6390_s8, 3 }
  0x1a   : > { %p895_p2 = pnand %p5258_p0, %p894_p1 }
  0x1c   : > { %898 = sbr.rel (%p895_p2) target bundleno = 5753 (0x1679), region = 128 }
  0x23   : > { %p1026_p3 = scmp.lt.s32.totalorder %s6550_s5, 1  ;;  %s7719_s8 = sld [smem:[#allocation19_spill]] }
  0x24   : > { %s7721_s26 = sld [smem:[#allocation20_spill]]  ;;  %s7723_s0 = sld [smem:[#allocation21_spill]] }
  0x25   : > { %s6556_s9 = scalar_select %p1026_p3, %s6550_s5, 1 }
  0x26   : > { %s7725_s23 = sld [smem:[#allocation22_spill]]  ;;  %s7726_s13 = sld [smem:[#allocation23_spill]] }
  0x27   : > { %s5525_s7 = sshll.u32 %s6556_s9, 6  ;;  %s5261_s12 = sshll.u32 %s6556_s9, 2 }
  0x28   : > { %s7727_s14 = sld [smem:[#allocation24_spill]]  ;;  %s5528_s3 = sshll.u32 %s6556_s9, 4 }
  0x29   : > { %s6571_s30 = scalar_lea.vmem %s7719_s8, %s5525_s7  ;;  %s7728_s15 = sld [smem:[#allocation25_spill]] }
  0x2a   : > { %7720 = sst [smem:[#allocation7_spill]] %s6571_s30  ;;  %s6576_s24 = scalar_lea.vmem %s7721_s26, %s5261_s12 }
  0x2b   : > { %7722 = sst [smem:[#allocation8_spill]] %s6576_s24  ;;  %s6581_s11 = scalar_lea.vmem %s7723_s0, %s5525_s7 }
  0x2c   : > { %7724 = sst [smem:[#allocation9_spill]] %s6581_s11  ;;  %s6586_s25 = scalar_lea.vmem %s7725_s23, %s5261_s12 }
  0x2d   : > { %s6591_s8 = scalar_lea.vmem %s7726_s13, %s5525_s7  ;;  %s6619_s13 = scalar_lea.vmem %s7676_s19, %s5528_s3 }
  0x2e   : > { %s6596_s26 = scalar_lea.vmem %s7727_s14, %s5261_s12  ;;  %s1080_s6 = scalar_lea.vmem %s7677_s20, %s6556_s9 }
  0x2f   : > { %s6606_s23 = scalar_lea.vmem %s7728_s15, %s5528_s3  ;;  %s5530_s11 = sshll.u32 %s6556_s9, 5 }
  0x30   : > { %s6629_s15 = scalar_lea.vmem %s7678_s21, %s5530_s11  ;;  %s5531_s4 = sshll.u32 %s6556_s9, 8 }
  0x31   : > { %s6639_s3 = scalar_lea.vmem %s7685_s28, %s5531_s4  ;;  %p5276_p4 = scmp.ne.s32.totalorder %s6550_s5, 0 }
  0x32   : > { %s7729_s24 = sld [smem:[#allocation10_spill]] (!%p5276_p4)  ;;  %v6392_v2 = vmov (!%p5276_p4), 0   ;;  %vm1099_vm0 = vcmask (!%p5276_p4), 261120   ;;  %v6393_v3 = vmov (!%p5276_p4), 0.0   ;;  %s7730_s10 = sld [smem:[#allocation11_spill]] (!%p5276_p4)  ;;  %vm1177_vm1 = vcmask (!%p5276_p4), 257024  }
  0x33   : > { %1098 = sbr.rel (%p5276_p4) target bundleno = 202 (0xca), region = 132  ;;  %6119 = vset.pattern.permute.xlu1 (!%p5276_p4), %v6392_v2  ;;  %6118 = vset.pattern.permute.xlu0 (!%p5276_p4), %v6392_v2  ;;  %1102 = vst.msk [vmem:[#allocation2 + $0x10] sm:$0xff] (!%p5276_p4), %vm1099_vm0, %v6393_v3  ;;  %1100 = vst.msk [vmem:[#allocation2] sm:$0xff] (!%p5276_p4), %vm1099_vm0, %v6393_v3  ;;  %s7731_s2 = sld [smem:[#allocation13_spill]] (!%p5276_p4) }
  0x34   : > { %1101 = vst.msk [vmem:[#allocation2 + $0x8] sm:$0xff] (!%p5276_p4), %vm1099_vm0, %v6393_v3  ;;  %1103 = vst.msk [vmem:[#allocation2 + $0x18] sm:$0xff] (!%p5276_p4), %vm1099_vm0, %v6393_v3  ;;  %s7732_s12 = sld [smem:[#allocation14_spill]] (!%p5276_p4)  ;;  %s7733_s1 = sld [smem:[#allocation12_spill]] (!%p5276_p4) }
  0x35   : > { %1104 = vst.msk [vmem:[#allocation2 + $0x20] sm:$0xff] (!%p5276_p4), %vm1099_vm0, %v6393_v3  ;;  %1105 = vst.msk [vmem:[#allocation2 + $0x28] sm:$0xff] (!%p5276_p4), %vm1099_vm0, %v6393_v3  ;;  %s7734_s4 = sld [smem:[#allocation15_spill]] (!%p5276_p4)  ;;  %s7735_s14 = sld [smem:[#allocation16_spill]] (!%p5276_p4) }
  0x36   : > { %1106 = vst.msk [vmem:[#allocation2 + $0x30] sm:$0xff] (!%p5276_p4), %vm1099_vm0, %v6393_v3  ;;  %1107 = vst.msk [vmem:[#allocation2 + $0x38] sm:$0xff] (!%p5276_p4), %vm1099_vm0, %v6393_v3 }
  0x38   : > { %v1117_v0 = vld [vmem:[%s7729_s24 + $0x10] sm:$0xff] (!%p5276_p4)  ;;  %v1115_v1 = vld [vmem:[%s7729_s24] sm:$0xff] (!%p5276_p4)  ;;  %v5281_v4 = vld [vmem:[%s7729_s24 + $0x18] sm:$0xff] (!%p5276_p4) }
  0x39   : > { %1130 = vperm.xlu1 (!%p5276_p4), %6119, %v1117_v0   ;;  %1120 = vperm.xlu0 (!%p5276_p4), %6118, %v1115_v1   ;;  %v1116_v5 = vld [vmem:[%s7729_s24 + $0x8] sm:$0xff] (!%p5276_p4)  ;;  %v5282_v7 = vld [vmem:[%s7729_s24 + $0x20] sm:$0xff] (!%p5276_p4) }
  0x3a   : > { %v5283_v6 = vld [vmem:[%s7729_s24 + $0x28] sm:$0xff]  ;;  %v5284_v8 = vld [vmem:[%s7730_s10 + $0x4] sm:$0xf]  ;;  %v1154_v9 = vld [vmem:[%s7730_s10] sm:$0xf] }
  0x3b   : > { %v5277_v10 = vld [vmem:[%s7731_s2] ss:$0 sm:$0xff]  ;;  %v1114_v16 = vld [vmem:[%s7733_s1 + $0x10] sm:$0xff]  ;;  %v1113_v26 = vld [vmem:[%s7733_s1 + $0x8] sm:$0xff] }
  0x3c   : > { %v5278_v12 = vld [vmem:[%s7732_s12] ss:$0 sm:$0xff] }
  0x3d   : > { %1185 = vperm.xlu1 %6119, %v5281_v4   ;;  %1125 = vperm.xlu0 %6118, %v1116_v5   ;;  %v1112_v17 = vld [vmem:[%s7733_s1] sm:$0xff] }
  0x3e   : > { %v5279_v35 = vld [vmem:[%s7734_s4] ss:$0 sm:$0xff] }
  0x3f   : > { %v5280_v39 = vld [vmem:[%s7735_s14] ss:$0 sm:$0xff] }
  0x41   : > { %1195 = vperm.xlu1 %6119, %v5283_v6   ;;  %1190 = vperm.xlu0 %6118, %v5282_v7  }
  0x45   : > { %1211 = vperm.xlu1 %6119, %v5284_v8   ;;  %1157 = vperm.xlu0 %6118, %v1154_v9  }
  0xb8   : > { %v1131_v11 = vpop.permute.xlu1 %1130  ;;  %v1121_v13 = vpop.permute.xlu0 %1120 }
  0xb9   : > { %v1141_v14 = vmul.f32 %v5277_v10, %v1131_v11  ;;  %v1139_v15 = vmul.f32 %v5277_v10, %v1121_v13 }
  0xbb   : > { %v1150_v18 = vadd.f32 %v5278_v12, %v1141_v14  ;;  %v1148_v19 = vadd.f32 %v5278_v12, %v1139_v15 }
  0xbc   : > { %v1186_v20 = vpop.permute.xlu1 %1185  ;;  %v1126_v21 = vpop.permute.xlu0 %1125 }
  0xbd   : > { %v1153_v22 = vadd.f32 %v1150_v18, %v1114_v16  ;;  %v1151_v23 = vadd.f32 %v1148_v19, %v1112_v17  ;;  %v1198_v24 = vmul.f32 %v5277_v10, %v1186_v20  ;;  %v1140_v25 = vmul.f32 %v5277_v10, %v1126_v21 }
  0xbf   : > { %1176 = vst.msk [vmem:[#allocation2 + $0x10] sm:$0xff] %vm1099_vm0, %v1153_v22  ;;  %1174 = vst.msk [vmem:[#allocation2] sm:$0xff] %vm1099_vm0, %v1151_v23  ;;  %v1201_v27 = vadd.f32 %v5278_v12, %v1198_v24  ;;  %v1149_v28 = vadd.f32 %v5278_v12, %v1140_v25 }
  0xc0   : > { %v1196_v29 = vpop.permute.xlu1 %1195  ;;  %v1191_v30 = vpop.permute.xlu0 %1190 }
  0xc1   : > { %v1204_v31 = vadd.f32 %v1201_v27, %v1112_v17  ;;  %v1152_v32 = vadd.f32 %v1149_v28, %v1113_v26  ;;  %v1200_v33 = vmul.f32 %v5277_v10, %v1196_v29  ;;  %v1199_v34 = vmul.f32 %v5277_v10, %v1191_v30 }
  0xc3   : > { %1216 = vst.msk [vmem:[#allocation2 + $0x20] sm:$0xff] %vm1099_vm0, %v1204_v31  ;;  %1175 = vst.msk [vmem:[#allocation2 + $0x8] sm:$0xff] %vm1099_vm0, %v1152_v32  ;;  %v1203_v36 = vadd.f32 %v5278_v12, %v1200_v33  ;;  %v1202_v37 = vadd.f32 %v5278_v12, %v1199_v34 }
  0xc4   : > { %v1212_v38 = vpop.permute.xlu1 %1211  ;;  %v1158_v40 = vpop.permute.xlu0 %1157 }
  0xc5   : > { %v1206_v41 = vadd.f32 %v1203_v36, %v1114_v16  ;;  %v1205_v42 = vadd.f32 %v1202_v37, %v1113_v26  ;;  %v1214_v43 = vmul.f32 %v5279_v35, %v1212_v38  ;;  %v1166_v44 = vmul.f32 %v5279_v35, %v1158_v40 }
  0xc7   : > { %1218 = vst.msk [vmem:[#allocation2 + $0x30] sm:$0xff] %vm1099_vm0, %v1206_v41  ;;  %1217 = vst.msk [vmem:[#allocation2 + $0x28] sm:$0xff] %vm1099_vm0, %v1205_v42  ;;  %v1215_v45 = vadd.f32 %v5280_v39, %v1214_v43  ;;  %v1173_v46 = vadd.f32 %v5280_v39, %v1166_v44 }
  0xc9   : > { %1219 = vst.msk [vmem:[#allocation2 + $0x38] sm:$0xf] %vm1177_vm1, %v1215_v45  ;;  %1178 = vst.msk [vmem:[#allocation2 + $0x18] sm:$0xf] %vm1177_vm1, %v1173_v46 }
  0xca PF: > { %v1220_v47 = vld [vmem:[#allocation2] sm:$0xff]  ;;  %vm1234_vm2 = vcmask 261120   ;;  %v1222_v48 = vld [vmem:[#allocation2 + $0x10] sm:$0xff]  ;;  %s7736_s7 = sld [smem:[#allocation7_spill]]  ;;  %s7737_s30 = sld [smem:[#allocation9_spill]]  ;;  %vm1660_vm3 = vcmask 64512  }
  0xcb   : > { %v1221_v49 = vld [vmem:[#allocation2 + $0x8] sm:$0xff]  ;;  %v1235_v50 = vsel %vm1234_vm2, %v1220_v47, 0.0  ;;  %v1241_v51 = vsel %vm1234_vm2, %v1222_v48, 0.0  ;;  %v6754_v43 = vld [vmem:[%s6591_s8] sm:$0xff]   ;;  %s7738_s2 = sld [smem:[#allocation17_spill]]  ;;  %s7740_s27 = sld [smem:[#allocation18_spill]] }
  0xcc   : > { %v1224_v53 = vld [vmem:[#allocation2 + $0x20] sm:$0xff]  ;;  %1236 = vadd.xlane.f32.xlu0 %v1235_v50  ;;  %1242 = vadd.xlane.f32.xlu1 %v1241_v51  ;;  %v1238_v55 = vsel %vm1234_vm2, %v1221_v49, 0.0  ;;  %s7742_s11 = sld [smem:[#allocation8_spill]]  ;;  %vm1774_vm5 = vcmask 228352   ;;  %vm1778_vm6 = vcmask 224256   ;;  %vm2667_vm7 = vcmask 1043456   ;;  %s7745_s0 = scalar_lea.vmem %s7675_s18, %s6556_s9 }
  0xcd   : > { %v1247_v57 = vsel %vm1234_vm2, %v1224_v53, 0.0  ;;  %vm4788_vm12 = vcmask 523264   ;;  %s7746_s4 = scalar_lea.vmem %s7679_s22, %s6556_s9  ;;  %p5514_p5 = scmp.ne.s32.totalorder %s6550_s5, 1 }
  0xce   : > { %v1225_v54 = vld [vmem:[#allocation2 + $0x28] sm:$0xff]  ;;  %v1226_v59 = vld [vmem:[#allocation2 + $0x30] sm:$0xff]  ;;  %vm4891_vm1 = vcmask (!%p5514_p5), 257024  }
  0xcf   : > { %v1250_v58 = vsel %vm1234_vm2, %v1225_v54, 0.0  ;;  %v1253_v61 = vsel %vm1234_vm2, %v1226_v59, 0.0 }
  0xd0   : > { %v1223_v52 = vld [vmem:[#allocation2 + $0x18] sm:$0xff]  ;;  %1239 = vadd.xlane.f32.xlu0 %v1238_v55  ;;  %v6120_v39 = vld [vmem:[%s7736_s7] sm:$0xff]   ;;  %v6122_v41 = vld [vmem:[%s7736_s7 + $0x8] sm:$0xff]  }
  0xd1   : > { %v1244_v56 = vsel %vm1234_vm2, %v1223_v52, 0.0  ;;  %v1227_v60 = vld [vmem:[#allocation2 + $0x38] sm:$0xff]  ;;  %v6121_v40 = vld [vmem:[%s7737_s30] sm:$0xff]   ;;  %5705 = vmatprep.subr.bf16.mxu0 %v6120_v39  ;;  %v6123_v42 = vld [vmem:[%s7737_s30 + $0x8] sm:$0xff]   ;;  %s7739_s29 = scalar_lea.vmem %s7738_s2, %s6556_s9  ;;  %s7741_s14 = scalar_lea.vmem %s7740_s27, %s6556_s9 }
  0xd2   : > { %v1256_v62 = vsel %vm1234_vm2, %v1227_v60, 0.0  ;;  %1245 = vadd.xlane.f32.xlu1 %v1244_v56  ;;  %5717 = vmatprep.subr.bf16.mxu1 %v6121_v40  ;;  %s7747_s27 = sld [smem:[#allocation28_spill]] (!%p5514_p5) }
  0xd3   : > { %5706 = vmatpush3.bf16.msra.mxu0 %v6120_v39  ;;  %5718 = vmatpush3.bf16.msra.mxu1 %v6121_v40 }
  0xd4   : > { %1248 = vadd.xlane.f32.xlu0 %v1247_v57  ;;  %5707 = vmatprep.subr.bf16.mxu0 %v6122_v41 }
  0xd5   : > { %5719 = vmatprep.subr.bf16.mxu1 %v6123_v42 }
  0xd6   : > { %1251 = vadd.xlane.f32.xlu1 %v1250_v58 }
  0xd7   : > { %5708 = vmatpush3.bf16.msra.mxu0 %v6122_v41  ;;  %5720 = vmatpush3.bf16.msra.mxu1 %v6123_v42 }
  0xd8   : > { %1254 = vadd.xlane.f32.xlu0 %v1253_v61  ;;  %5729 = vmatprep.subr.bf16.mxu0 %v6754_v43 }
  0xda   : > { %1257 = vadd.xlane.f32.xlu1 %v1256_v62 }
 0x159   : > { %v1237_v63 = vpop.xlane.xlu0 %1236  ;;  %v1243_v0 = vpop.xlane.xlu1 %1242 }
 0x15a   : > { %v1260_v1 = vmul.f32 0.03125, %v1237_v63  ;;  %v1262_v2 = vmul.f32 0.03125, %v1243_v0 }
 0x15c   : > { %v6709_v3 = vsub.f32 %v1220_v47, %v1260_v1  ;;  %v6711_v4 = vsub.f32 %v1222_v48, %v1262_v2 }
 0x15d   : > { %v1240_v5 = vpop.xlane.xlu0 %1239 }
 0x15e   : > { %v1261_v7 = vmul.f32 0.03125, %v1240_v5  ;;  %v1276_v9 = vmul.f32 %v6709_v3, %v6709_v3  ;;  %v1278_v10 = vmul.f32 %v6711_v4, %v6711_v4 }
 0x15f   : > { %v1246_v6 = vpop.xlane.xlu1 %1245 }
 0x160   : > { %v1263_v8 = vmul.f32 0.03125, %v1246_v6  ;;  %v6717_v11 = vsub.f32 %v1221_v49, %v1261_v7  ;;  %v1284_v13 = vsel %vm1234_vm2, %v1276_v9, 0.0  ;;  %v1290_v16 = vsel %vm1234_vm2, %v1278_v10, 0.0  ;;  %v5285_v6 = vld [vmem:[%s7739_s29] ss:$0 sm:$0xff] }
 0x161   : > { %1285 = vadd.xlane.f32.xlu0 %v1284_v13  ;;  %v1249_v14 = vpop.xlane.xlu0 %1248 }
 0x162   : > { %v6719_v12 = vsub.f32 %v1223_v52, %v1263_v8  ;;  %v1264_v17 = vmul.f32 0.03125, %v1249_v14  ;;  %v1277_v19 = vmul.f32 %v6717_v11, %v6717_v11 }
 0x163   : > { %v1252_v15 = vpop.xlane.xlu1 %1251 }
 0x164   : > { %v1265_v18 = vmul.f32 0.03125, %v1252_v15  ;;  %v1279_v20 = vmul.f32 %v6719_v12, %v6719_v12  ;;  %v6727_v21 = vsub.f32 %v1224_v53, %v1264_v17  ;;  %v1287_v23 = vsel %vm1234_vm2, %v1277_v19, 0.0 }
 0x165   : > { %1291 = vadd.xlane.f32.xlu0 %v1290_v16  ;;  %1288 = vadd.xlane.f32.xlu1 %v1287_v23  ;;  %v1255_v24 = vpop.xlane.xlu0 %1254 }
 0x166   : > { %v6729_v22 = vsub.f32 %v1225_v54, %v1265_v18  ;;  %v1293_v26 = vsel %vm1234_vm2, %v1279_v20, 0.0  ;;  %v1266_v27 = vmul.f32 0.03125, %v1255_v24  ;;  %v1280_v29 = vmul.f32 %v6727_v21, %v6727_v21 }
 0x167   : > { %v1258_v25 = vpop.xlane.xlu1 %1257 }
 0x168   : > { %v1267_v28 = vmul.f32 0.03125, %v1258_v25  ;;  %v1281_v30 = vmul.f32 %v6729_v22, %v6729_v22  ;;  %v6737_v31 = vsub.f32 %v1226_v59, %v1266_v27  ;;  %v1296_v33 = vsel %vm1234_vm2, %v1280_v29, 0.0 }
 0x169   : > { %1294 = vadd.xlane.f32.xlu1 %v1293_v26  ;;  %1297 = vadd.xlane.f32.xlu0 %v1296_v33 }
 0x16a   : > { %v6739_v32 = vsub.f32 %v1227_v60, %v1267_v28  ;;  %v1299_v34 = vsel %vm1234_vm2, %v1281_v30, 0.0  ;;  %v1282_v35 = vmul.f32 %v6737_v31, %v6737_v31 }
 0x16c   : > { %v1283_v36 = vmul.f32 %v6739_v32, %v6739_v32  ;;  %v1302_v37 = vsel %vm1234_vm2, %v1282_v35, 0.0  ;;  %v6125_v35 = vld [vmem:[%s6591_s8 + $0x8] sm:$0xff]  }
 0x16d   : > { %1300 = vadd.xlane.f32.xlu1 %v1299_v34  ;;  %1303 = vadd.xlane.f32.xlu0 %v1302_v37 }
 0x16e   : > { %v1305_v38 = vsel %vm1234_vm2, %v1283_v36, 0.0 }
 0x171   : > { %1306 = vadd.xlane.f32.xlu1 %v1305_v38 }
 0x1ee   : > { %v1286_v44 = vpop.xlane.xlu0 %1285 }
 0x1ef   : > { %v1308_v45 = vmul.f32 0.03125, %v1286_v44  ;;  %v5287_v44 = vld [vmem:[%s7742_s11] ss:$0 sm:$0xff] }
 0x1f1   : > { %v1316_v46 = vadd.f32 1e-05, %v1308_v45 }
 0x1f2   : > { %v1289_v47 = vpop.xlane.xlu1 %1288  ;;  %v1292_v48 = vpop.xlane.xlu0 %1291 }
 0x1f3   : > { %6150 = vrsqrt.f32 %v1316_v46  ;;  %v1309_v49 = vmul.f32 0.03125, %v1289_v47  ;;  %v1310_v50 = vmul.f32 0.03125, %v1292_v48  ;;  %v5294_v46 = vld [vmem:[%s6586_s25] ss:$0 sm:$0xff] }
 0x1f5   : > { %v1317_v51 = vadd.f32 1e-05, %v1309_v49  ;;  %v1318_v52 = vadd.f32 1e-05, %v1310_v50 }
 0x1f6   : > { %v1295_v53 = vpop.xlane.xlu1 %1294  ;;  %v1298_v54 = vpop.xlane.xlu0 %1297 }
 0x1f7   : > { %6152 = vrsqrt.f32 %v1317_v51  ;;  %v1311_v55 = vmul.f32 0.03125, %v1295_v53  ;;  %v1312_v56 = vmul.f32 0.03125, %v1298_v54 }
 0x1f8   : > { %6154 = vrsqrt.f32 %v1318_v52 }
 0x1f9   : > { %v1319_v57 = vadd.f32 1e-05, %v1311_v55  ;;  %v1320_v58 = vadd.f32 1e-05, %v1312_v56 }
 0x1fa   : > { %v1301_v59 = vpop.xlane.xlu1 %1300  ;;  %v1304_v60 = vpop.xlane.xlu0 %1303 }
 0x1fb   : > { %6156 = vrsqrt.f32 %v1319_v57  ;;  %v1313_v61 = vmul.f32 0.03125, %v1301_v59  ;;  %v1314_v62 = vmul.f32 0.03125, %v1304_v60 }
 0x1fc   : > { %6158 = vrsqrt.f32 %v1320_v58 }
 0x1fd   : > { %v6151_v63 = vpop.eup %6150  ;;  %v1321_v0 = vadd.f32 1e-05, %v1313_v61  ;;  %v1322_v1 = vadd.f32 1e-05, %v1314_v62 }
 0x1fe   : > { %v1332_v2 = vmul.f32 %v6151_v63, %v6709_v3  ;;  %v1307_v5 = vpop.xlane.xlu1 %1306  ;;  %v5286_v3 = vld [vmem:[%s7741_s14] ss:$0 sm:$0xff] }
 0x1ff   : > { %6160 = vrsqrt.f32 %v1321_v0  ;;  %v1315_v7 = vmul.f32 0.03125, %v1307_v5 }
 0x200   : > { %6162 = vrsqrt.f32 %v1322_v1  ;;  %v1346_v13 = vmul.f32 %v5285_v6, %v1332_v2 }
 0x201   : > { %v6153_v8 = vpop.eup %6152  ;;  %v1323_v9 = vadd.f32 1e-05, %v1315_v7 }
 0x202   : > { %v6155_v10 = vpop.eup %6154  ;;  %v1333_v14 = vmul.f32 %v6153_v8, %v6717_v11  ;;  %v1360_v19 = vadd.f32 %v5286_v3, %v1346_v13 }
 0x203   : > { %v1334_v15 = vmul.f32 %v6155_v10, %v6711_v4  ;;  %6164 = vrsqrt.f32 %v1323_v9 }
 0x204   : > { %v1347_v16 = vmul.f32 %v5285_v6, %v1333_v14 }
 0x205   : > { %v6157_v17 = vpop.eup %6156  ;;  %v1348_v23 = vmul.f32 %v5285_v6, %v1334_v15 }
 0x206   : > { %v6159_v18 = vpop.eup %6158  ;;  %v1361_v20 = vadd.f32 %v5286_v3, %v1347_v16  ;;  %v1335_v24 = vmul.f32 %v6157_v17, %v6719_v12 }
 0x207   : > { %v1336_v25 = vmul.f32 %v6159_v18, %v6727_v21  ;;  %v1362_v30 = vadd.f32 %v5286_v3, %v1348_v23 }
 0x208   : > { %v6772_v11 = vpack.c.bf16 %v1361_v20, %v1360_v19  ;;  %v1349_v26 = vmul.f32 %v5285_v6, %v1335_v24 }
 0x209   : > { %v6161_v27 = vpop.eup %6160  ;;  %v1350_v28 = vmul.f32 %v5285_v6, %v1336_v25 }
 0x20a   : > { %v6163_v29 = vpop.eup %6162  ;;  %v1363_v4 = vadd.f32 %v5286_v3, %v1349_v26  ;;  %v1337_v33 = vmul.f32 %v6161_v27, %v6729_v22  ;;  %5709 = vmatprep.mubr.msk.bf16.mxu0 %vm1234_vm2, %v6772_v11  ;;  %5721 = vmatprep.mubr.msk.bf16.mxu1 %vm1234_vm2, %v6772_v11 }
 0x20b   : > { %v1338_v12 = vmul.f32 %v6163_v29, %v6737_v31  ;;  %v1364_v37 = vadd.f32 %v5286_v3, %v1350_v28  ;;  %v5301_v28 = vld [vmem:[%s6596_s26] ss:$0 sm:$0xff] }
 0x20c   : > { %v6780_v34 = vpack.c.bf16 %v1363_v4, %v1362_v30  ;;  %v1351_v21 = vmul.f32 %v5285_v6, %v1337_v33 }
 0x20d   : > { %v6165_v36 = vpop.eup %6164  ;;  %v1352_v39 = vmul.f32 %v5285_v6, %v1338_v12 }
 0x20e   : > { %v1365_v38 = vadd.f32 %v5286_v3, %v1351_v21  ;;  %v1339_v40 = vmul.f32 %v6165_v36, %v6739_v32  ;;  %5710 = vmatmul.mubr.msk.bf16.vlgmr.msra.gmra.mrb[0].mxu0 %vm1234_vm2, %v6780_v34  ;;  %5722 = vmatmul.mubr.msk.bf16.vlgmr.msra.gmra.mrb[0].mxu1 %vm1234_vm2, %v6780_v34 }
 0x20f   : > { %5730 = vmatpush3.bf16.msra.mxu0 %v6754_v43  ;;  %v1366_v41 = vadd.f32 %v5286_v3, %v1352_v39 }
 0x210   : > { %v6789_v22 = vpack.c.bf16 %v1365_v38, %v1364_v37  ;;  %v1353_v31 = vmul.f32 %v5285_v6, %v1339_v40  ;;  %5731 = vmatprep.subr.bf16.mxu0 %v6125_v35  ;;  %v6126_v40 = vld [vmem:[%s7736_s7 + $0x10] sm:$0xff]  }
 0x212   : > { %v1367_v42 = vadd.f32 %v5286_v3, %v1353_v31  ;;  %5713 = vmatprep.mubr.msk.bf16.mxu0 %vm1234_vm2, %v6789_v22  ;;  %5725 = vmatprep.mubr.msk.bf16.mxu1 %vm1234_vm2, %v6789_v22 }
 0x213   : > { %5732 = vmatpush3.bf16.msra.mxu0 %v6125_v35 }
 0x214   : > { %v6795_v32 = vpack.c.bf16 %v1367_v42, %v1366_v41 }
 0x216   : > { %5714 = vmatmul.mubr.msk.bf16.gmra.mrb[4].mxu0 %vm1234_vm2, %v6795_v32  ;;  %5726 = vmatmul.mubr.msk.bf16.gmra.mrb[4].mxu1 %vm1234_vm2, %v6795_v32 }
 0x217   : > { %5733 = vmatprep.mubr.msk.bf16.mxu0 %vm1234_vm2, %v6772_v11 }
 0x21e   : > { %5734 = vmatmul.mubr.msk.bf16.vlgmr.msra.gmra.mrb[8].mxu0 %vm1234_vm2, %v6780_v34 }
 0x21f   : > { %5737 = vmatprep.mubr.msk.bf16.mxu0 %vm1234_vm2, %v6789_v22 }
 0x226   : > { %5738 = vmatmul.mubr.msk.bf16.gmra.mrb[12].mxu0 %vm1234_vm2, %v6795_v32 }
 0x2e1   : > { %v5711_v43 = vpop.f32.mrb[0].mxu0  ;;  %v5723_v45 = vpop.f32.mrb[0].mxu1 }
 0x2e2   : > { %v1441_v47 = vpop.f32.mrb[1].mxu0  ;;  %v1529_v48 = vpop.f32.mrb[1].mxu1  ;;  %v1450_v51 = vadd.f32 %v5711_v43, %v5287_v44  ;;  %v1538_v52 = vadd.f32 %v5723_v45, %v5294_v46 }
 0x2e3   : > { %v5712_v49 = vpop.f32.mrb[2].mxu0  ;;  %v5724_v50 = vpop.f32.mrb[2].mxu1  ;;  %v1442_v57 = vadd.f32 %v5287_v44, %v1441_v47  ;;  %v1530_v58 = vadd.f32 %v5294_v46, %v1529_v48 }
 0x2e4   : > { %v1453_v53 = vadd.f32 %v5712_v49, %v5287_v44  ;;  %v1541_v54 = vadd.f32 %v5724_v50, %v5294_v46  ;;  %v1444_v55 = vpop.f32.mrb[3].mxu0  ;;  %v1532_v56 = vpop.f32.mrb[3].mxu1 }
 0x2e5   : > { %v1445_v59 = vadd.f32 %v5287_v44, %v1444_v55  ;;  %v1533_v60 = vadd.f32 %v5294_v46, %v1532_v56 }
 0x2e6   : > { %v1649_v61 = vpack.c.bf16 %v1453_v53, %v1450_v51  ;;  %v1653_v62 = vpack.c.bf16 %v1541_v54, %v1538_v52  ;;  %v6127_v51 = vld [vmem:[%s7736_s7 + $0x18] sm:$0xff]   ;;  %v6128_v52 = vld [vmem:[%s6591_s8 + $0x10] sm:$0xff]   ;;  %v1228_v54 = vlaneseq }
 0x2e7   : > { %v1648_v63 = vpack.c.bf16 %v1445_v59, %v1442_v57  ;;  %v1652_v0 = vpack.c.bf16 %v1533_v60, %v1530_v58  ;;  %v6129_v53 = vld [vmem:[%s6591_s8 + $0x18] sm:$0xff]   ;;  %v6394_v58 = vmov -1e+30  }
 0x2e8   : > { %v1671_v29 = vsel %vm1660_vm3, %v1653_v62, 0  ;;  %v1229_v55 = vand.u32 127, %v1228_v54  ;;  %v5349_v54 = vld [vmem:[%s6596_s26 + $0x1] ss:$0 sm:$0xff] }
 0x2e9   : > { %v5715_v1 = vpop.f32.mrb[4].mxu0  ;;  %v5727_v2 = vpop.f32.mrb[4].mxu1  ;;  %6077 = vmatprep.subr.msk.bf16.mxu1 %vm1660_vm3, %v1652_v0  ;;  %5745 = vmatprep.mubr.msk.bf16.mxu1 %vm1660_vm3, %v1648_v63  ;;  %v1668_v5 = vsel %vm1660_vm3, %v1652_v0, 0 }
 0x2ea   : > { %v1457_v6 = vpop.f32.mrb[5].mxu0  ;;  %v1545_v7 = vpop.f32.mrb[5].mxu1  ;;  %5742 = vmatpush3.bf16.xpose.msra.mxu1 %v1668_v5  ;;  %v1466_v10 = vadd.f32 %v5715_v1, %v5287_v44  ;;  %v1554_v13 = vadd.f32 %v5727_v2, %v5294_v46  ;;  %vm1230_vm4 = vcmp.lt.s32.totalorder %v1229_v55, 28 }
 0x2eb   : > { %v5716_v8 = vpop.f32.mrb[6].mxu0  ;;  %v5728_v9 = vpop.f32.mrb[6].mxu1  ;;  %6078 = vmatprep.subr.msk.bf16.mxu1 %vm1660_vm3, %v1653_v62  ;;  %v1458_v17 = vadd.f32 %v5287_v44, %v1457_v6  ;;  %v1546_v18 = vadd.f32 %v5294_v46, %v1545_v7  ;;  %v6849_v59 = vsel %vm1230_vm4, 0.0, %v6394_v58  ;;  %vm4919_vm4 = vcmask (!%p5514_p5), 254976  }
 0x2ec   : > { %v1469_v14 = vadd.f32 %v5716_v8, %v5287_v44  ;;  %v1557_v3 = vadd.f32 %v5728_v9, %v5294_v46  ;;  %v1460_v15 = vpop.f32.mrb[7].mxu0  ;;  %v1548_v16 = vpop.f32.mrb[7].mxu1 }
 0x2ed   : > { %v1461_v19 = vadd.f32 %v5287_v44, %v1460_v15  ;;  %v1549_v20 = vadd.f32 %v5294_v46, %v1548_v16 }
 0x2ee   : > { %v1651_v23 = vpack.c.bf16 %v1469_v14, %v1466_v10  ;;  %v1655_v24 = vpack.c.bf16 %v1557_v3, %v1554_v13 }
 0x2ef   : > { %v1650_v25 = vpack.c.bf16 %v1461_v19, %v1458_v17  ;;  %v1654_v26 = vpack.c.bf16 %v1549_v20, %v1546_v18 }
 0x2f0   : > { %v1847_v41 = vsel %vm1660_vm3, %v1655_v24, 0 }
 0x2f1   : > { %v5735_v27 = vpop.f32.mrb[8].mxu0  ;;  %6079 = vmatprep.subr.msk.bf16.mxu0 %vm1660_vm3, %v1654_v26  ;;  %5761 = vmatprep.mubr.msk.bf16.mxu0 %vm1660_vm3, %v1650_v25  ;;  %v1844_v30 = vsel %vm1660_vm3, %v1654_v26, 0  ;;  %v5325_v25 = vld [vmem:[%s7742_s11 + $0x1] ss:$0 sm:$0xff] }
 0x2f2   : > { %v1617_v4 = vpop.f32.mrb[9].mxu0  ;;  %5744 = vmatpush3.bf16.xpose.msra.mxu1 %v1671_v29  ;;  %5758 = vmatpush3.bf16.xpose.msra.mxu0 %v1844_v30  ;;  %v1626_v12 = vadd.f32 %v5735_v27, %v5301_v28 }
 0x2f3   : > { %v5736_v33 = vpop.f32.mrb[10].mxu0  ;;  %6080 = vmatprep.subr.msk.bf16.mxu0 %vm1660_vm3, %v1655_v24  ;;  %v1618_v36 = vadd.f32 %v5301_v28, %v1617_v4 }
 0x2f4   : > { %v1629_v21 = vadd.f32 %v5736_v33, %v5301_v28  ;;  %v1620_v35 = vpop.f32.mrb[11].mxu0 }
 0x2f5   : > { %v1621_v37 = vadd.f32 %v5301_v28, %v1620_v35 }
 0x2f6   : > { %v1657_v38 = vpack.c.bf16 %v1629_v21, %v1626_v12 }
 0x2f7   : > { %v1656_v39 = vpack.c.bf16 %v1621_v37, %v1618_v36 }
 0x2f9   : > { %v5739_v31 = vpop.f32.mrb[12].mxu0  ;;  %5746 = vmatmul.mubr.msk.bf16.vlgmr.msra.gmra.mrb[8].mxu1 %vm1660_vm3, %v1649_v61  ;;  %5749 = vmatprep.subr.bf16.mxu1 %v1656_v39 }
 0x2fa   : > { %v1642_v42 = vadd.f32 %v5739_v31, %v5301_v28  ;;  %v1633_v43 = vpop.f32.mrb[13].mxu0  ;;  %5750 = vmatpush3.bf16.msra.mxu1 %v1656_v39  ;;  %5760 = vmatpush3.bf16.xpose.msra.mxu0 %v1847_v41 }
 0x2fb   : > { %v5740_v44 = vpop.f32.mrb[14].mxu0  ;;  %5751 = vmatprep.subr.bf16.mxu1 %v1657_v38  ;;  %5773 = vmatprep.subr.bf16.mxu0 %v6126_v40  ;;  %v1634_v47 = vadd.f32 %v5301_v28, %v1633_v43 }
 0x2fc   : > { %v1645_v45 = vadd.f32 %v5740_v44, %v5301_v28  ;;  %v1636_v46 = vpop.f32.mrb[15].mxu0 }
 0x2fd   : > { %v1637_v48 = vadd.f32 %v5301_v28, %v1636_v46 }
 0x2fe   : > { %v6824_v49 = vpack.c.bf16 %v1645_v45, %v1642_v42  ;;  %5752 = vmatpush3.bf16.msra.mxu1 %v1657_v38 }
 0x2ff   : > { %v6826_v50 = vpack.c.bf16 %v1637_v48, %v1634_v47 }
 0x301   : > { %5762 = vmatmul.mubr.msk.bf16.vlgmr.msra.gmra.mrb[16].mxu0 %vm1660_vm3, %v1651_v23  ;;  %5765 = vmatprep.subr.bf16.mxu1 %v6826_v50 }
 0x302   : > { %5774 = vmatpush3.bf16.msra.mxu0 %v6126_v40  ;;  %5777 = vmatprep.mubr.msk.bf16.mxu0 %vm1234_vm2, %v6772_v11 }
 0x303   : > { %5775 = vmatprep.subr.bf16.mxu0 %v6127_v51 }
 0x306   : > { %5776 = vmatpush3.bf16.msra.mxu0 %v6127_v51 }
 0x307   : > { %5797 = vmatprep.subr.bf16.mxu0 %v6128_v52 }
 0x309   : > { %5778 = vmatmul.mubr.msk.bf16.vlgmr.msra.gmra.mrb[20].mxu0 %vm1234_vm2, %v6780_v34 }
 0x30a   : > { %5781 = vmatprep.mubr.msk.bf16.mxu0 %vm1234_vm2, %v6789_v22  ;;  %5798 = vmatpush3.bf16.msra.mxu0 %v6128_v52 }
 0x30b   : > { %5799 = vmatprep.subr.bf16.mxu0 %v6129_v53 }
 0x30e   : > { %5800 = vmatpush3.bf16.msra.mxu0 %v6129_v53 }
 0x311   : > { %5782 = vmatmul.mubr.msk.bf16.gmra.mrb[24].mxu0 %vm1234_vm2, %v6795_v32 }
 0x312   : > { %5801 = vmatprep.mubr.msk.bf16.mxu0 %vm1234_vm2, %v6772_v11 }
 0x319   : > { %5802 = vmatmul.mubr.msk.bf16.vlgmr.msra.gmra.mrb[28].mxu0 %vm1234_vm2, %v6780_v34 }
 0x31a   : > { %5805 = vmatprep.mubr.msk.bf16.mxu0 %vm1234_vm2, %v6789_v22 }
 0x321   : > { %5806 = vmatmul.mubr.msk.bf16.gmra.mrb[32].mxu0 %vm1234_vm2, %v6795_v32 }
 0x3cc   : > { %v5747_v56 = vpop.f32.mrb[8].mxu1 }
 0x3cd   : > { %v1707_v57 = vpop.f32.mrb[9].mxu1  ;;  %v1724_v60 = vmul.f32 0.35355338, %v5747_v56 }
 0x3ce   : > { %v1722_v61 = vmul.f32 0.35355338, %v1707_v57  ;;  %v5748_v62 = vpop.f32.mrb[10].mxu1 }
 0x3cf   : > { %v1710_v63 = vpop.f32.mrb[11].mxu1  ;;  %v1725_v0 = vmul.f32 0.35355338, %v5748_v62  ;;  %v6860_v7 = vadd.f32 %v1724_v60, %v6849_v59 }
 0x3d0   : > { %v1723_v1 = vmul.f32 0.35355338, %v1710_v63  ;;  %v6852_v2 = vadd.f32 %v1722_v61, %v6849_v59 }
 0x3d1   : > { %v6865_v10 = vadd.f32 %v1725_v0, %v6849_v59  ;;  %v1736_v16 = vsel %vm1234_vm2, %v6860_v7, -inf }
 0x3d2   : > { %v1730_v5 = vsel %vm1234_vm2, %v6852_v2, -inf  ;;  %v6857_v6 = vadd.f32 %v1723_v1, %v6849_v59 }
 0x3d3   : > { %1731 = vmax.xlane.f32.xlu0 %v1730_v5  ;;  %v1739_v20 = vsel %vm1234_vm2, %v6865_v10, -inf }
 0x3d4   : > { %v5763_v8 = vpop.f32.mrb[16].mxu0  ;;  %v1733_v9 = vsel %vm1234_vm2, %v6857_v6, -inf }
 0x3d5   : > { %1734 = vmax.xlane.f32.xlu1 %v1733_v9  ;;  %v1883_v13 = vpop.f32.mrb[17].mxu0  ;;  %v1900_v14 = vmul.f32 0.35355338, %v5763_v8 }
 0x3d6   : > { %v1898_v3 = vmul.f32 0.35355338, %v1883_v13  ;;  %v5764_v15 = vpop.f32.mrb[18].mxu0 }
 0x3d7   : > { %1737 = vmax.xlane.f32.xlu0 %v1736_v16  ;;  %v1886_v17 = vpop.f32.mrb[19].mxu0  ;;  %v1901_v18 = vmul.f32 0.35355338, %v5764_v15  ;;  %v6881_v27 = vadd.f32 %v1900_v14, %v6849_v59 }
 0x3d8   : > { %v1899_v19 = vmul.f32 0.35355338, %v1886_v17  ;;  %v6872_v23 = vadd.f32 %v1898_v3, %v6849_v59 }
 0x3d9   : > { %1740 = vmax.xlane.f32.xlu1 %v1739_v20  ;;  %v6886_v30 = vadd.f32 %v1901_v18, %v6849_v59  ;;  %v1912_v35 = vsel %vm1234_vm2, %v6881_v27, -inf }
 0x3da   : > { %v1906_v24 = vsel %vm1234_vm2, %v6872_v23, -inf  ;;  %v6878_v26 = vadd.f32 %v1899_v19, %v6849_v59 }
 0x3db   : > { %1907 = vmax.xlane.f32.xlu0 %v1906_v24  ;;  %v1915_v39 = vsel %vm1234_vm2, %v6886_v30, -inf }
 0x3dc   : > { %v5779_v28 = vpop.f32.mrb[20].mxu0  ;;  %v1909_v29 = vsel %vm1234_vm2, %v6878_v26, -inf }
 0x3dd   : > { %v6888_v4 = vadd.f32 %v5779_v28, %v5325_v25  ;;  %v2076_v33 = vpop.f32.mrb[21].mxu0  ;;  %1910 = vmax.xlane.f32.xlu1 %v1909_v29 }
 0x3de   : > { %v6890_v12 = vadd.f32 %v5325_v25, %v2076_v33  ;;  %v5780_v21 = vpop.f32.mrb[22].mxu0 }
 0x3df   : > { %v6894_v36 = vadd.f32 %v5780_v21, %v5325_v25  ;;  %1913 = vmax.xlane.f32.xlu0 %v1912_v35  ;;  %v2079_v37 = vpop.f32.mrb[23].mxu0 }
 0x3e0   : > { %v6896_v38 = vadd.f32 %v5325_v25, %v2079_v37 }
 0x3e1   : > { %v2288_v40 = vpack.c.bf16 %v6894_v36, %v6888_v4  ;;  %1916 = vmax.xlane.f32.xlu1 %v1915_v39 }
 0x3e2   : > { %v2287_v31 = vpack.c.bf16 %v6896_v38, %v6890_v12 }
 0x3e4   : > { %v5783_v41 = vpop.f32.mrb[24].mxu0 }
 0x3e5   : > { %v6904_v42 = vadd.f32 %v5783_v41, %v5325_v25  ;;  %v2092_v43 = vpop.f32.mrb[25].mxu0 }
 0x3e6   : > { %v5784_v44 = vpop.f32.mrb[26].mxu0  ;;  %v2093_v47 = vadd.f32 %v5325_v25, %v2092_v43 }
 0x3e7   : > { %v6906_v45 = vadd.f32 %v5784_v44, %v5325_v25  ;;  %v2095_v46 = vpop.f32.mrb[27].mxu0 }
 0x3e8   : > { %v2096_v48 = vadd.f32 %v5325_v25, %v2095_v46 }
 0x3e9   : > { %v2290_v51 = vpack.c.bf16 %v6906_v45, %v6904_v42 }
 0x3ea   : > { %v2289_v52 = vpack.c.bf16 %v2096_v48, %v2093_v47 }
 0x3ec   : > { %v5803_v53 = vpop.f32.mrb[28].mxu0  ;;  %5829 = vmatprep.mubr.msk.bf16.mxu0 %vm1660_vm3, %v2289_v52 }
 0x3ed   : > { %v2256_v55 = vpop.f32.mrb[29].mxu0  ;;  %v2265_v57 = vadd.f32 %v5803_v53, %v5349_v54 }
 0x3ee   : > { %v5804_v56 = vpop.f32.mrb[30].mxu0  ;;  %v2257_v61 = vadd.f32 %v5349_v54, %v2256_v55 }
 0x3ef   : > { %v2268_v58 = vadd.f32 %v5804_v56, %v5349_v54  ;;  %v2259_v60 = vpop.f32.mrb[31].mxu0 }
 0x3f0   : > { %v2260_v62 = vadd.f32 %v5349_v54, %v2259_v60 }
 0x3f1   : > { %v6912_v63 = vpack.c.bf16 %v2268_v58, %v2265_v57 }
 0x3f2   : > { %v6914_v0 = vpack.c.bf16 %v2260_v62, %v2257_v61 }
 0x3f4   : > { %v5807_v1 = vpop.f32.mrb[32].mxu0 }
 0x3f5   : > { %v2281_v5 = vadd.f32 %v5807_v1, %v5349_v54  ;;  %v2272_v8 = vpop.f32.mrb[33].mxu0 }
 0x3f6   : > { %v5808_v9 = vpop.f32.mrb[34].mxu0  ;;  %v2273_v3 = vadd.f32 %v5349_v54, %v2272_v8 }
 0x3f7   : > { %v2284_v13 = vadd.f32 %v5808_v9, %v5349_v54  ;;  %v2275_v14 = vpop.f32.mrb[35].mxu0 }
 0x3f8   : > { %v2276_v15 = vadd.f32 %v5349_v54, %v2275_v14 }
 0x3f9   : > { %v6916_v16 = vpack.c.bf16 %v2284_v13, %v2281_v5 }
 0x3fa   : > { %v6918_v17 = vpack.c.bf16 %v2276_v15, %v2273_v3 }
 0x460   : > { %v1732_v18 = vpop.xlane.xlu0 %1731 }
 0x461   : > { %v1742_v19 = vsub.f32 %v6852_v2, %v1732_v18 }
 0x462   : > { %v1735_v20 = vpop.xlane.xlu1 %1734 }
 0x463   : > { %v1746_v24 = vmul.f32 1.442695, %v1742_v19  ;;  %v1743_v25 = vsub.f32 %v6857_v6, %v1735_v20 }
 0x464   : > { %v1738_v28 = vpop.xlane.xlu0 %1737 }
 0x465   : > { %6166 = vpow2.f32 %v1746_v24  ;;  %v1748_v29 = vmul.f32 1.442695, %v1743_v25  ;;  %v1744_v33 = vsub.f32 %v6860_v7, %v1738_v28 }
 0x466   : > { %v1741_v21 = vpop.xlane.xlu1 %1740 }
 0x467   : > { %6168 = vpow2.f32 %v1748_v29  ;;  %v1750_v35 = vmul.f32 1.442695, %v1744_v33  ;;  %v1745_v37 = vsub.f32 %v6865_v10, %v1741_v21 }
 0x468   : > { %v1908_v39 = vpop.xlane.xlu0 %1907 }
 0x469   : > { %6170 = vpow2.f32 %v1750_v35  ;;  %v1752_v41 = vmul.f32 1.442695, %v1745_v37  ;;  %v1918_v43 = vsub.f32 %v6872_v23, %v1908_v39 }
 0x46a   : > { %v1911_v2 = vpop.xlane.xlu1 %1910 }
 0x46b   : > { %6172 = vpow2.f32 %v1752_v41  ;;  %v1922_v44 = vmul.f32 1.442695, %v1918_v43  ;;  %v1919_v6 = vsub.f32 %v6878_v26, %v1911_v2 }
 0x46c   : > { %v1914_v46 = vpop.xlane.xlu0 %1913 }
 0x46d   : > { %6174 = vpow2.f32 %v1922_v44  ;;  %v1924_v47 = vmul.f32 1.442695, %v1919_v6  ;;  %v1920_v7 = vsub.f32 %v6881_v27, %v1914_v46 }
 0x46e   : > { %v1917_v48 = vpop.xlane.xlu1 %1916 }
 0x46f   : > { %v6167_v52 = vpop.eup %6166  ;;  %6176 = vpow2.f32 %v1924_v47  ;;  %v1926_v53 = vmul.f32 1.442695, %v1920_v7  ;;  %v1921_v10 = vsub.f32 %v6886_v30, %v1917_v48 }
 0x470   : > { %v1754_v54 = vsel %vm1234_vm2, %v6167_v52, 0.0 }
 0x471   : > { %v6169_v55 = vpop.eup %6168  ;;  %6178 = vpow2.f32 %v1926_v53  ;;  %v1928_v23 = vmul.f32 1.442695, %v1921_v10  ;;  %1755 = vadd.xlane.f32.xlu0 %v1754_v54 }
 0x472   : > { %v1757_v56 = vsel %vm1234_vm2, %v6169_v55, 0.0 }
 0x473   : > { %v6171_v26 = vpop.eup %6170  ;;  %6180 = vpow2.f32 %v1928_v23  ;;  %1758 = vadd.xlane.f32.xlu1 %v1757_v56 }
 0x474   : > { %v1760_v57 = vsel %vm1234_vm2, %v6171_v26, 0.0 }
 0x475   : > { %v6173_v27 = vpop.eup %6172  ;;  %1761 = vadd.xlane.f32.xlu0 %v1760_v57 }
 0x476   : > { %v1763_v58 = vsel %vm1234_vm2, %v6173_v27, 0.0 }
 0x477   : > { %v6175_v60 = vpop.eup %6174  ;;  %1764 = vadd.xlane.f32.xlu1 %v1763_v58 }
 0x478   : > { %v1930_v30 = vsel %vm1234_vm2, %v6175_v60, 0.0 }
 0x479   : > { %v6177_v61 = vpop.eup %6176  ;;  %1931 = vadd.xlane.f32.xlu0 %v1930_v30 }
 0x47a   : > { %v1933_v62 = vsel %vm1234_vm2, %v6177_v61, 0.0 }
 0x47b   : > { %v6179_v1 = vpop.eup %6178  ;;  %1934 = vadd.xlane.f32.xlu1 %v1933_v62 }
 0x47c   : > { %v1936_v5 = vsel %vm1234_vm2, %v6179_v1, 0.0 }
 0x47d   : > { %v6181_v8 = vpop.eup %6180  ;;  %1937 = vadd.xlane.f32.xlu0 %v1936_v5 }
 0x47e   : > { %v1939_v9 = vsel %vm1234_vm2, %v6181_v8, 0.0 }
 0x47f   : > { %1940 = vadd.xlane.f32.xlu1 %v1939_v9 }
 0x4fe   : > { %v1756_v13 = vpop.xlane.xlu0 %1755 }
 0x4ff   : > { %6182 = vrcp.f32 %v1756_v13 }
 0x500   : > { %v1759_v14 = vpop.xlane.xlu1 %1758 }
 0x501   : > { %6184 = vrcp.f32 %v1759_v14 }
 0x502   : > { %v1762_v3 = vpop.xlane.xlu0 %1761 }
 0x503   : > { %6186 = vrcp.f32 %v1762_v3 }
 0x504   : > { %v1765_v15 = vpop.xlane.xlu1 %1764 }
 0x505   : > { %6188 = vrcp.f32 %v1765_v15 }
 0x506   : > { %v1932_v18 = vpop.xlane.xlu0 %1931 }
 0x507   : > { %6190 = vrcp.f32 %v1932_v18 }
 0x508   : > { %v1935_v19 = vpop.xlane.xlu1 %1934 }
 0x509   : > { %v6183_v20 = vpop.eup %6182  ;;  %6192 = vrcp.f32 %v1935_v19 }
 0x50a   : > { %v1938_v24 = vpop.xlane.xlu0 %1937  ;;  %v1767_v25 = vmul.f32 %v6183_v20, %v6167_v52  ;;  %v6130_v52 = vld [vmem:[%s7737_s30 + $0x10] sm:$0xff]  }
 0x50b   : > { %v6185_v28 = vpop.eup %6184  ;;  %6194 = vrcp.f32 %v1938_v24 }
 0x50c   : > { %v1941_v29 = vpop.xlane.xlu1 %1940  ;;  %v1769_v33 = vmul.f32 %v6185_v28, %v6169_v55  ;;  %1775 = vst.msk [vmem:[%s6639_s3] sm:$0xff] %vm1774_vm5, %v1767_v25 }
 0x50d   : > { %v6187_v21 = vpop.eup %6186  ;;  %6196 = vrcp.f32 %v1941_v29 }
 0x50e   : > { %v1771_v35 = vmul.f32 %v6187_v21, %v6171_v26  ;;  %1776 = vst.msk [vmem:[%s6639_s3 + $0x8] sm:$0xff] %vm1774_vm5, %v1769_v33  ;;  %v1780_v37 = vpack.c.bf16 %v1769_v33, %v1767_v25 }
 0x50f   : > { %v6189_v39 = vpop.eup %6188 }
 0x510   : > { %1777 = vst.msk [vmem:[%s6639_s3 + $0x10] sm:$0xff] %vm1774_vm5, %v1771_v35  ;;  %v1773_v41 = vmul.f32 %v6189_v39, %v6173_v27  ;;  %5753 = vmatprep.mubr.msk.bf16.mxu1 %vm1234_vm2, %v1780_v37 }
 0x511   : > { %v6191_v43 = vpop.eup %6190 }
 0x512   : > { %1779 = vst.msk [vmem:[%s6639_s3 + $0x18] sm:$0xf] %vm1778_vm6, %v1773_v41  ;;  %v1781_v2 = vpack.c.bf16 %v1773_v41, %v1771_v35  ;;  %v1943_v44 = vmul.f32 %v6191_v43, %v6175_v60 }
 0x513   : > { %v6193_v6 = vpop.eup %6192 }
 0x514   : > { %5754 = vmatmul.mubr.msk.bf16.vlgmr.msra.gmra.mrb[12].mxu1 %vm1234_vm2, %v1781_v2  ;;  %v1945_v46 = vmul.f32 %v6193_v6, %v6177_v61  ;;  %5314 = vst.msk [vmem:[%s6639_s3 + $0x80] sm:$0xff] %vm1774_vm5, %v1943_v44  ;;  %v5337_v61 = vld [vmem:[%s6586_s25 + $0x1] ss:$0 sm:$0xff] }
 0x515   : > { %v6195_v47 = vpop.eup %6194  ;;  %5766 = vmatpush3.bf16.msra.mxu1 %v6826_v50  ;;  %v6131_v50 = vld [vmem:[%s7737_s30 + $0x18] sm:$0xff]  }
 0x516   : > { %v1947_v7 = vmul.f32 %v6195_v47, %v6179_v1  ;;  %5767 = vmatprep.subr.bf16.mxu1 %v6824_v49  ;;  %5315 = vst.msk [vmem:[%s6639_s3 + $0x88] sm:$0xff] %vm1774_vm5, %v1945_v46  ;;  %v1955_v48 = vpack.c.bf16 %v1945_v46, %v1943_v44 }
 0x517   : > { %v6197_v53 = vpop.eup %6196 }
 0x518   : > { %5316 = vst.msk [vmem:[%s6639_s3 + $0x90] sm:$0xff] %vm1774_vm5, %v1947_v7  ;;  %v1949_v10 = vmul.f32 %v6197_v53, %v6181_v8  ;;  %5769 = vmatprep.mubr.msk.bf16.mxu1 %vm1234_vm2, %v1955_v48 }
 0x519   : > { %5768 = vmatpush3.bf16.msra.mxu1 %v6824_v49 }
 0x51a   : > { %5317 = vst.msk [vmem:[%s6639_s3 + $0x98] sm:$0xf] %vm1778_vm6, %v1949_v10  ;;  %v1956_v54 = vpack.c.bf16 %v1949_v10, %v1947_v7  ;;  %5785 = vmatprep.subr.bf16.mxu1 %v6130_v52 }
 0x51c   : > { %5770 = vmatmul.mubr.msk.bf16.vlgmr.msra.gmra.mrb[16].mxu1 %vm1234_vm2, %v1956_v54 }
 0x51d   : > { %5786 = vmatpush3.bf16.msra.mxu1 %v6130_v52  ;;  %5789 = vmatprep.mubr.msk.bf16.mxu1 %vm1234_vm2, %v6772_v11 }
 0x51e   : > { %5787 = vmatprep.subr.bf16.mxu1 %v6131_v50 }
 0x521   : > { %5788 = vmatpush3.bf16.msra.mxu1 %v6131_v50 }
 0x524   : > { %5790 = vmatmul.mubr.msk.bf16.vlgmr.msra.gmra.mrb[20].mxu1 %vm1234_vm2, %v6780_v34 }
 0x525   : > { %5793 = vmatprep.mubr.msk.bf16.mxu1 %vm1234_vm2, %v6789_v22 }
 0x52c   : > { %5794 = vmatmul.mubr.msk.bf16.gmra.mrb[24].mxu1 %vm1234_vm2, %v6795_v32 }
 0x52d   : > { %5813 = vmatprep.mubr.msk.bf16.mxu1 %vm1660_vm3, %v2287_v31 }
 0x5e7   : > { %v6973_v49 = vpop.f32.mrb[12].mxu1 }
 0x5e8   : > { %v6975_v55 = vpop.f32.mrb[13].mxu1 }
 0x5e9   : > { %v6977_v23 = vpop.f32.mrb[14].mxu1 }
 0x5ea   : > { %v2013_v56 = vpack.c.bf16 %v6977_v23, %v6973_v49  ;;  %v6981_v26 = vpop.f32.mrb[15].mxu1 }
 0x5eb   : > { %v2012_v57 = vpack.c.bf16 %v6981_v26, %v6975_v55 }
 0x5ef   : > { %v6985_v27 = vpop.f32.mrb[16].mxu1 }
 0x5f0   : > { %v6987_v58 = vpop.f32.mrb[17].mxu1 }
 0x5f1   : > { %v6989_v12 = vpop.f32.mrb[18].mxu1 }
 0x5f2   : > { %v2015_v38 = vpack.c.bf16 %v6989_v12, %v6985_v27  ;;  %v6993_v31 = vpop.f32.mrb[19].mxu1 }
 0x5f3   : > { %v2014_v60 = vpack.c.bf16 %v6993_v31, %v6987_v58  ;;  %v5398_v31 = vld [vmem:[%s6586_s25 + $0x2] ss:$0 sm:$0xff] }
 0x5f7   : > { %v5791_v30 = vpop.f32.mrb[20].mxu1 }
 0x5f8   : > { %v2166_v62 = vpop.f32.mrb[21].mxu1  ;;  %v2175_v5 = vadd.f32 %v5791_v30, %v5337_v61 }
 0x5f9   : > { %v5792_v1 = vpop.f32.mrb[22].mxu1  ;;  %v2167_v13 = vadd.f32 %v5337_v61, %v2166_v62 }
 0x5fa   : > { %v2178_v8 = vadd.f32 %v5792_v1, %v5337_v61  ;;  %v2169_v9 = vpop.f32.mrb[23].mxu1 }
 0x5fb   : > { %v2170_v14 = vadd.f32 %v5337_v61, %v2169_v9 }
 0x5fc   : > { %v2292_v3 = vpack.c.bf16 %v2178_v8, %v2175_v5 }
 0x5fd   : > { %v2291_v15 = vpack.c.bf16 %v2170_v14, %v2167_v13 }
 0x5fe   : > { %v2309_v39 = vsel %vm1660_vm3, %v2292_v3, 0 }
 0x5ff   : > { %v5795_v18 = vpop.f32.mrb[24].mxu1  ;;  %6081 = vmatprep.subr.msk.bf16.mxu1 %vm1660_vm3, %v2291_v15  ;;  %v2306_v19 = vsel %vm1660_vm3, %v2291_v15, 0 }
 0x600   : > { %v2182_v20 = vpop.f32.mrb[25].mxu1  ;;  %5810 = vmatpush3.bf16.xpose.msra.mxu1 %v2306_v19  ;;  %v2191_v25 = vadd.f32 %v5795_v18, %v5337_v61 }
 0x601   : > { %v5796_v24 = vpop.f32.mrb[26].mxu1  ;;  %6082 = vmatprep.subr.msk.bf16.mxu1 %vm1660_vm3, %v2292_v3  ;;  %v2183_v33 = vadd.f32 %v5337_v61, %v2182_v20 }
 0x602   : > { %v2194_v28 = vadd.f32 %v5796_v24, %v5337_v61  ;;  %v2185_v29 = vpop.f32.mrb[27].mxu1 }
 0x603   : > { %v2186_v21 = vadd.f32 %v5337_v61, %v2185_v29 }
 0x604   : > { %v2294_v35 = vpack.c.bf16 %v2194_v28, %v2191_v25 }
 0x605   : > { %v2293_v37 = vpack.c.bf16 %v2186_v21, %v2183_v33 }
 0x606   : > { %v2484_v43 = vsel %vm1660_vm3, %v2294_v35, 0 }
 0x607   : > { %6083 = vmatprep.subr.msk.bf16.mxu0 %vm1660_vm3, %v2293_v37  ;;  %v2481_v41 = vsel %vm1660_vm3, %v2293_v37, 0 }
 0x608   : > { %5812 = vmatpush3.bf16.xpose.msra.mxu1 %v2309_v39  ;;  %5826 = vmatpush3.bf16.xpose.msra.mxu0 %v2481_v41 }
 0x609   : > { %5817 = vmatprep.subr.bf16.mxu1 %v6914_v0  ;;  %6084 = vmatprep.subr.msk.bf16.mxu0 %vm1660_vm3, %v2294_v35 }
 0x60f   : > { %5814 = vmatmul.mubr.msk.bf16.vlgmr.msra.gmra.mrb[28].mxu1 %vm1660_vm3, %v2288_v40 }
 0x610   : > { %5818 = vmatpush3.bf16.msra.mxu1 %v6914_v0  ;;  %5828 = vmatpush3.bf16.xpose.msra.mxu0 %v2484_v43 }
 0x611   : > { %5819 = vmatprep.subr.bf16.mxu1 %v6912_v63 }
 0x614   : > { %5820 = vmatpush3.bf16.msra.mxu1 %v6912_v63 }
 0x615   : > { %5833 = vmatprep.subr.bf16.mxu1 %v6918_v17 }
 0x617   : > { %5830 = vmatmul.mubr.msk.bf16.vlgmr.msra.gmra.mrb[36].mxu0 %vm1660_vm3, %v2290_v51 }
 0x6e2   : > { %v5815_v2 = vpop.f32.mrb[28].mxu1 }
 0x6e3   : > { %v2345_v4 = vpop.f32.mrb[29].mxu1  ;;  %v2362_v36 = vmul.f32 0.35355338, %v5815_v2 }
 0x6e4   : > { %v2360_v40 = vmul.f32 0.35355338, %v2345_v4  ;;  %v5816_v44 = vpop.f32.mrb[30].mxu1 }
 0x6e5   : > { %v2348_v6 = vpop.f32.mrb[31].mxu1  ;;  %v2363_v46 = vmul.f32 0.35355338, %v5816_v44  ;;  %v2366_v48 = vadd.f32 %v2362_v36, %v6849_v59 }
 0x6e6   : > { %v2361_v0 = vmul.f32 0.35355338, %v2348_v6  ;;  %v2364_v47 = vadd.f32 %v2360_v40, %v6849_v59 }
 0x6e7   : > { %v2367_v51 = vadd.f32 %v2363_v46, %v6849_v59  ;;  %v2374_v50 = vsel %vm1234_vm2, %v2366_v48, -inf }
 0x6e8   : > { %v2368_v7 = vsel %vm1234_vm2, %v2364_v47, -inf  ;;  %v2365_v63 = vadd.f32 %v2361_v0, %v6849_v59 }
 0x6e9   : > { %2369 = vmax.xlane.f32.xlu0 %v2368_v7  ;;  %v2377_v1 = vsel %vm1234_vm2, %v2367_v51, -inf }
 0x6ea   : > { %v5831_v42 = vpop.f32.mrb[36].mxu0  ;;  %v2371_v45 = vsel %vm1234_vm2, %v2365_v63, -inf }
 0x6eb   : > { %v2520_v52 = vpop.f32.mrb[37].mxu0  ;;  %2372 = vmax.xlane.f32.xlu1 %v2371_v45  ;;  %v2537_v53 = vmul.f32 0.35355338, %v5831_v42 }
 0x6ec   : > { %v2535_v10 = vmul.f32 0.35355338, %v2520_v52  ;;  %v5832_v54 = vpop.f32.mrb[38].mxu0 }
 0x6ed   : > { %v2523_v30 = vpop.f32.mrb[39].mxu0  ;;  %2375 = vmax.xlane.f32.xlu0 %v2374_v50  ;;  %v2538_v61 = vmul.f32 0.35355338, %v5832_v54  ;;  %v2541_v13 = vadd.f32 %v2537_v53, %v6849_v59 }
 0x6ee   : > { %v2536_v62 = vmul.f32 0.35355338, %v2523_v30  ;;  %v2539_v5 = vadd.f32 %v2535_v10, %v6849_v59 }
 0x6ef   : > { %2378 = vmax.xlane.f32.xlu1 %v2377_v1  ;;  %v2542_v3 = vadd.f32 %v2538_v61, %v6849_v59  ;;  %v2549_v15 = vsel %vm1234_vm2, %v2541_v13, -inf }
 0x6f0   : > { %v2543_v8 = vsel %vm1234_vm2, %v2539_v5, -inf  ;;  %v2540_v9 = vadd.f32 %v2536_v62, %v6849_v59 }
 0x6f1   : > { %2544 = vmax.xlane.f32.xlu0 %v2543_v8  ;;  %v2552_v18 = vsel %vm1234_vm2, %v2542_v3, -inf }
 0x6f2   : > { %v2546_v14 = vsel %vm1234_vm2, %v2540_v9, -inf }
 0x6f3   : > { %2547 = vmax.xlane.f32.xlu1 %v2546_v14 }
 0x6f5   : > { %2550 = vmax.xlane.f32.xlu0 %v2549_v15 }
 0x6f7   : > { %2553 = vmax.xlane.f32.xlu1 %v2552_v18 }
 0x776   : > { %v2370_v19 = vpop.xlane.xlu0 %2369 }
 0x777   : > { %v2380_v20 = vsub.f32 %v2364_v47, %v2370_v19 }
 0x778   : > { %v2373_v24 = vpop.xlane.xlu1 %2372 }
 0x779   : > { %v2384_v25 = vmul.f32 1.442695, %v2380_v20  ;;  %v2381_v28 = vsub.f32 %v2365_v63, %v2373_v24 }
 0x77a   : > { %v2376_v29 = vpop.xlane.xlu0 %2375 }
 0x77b   : > { %6198 = vpow2.f32 %v2384_v25  ;;  %v2386_v33 = vmul.f32 1.442695, %v2381_v28  ;;  %v2382_v21 = vsub.f32 %v2366_v48, %v2376_v29 }
 0x77c   : > { %v2379_v35 = vpop.xlane.xlu1 %2378 }
 0x77d   : > { %6200 = vpow2.f32 %v2386_v33  ;;  %v2388_v37 = vmul.f32 1.442695, %v2382_v21  ;;  %v2383_v39 = vsub.f32 %v2367_v51, %v2379_v35 }
 0x77e   : > { %v2545_v41 = vpop.xlane.xlu0 %2544 }
 0x77f   : > { %6202 = vpow2.f32 %v2388_v37  ;;  %v2390_v43 = vmul.f32 1.442695, %v2383_v39  ;;  %v2555_v2 = vsub.f32 %v2539_v5, %v2545_v41 }
 0x780   : > { %v2548_v4 = vpop.xlane.xlu1 %2547 }
 0x781   : > { %6204 = vpow2.f32 %v2390_v43  ;;  %v2559_v36 = vmul.f32 1.442695, %v2555_v2  ;;  %v2556_v40 = vsub.f32 %v2540_v9, %v2548_v4 }
 0x782   : > { %v2551_v44 = vpop.xlane.xlu0 %2550 }
 0x783   : > { %6206 = vpow2.f32 %v2559_v36  ;;  %v2561_v6 = vmul.f32 1.442695, %v2556_v40  ;;  %v2557_v46 = vsub.f32 %v2541_v13, %v2551_v44 }
 0x784   : > { %v2554_v0 = vpop.xlane.xlu1 %2553 }
 0x785   : > { %v6199_v47 = vpop.eup %6198  ;;  %6208 = vpow2.f32 %v2561_v6  ;;  %v2563_v7 = vmul.f32 1.442695, %v2557_v46  ;;  %v2558_v63 = vsub.f32 %v2542_v3, %v2554_v0  ;;  %v6132_v0 = vld [vmem:[%s7736_s7 + $0x20] sm:$0xff]  }
 0x786   : > { %v2392_v48 = vsel %vm1234_vm2, %v6199_v47, 0.0 }
 0x787   : > { %v6201_v42 = vpop.eup %6200  ;;  %6210 = vpow2.f32 %v2563_v7  ;;  %v2565_v45 = vmul.f32 1.442695, %v2558_v63  ;;  %2393 = vadd.xlane.f32.xlu0 %v2392_v48  ;;  %v6133_v63 = vld [vmem:[%s7736_s7 + $0x28] sm:$0xff]   ;;  %v6134_v48 = vld [vmem:[%s7737_s30 + $0x20] sm:$0xff]  }
 0x788   : > { %v2395_v51 = vsel %vm1234_vm2, %v6201_v42, 0.0 }
 0x789   : > { %v6203_v52 = vpop.eup %6202  ;;  %6212 = vpow2.f32 %v2565_v45  ;;  %2396 = vadd.xlane.f32.xlu1 %v2395_v51  ;;  %v2016_v51 = vld [vmem:[%s6606_s23] sm:$0xf] }
 0x78a   : > { %v2398_v53 = vsel %vm1234_vm2, %v6203_v52, 0.0 }
 0x78b   : > { %v6205_v10 = vpop.eup %6204  ;;  %2399 = vadd.xlane.f32.xlu0 %v2398_v53 }
 0x78c   : > { %v2401_v54 = vsel %vm1234_vm2, %v6205_v10, 0.0 }
 0x78d   : > { %v6207_v50 = vpop.eup %6206  ;;  %2402 = vadd.xlane.f32.xlu1 %v2401_v54 }
 0x78e   : > { %v2567_v30 = vsel %vm1234_vm2, %v6207_v50, 0.0 }
 0x78f   : > { %v6209_v61 = vpop.eup %6208  ;;  %2568 = vadd.xlane.f32.xlu0 %v2567_v30 }
 0x790   : > { %v2570_v62 = vsel %vm1234_vm2, %v6209_v61, 0.0 }
 0x791   : > { %v6211_v1 = vpop.eup %6210  ;;  %2571 = vadd.xlane.f32.xlu1 %v2570_v62  ;;  %v6136_v62 = vld [vmem:[%s6591_s8 + $0x20] sm:$0xff]  }
 0x792   : > { %v2573_v5 = vsel %vm1234_vm2, %v6211_v1, 0.0 }
 0x793   : > { %v6213_v8 = vpop.eup %6212  ;;  %2574 = vadd.xlane.f32.xlu0 %v2573_v5 }
 0x794   : > { %v2576_v9 = vsel %vm1234_vm2, %v6213_v8, 0.0 }
 0x795   : > { %2577 = vadd.xlane.f32.xlu1 %v2576_v9 }
 0x814   : > { %v2394_v13 = vpop.xlane.xlu0 %2393 }
 0x815   : > { %6214 = vrcp.f32 %v2394_v13 }
 0x816   : > { %v2397_v14 = vpop.xlane.xlu1 %2396 }
 0x817   : > { %6216 = vrcp.f32 %v2397_v14 }
 0x818   : > { %v2400_v3 = vpop.xlane.xlu0 %2399 }
 0x819   : > { %6218 = vrcp.f32 %v2400_v3 }
 0x81a   : > { %v2403_v15 = vpop.xlane.xlu1 %2402 }
 0x81b   : > { %6220 = vrcp.f32 %v2403_v15  ;;  %v5386_v15 = vld [vmem:[%s7742_s11 + $0x2] ss:$0 sm:$0xff] }
 0x81c   : > { %v2569_v18 = vpop.xlane.xlu0 %2568 }
 0x81d   : > { %6222 = vrcp.f32 %v2569_v18 }
 0x81e   : > { %v2572_v19 = vpop.xlane.xlu1 %2571 }
 0x81f   : > { %v6215_v20 = vpop.eup %6214  ;;  %6224 = vrcp.f32 %v2572_v19 }
 0x820   : > { %v2575_v24 = vpop.xlane.xlu0 %2574  ;;  %v2405_v25 = vmul.f32 %v6215_v20, %v6199_v47 }
 0x821   : > { %v6217_v28 = vpop.eup %6216  ;;  %6226 = vrcp.f32 %v2575_v24 }
 0x822   : > { %v2578_v29 = vpop.xlane.xlu1 %2577  ;;  %v2407_v33 = vmul.f32 %v6217_v28, %v6201_v42  ;;  %5358 = vst.msk [vmem:[%s6639_s3 + $0x20] sm:$0xff] %vm1774_vm5, %v2405_v25  ;;  %v6135_v42 = vld [vmem:[%s7737_s30 + $0x28] sm:$0xff]  }
 0x823   : > { %v6219_v21 = vpop.eup %6218  ;;  %6228 = vrcp.f32 %v2578_v29 }
 0x824   : > { %v2409_v35 = vmul.f32 %v6219_v21, %v6203_v52  ;;  %5359 = vst.msk [vmem:[%s6639_s3 + $0x28] sm:$0xff] %vm1774_vm5, %v2407_v33  ;;  %v2417_v37 = vpack.c.bf16 %v2407_v33, %v2405_v25 }
 0x825   : > { %v6221_v39 = vpop.eup %6220 }
 0x826   : > { %5360 = vst.msk [vmem:[%s6639_s3 + $0x30] sm:$0xff] %vm1774_vm5, %v2409_v35  ;;  %v2411_v41 = vmul.f32 %v6221_v39, %v6205_v10  ;;  %5821 = vmatprep.mubr.msk.bf16.mxu1 %vm1234_vm2, %v2417_v37 }
 0x827   : > { %v6223_v43 = vpop.eup %6222 }
 0x828   : > { %5361 = vst.msk [vmem:[%s6639_s3 + $0x38] sm:$0xf] %vm1778_vm6, %v2411_v41  ;;  %v2418_v2 = vpack.c.bf16 %v2411_v41, %v2409_v35  ;;  %v2580_v4 = vmul.f32 %v6223_v43, %v6207_v50  ;;  %v6137_v35 = vld [vmem:[%s6591_s8 + $0x28] sm:$0xff]  }
 0x829   : > { %v6225_v36 = vpop.eup %6224 }
 0x82a   : > { %5822 = vmatmul.mubr.msk.bf16.vlgmr.msra.gmra.mrb[32].mxu1 %vm1234_vm2, %v2418_v2  ;;  %v2582_v40 = vmul.f32 %v6225_v36, %v6209_v61  ;;  %5366 = vst.msk [vmem:[%s6639_s3 + $0xa0] sm:$0xff] %vm1774_vm5, %v2580_v4  ;;  %v2749_v61 = vsel %vm2667_vm7, %v2016_v51, 0 }
 0x82b   : > { %v6227_v44 = vpop.eup %6226  ;;  %5834 = vmatpush3.bf16.msra.mxu1 %v6918_v17 }
 0x82c   : > { %v2584_v6 = vmul.f32 %v6227_v44, %v6211_v1  ;;  %5835 = vmatprep.subr.bf16.mxu1 %v6916_v16  ;;  %5367 = vst.msk [vmem:[%s6639_s3 + $0xa8] sm:$0xff] %vm1774_vm5, %v2582_v40  ;;  %v2592_v46 = vpack.c.bf16 %v2582_v40, %v2580_v4 }
 0x82d   : > { %v6229_v47 = vpop.eup %6228 }
 0x82e   : > { %5368 = vst.msk [vmem:[%s6639_s3 + $0xb0] sm:$0xff] %vm1774_vm5, %v2584_v6  ;;  %v2586_v7 = vmul.f32 %v6229_v47, %v6213_v8  ;;  %5837 = vmatprep.mubr.msk.bf16.mxu1 %vm1234_vm2, %v2592_v46 }
 0x82f   : > { %5836 = vmatpush3.bf16.msra.mxu1 %v6916_v16  ;;  %v5372_v16 = vld [vmem:[%s6606_s23 + $0x4] sm:$0xf] }
 0x830   : > { %5369 = vst.msk [vmem:[%s6639_s3 + $0xb8] sm:$0xf] %vm1778_vm6, %v2586_v7  ;;  %v2593_v17 = vpack.c.bf16 %v2586_v7, %v2584_v6  ;;  %5861 = vmatprep.subr.bf16.mxu1 %v6132_v0  ;;  %6085 = vmatprep.subr.msk.bf16.mxu0 %vm2667_vm7, %v5372_v16  ;;  %v2669_v45 = vsel %vm2667_vm7, %v5372_v16, 0 }
 0x831   : > { %5842 = vmatpush3.bf16.msra.mxu0 %v2669_v45 }
 0x832   : > { %5838 = vmatmul.mubr.msk.bf16.vlgmr.msra.gmra.mrb[36].mxu1 %vm1234_vm2, %v2593_v17  ;;  %6086 = vmatprep.subr.msk.bf16.mxu0 %vm2667_vm7, %v2016_v51 }
 0x833   : > { %5862 = vmatpush3.bf16.msra.mxu1 %v6132_v0  ;;  %5865 = vmatprep.mubr.msk.bf16.mxu1 %vm1234_vm2, %v6772_v11 }
 0x834   : > { %5863 = vmatprep.subr.bf16.mxu1 %v6133_v63 }
 0x837   : > { %5864 = vmatpush3.bf16.msra.mxu1 %v6133_v63 }
 0x838   : > { %5873 = vmatprep.subr.bf16.mxu1 %v6134_v48 }
 0x83a   : > { %5866 = vmatmul.mubr.msk.bf16.vlgmr.msra.gmra.mrb[40].mxu1 %vm1234_vm2, %v6780_v34 }
 0x83b   : > { %5869 = vmatprep.mubr.msk.bf16.mxu1 %vm1234_vm2, %v6789_v22  ;;  %5874 = vmatpush3.bf16.msra.mxu1 %v6134_v48 }
 0x83c   : > { %5875 = vmatprep.subr.bf16.mxu1 %v6135_v42 }
 0x83f   : > { %5876 = vmatpush3.bf16.msra.mxu1 %v6135_v42 }
 0x842   : > { %5870 = vmatmul.mubr.msk.bf16.gmra.mrb[44].mxu1 %vm1234_vm2, %v6795_v32 }
 0x843   : > { %5877 = vmatprep.mubr.msk.bf16.mxu1 %vm1234_vm2, %v6772_v11 }
 0x84a   : > { %5878 = vmatmul.mubr.msk.bf16.vlgmr.msra.gmra.mrb[48].mxu1 %vm1234_vm2, %v6780_v34 }
 0x84b   : > { %5881 = vmatprep.mubr.msk.bf16.mxu1 %vm1234_vm2, %v6789_v22 }
 0x852   : > { %5882 = vmatmul.mubr.msk.bf16.gmra.mrb[52].mxu1 %vm1234_vm2, %v6795_v32 }
 0x8fd   : > { %v5823_v52 = vpop.f32.mrb[32].mxu1 }
 0x8fe   : > { %v2459_v53 = vpop.f32.mrb[33].mxu1 }
 0x8ff   : > { %v5824_v10 = vpop.f32.mrb[34].mxu1 }
 0x900   : > { %v2650_v54 = vpack.c.bf16 %v5824_v10, %v5823_v52  ;;  %v2462_v50 = vpop.f32.mrb[35].mxu1 }
 0x901   : > { %v2649_v30 = vpack.c.bf16 %v2462_v50, %v2459_v53 }
 0x903   : > { %5843 = vmatprep.mubr.msk.bf16.mxu0 %vm1660_vm3, %v2649_v30 }
 0x904   : > { %5844 = vmatmul.mubr.msk.bf16.vlgmr.msra.gmra.mrb[40].mxu0 %vm1660_vm3, %v2650_v54  ;;  %v5410_v54 = vld [vmem:[%s6596_s26 + $0x2] ss:$0 sm:$0xff] }
 0x905   : > { %v5839_v1 = vpop.f32.mrb[36].mxu1  ;;  %5852 = vmatpush3.bf16.msra.mxu0 %v2749_v61 }
 0x906   : > { %v2634_v5 = vpop.f32.mrb[37].mxu1  ;;  %5885 = vmatprep.subr.bf16.mxu0 %v6136_v62 }
 0x907   : > { %v5840_v8 = vpop.f32.mrb[38].mxu1 }
 0x908   : > { %v2652_v9 = vpack.c.bf16 %v5840_v8, %v5839_v1  ;;  %v2637_v13 = vpop.f32.mrb[39].mxu1 }
 0x909   : > { %v2651_v14 = vpack.c.bf16 %v2637_v13, %v2634_v5 }
 0x90b   : > { %5847 = vmatprep.mubr.msk.bf16.mxu0 %vm1660_vm3, %v2651_v14 }
 0x90c   : > { %5848 = vmatmul.mubr.msk.bf16.gmra.mrb[44].mxu0 %vm1660_vm3, %v2652_v9 }
 0x90d   : > { %5853 = vmatprep.mubr.msk.bf16.mxu0 %vm1660_vm3, %v2012_v57  ;;  %v5867_v3 = vpop.f32.mrb[40].mxu1 }
 0x90e   : > { %v2875_v18 = vpop.f32.mrb[41].mxu1  ;;  %v2884_v20 = vadd.f32 %v5867_v3, %v5386_v15 }
 0x90f   : > { %v5868_v19 = vpop.f32.mrb[42].mxu1  ;;  %v2876_v28 = vadd.f32 %v5386_v15, %v2875_v18 }
 0x910   : > { %v2887_v24 = vadd.f32 %v5868_v19, %v5386_v15  ;;  %v2878_v25 = vpop.f32.mrb[43].mxu1 }
 0x911   : > { %v2879_v29 = vadd.f32 %v5386_v15, %v2878_v25 }
 0x912   : > { %v3087_v33 = vpack.c.bf16 %v2887_v24, %v2884_v20 }
 0x913   : > { %v3086_v21 = vpack.c.bf16 %v2879_v29, %v2876_v28 }
 0x914   : > { %5854 = vmatmul.mubr.msk.bf16.vlgmr.msra.gmra.mrb[40].mxu0 %vm1660_vm3, %v2013_v56 }
 0x915   : > { %5857 = vmatprep.mubr.msk.bf16.mxu0 %vm1660_vm3, %v2014_v60  ;;  %v5871_v55 = vpop.f32.mrb[44].mxu1  ;;  %5901 = vmatprep.mubr.msk.bf16.mxu1 %vm1660_vm3, %v3086_v21 }
 0x916   : > { %v2891_v26 = vpop.f32.mrb[45].mxu1  ;;  %5886 = vmatpush3.bf16.msra.mxu0 %v6136_v62  ;;  %v2900_v37 = vadd.f32 %v5871_v55, %v5386_v15 }
 0x917   : > { %v5872_v57 = vpop.f32.mrb[46].mxu1  ;;  %5887 = vmatprep.subr.bf16.mxu0 %v6137_v35  ;;  %v2892_v43 = vadd.f32 %v5386_v15, %v2891_v26 }
 0x918   : > { %v2903_v39 = vadd.f32 %v5872_v57, %v5386_v15  ;;  %v2894_v41 = vpop.f32.mrb[47].mxu1 }
 0x919   : > { %v2895_v49 = vadd.f32 %v5386_v15, %v2894_v41 }
 0x91a   : > { %v3089_v23 = vpack.c.bf16 %v2903_v39, %v2900_v37  ;;  %5888 = vmatpush3.bf16.msra.mxu0 %v6137_v35 }
 0x91b   : > { %v3088_v56 = vpack.c.bf16 %v2895_v49, %v2892_v43 }
 0x91c   : > { %5858 = vmatmul.mubr.msk.bf16.gmra.mrb[44].mxu0 %vm1660_vm3, %v2015_v38 }
 0x91d   : > { %v5879_v58 = vpop.f32.mrb[48].mxu1  ;;  %5889 = vmatprep.mubr.msk.bf16.mxu0 %vm1234_vm2, %v6772_v11 }
 0x91e   : > { %v2965_v60 = vpop.f32.mrb[49].mxu1  ;;  %v2974_v4 = vadd.f32 %v5879_v58, %v5398_v31 }
 0x91f   : > { %v5880_v2 = vpop.f32.mrb[50].mxu1  ;;  %v2966_v44 = vadd.f32 %v5398_v31, %v2965_v60 }
 0x920   : > { %v2977_v36 = vadd.f32 %v5880_v2, %v5398_v31  ;;  %v2968_v40 = vpop.f32.mrb[51].mxu1 }
 0x921   : > { %v2969_v6 = vadd.f32 %v5398_v31, %v2968_v40 }
 0x922   : > { %v3091_v46 = vpack.c.bf16 %v2977_v36, %v2974_v4 }
 0x923   : > { %v3090_v0 = vpack.c.bf16 %v2969_v6, %v2966_v44 }
 0x924   : > { %5890 = vmatmul.mubr.msk.bf16.vlgmr.msra.gmra.mrb[48].mxu0 %vm1234_vm2, %v6780_v34  ;;  %v3108_v51 = vsel %vm1660_vm3, %v3091_v46, 0 }
 0x925   : > { %v5883_v27 = vpop.f32.mrb[52].mxu1  ;;  %5893 = vmatprep.mubr.msk.bf16.mxu0 %vm1234_vm2, %v6789_v22  ;;  %6087 = vmatprep.subr.msk.bf16.mxu1 %vm1660_vm3, %v3090_v0  ;;  %v3105_v12 = vsel %vm1660_vm3, %v3090_v0, 0 }
 0x926   : > { %v2981_v38 = vpop.f32.mrb[53].mxu1  ;;  %5898 = vmatpush3.bf16.xpose.msra.mxu1 %v3105_v12  ;;  %v2990_v7 = vadd.f32 %v5883_v27, %v5398_v31 }
 0x927   : > { %v5884_v47 = vpop.f32.mrb[54].mxu1  ;;  %6088 = vmatprep.subr.msk.bf16.mxu1 %vm1660_vm3, %v3091_v46  ;;  %v2982_v48 = vadd.f32 %v5398_v31, %v2981_v38 }
 0x928   : > { %v2993_v17 = vadd.f32 %v5884_v47, %v5398_v31  ;;  %v2984_v63 = vpop.f32.mrb[55].mxu1 }
 0x929   : > { %v2985_v42 = vadd.f32 %v5398_v31, %v2984_v63 }
 0x92a   : > { %v3093_v16 = vpack.c.bf16 %v2993_v17, %v2990_v7 }
 0x92b   : > { %v3092_v45 = vpack.c.bf16 %v2985_v42, %v2982_v48 }
 0x92c   : > { %5894 = vmatmul.mubr.msk.bf16.gmra.mrb[52].mxu0 %vm1234_vm2, %v6795_v32  ;;  %v3283_v53 = vsel %vm1660_vm3, %v3093_v16, 0 }
 0x92d   : > { %6089 = vmatprep.subr.msk.bf16.mxu0 %vm1660_vm3, %v3092_v45  ;;  %5917 = vmatprep.mubr.msk.bf16.mxu0 %vm1660_vm3, %v3088_v56  ;;  %v3280_v52 = vsel %vm1660_vm3, %v3092_v45, 0 }
 0x92e   : > { %5900 = vmatpush3.bf16.xpose.msra.mxu1 %v3108_v51  ;;  %5914 = vmatpush3.bf16.xpose.msra.mxu0 %v3280_v52 }
 0x92f   : > { %6090 = vmatprep.subr.msk.bf16.mxu0 %vm1660_vm3, %v3093_v16 }
 0x935   : > { %5902 = vmatmul.mubr.msk.bf16.vlgmr.msra.gmra.mrb[56].mxu1 %vm1660_vm3, %v3087_v33 }
 0x936   : > { %5916 = vmatpush3.bf16.xpose.msra.mxu0 %v3283_v53 }
 0x93d   : > { %5918 = vmatmul.mubr.msk.bf16.vlgmr.msra.gmra.mrb[56].mxu0 %vm1660_vm3, %v3089_v23 }
 0x9f7   : > { %v5891_v10 = vpop.f32.mrb[48].mxu0 }
 0x9f8   : > { %v3055_v50 = vpop.f32.mrb[49].mxu0  ;;  %v3064_v61 = vadd.f32 %v5891_v10, %v5410_v54 }
 0x9f9   : > { %v5892_v30 = vpop.f32.mrb[50].mxu0  ;;  %v3056_v5 = vadd.f32 %v5410_v54, %v3055_v50 }
 0x9fa   : > { %v3067_v62 = vadd.f32 %v5892_v30, %v5410_v54  ;;  %v3058_v1 = vpop.f32.mrb[51].mxu0 }
 0x9fb   : > { %v3059_v8 = vadd.f32 %v5410_v54, %v3058_v1 }
 0x9fc   : > { %v3095_v9 = vpack.c.bf16 %v3067_v62, %v3064_v61 }
 0x9fd   : > { %v3094_v13 = vpack.c.bf16 %v3059_v8, %v3056_v5 }
 0x9ff   : > { %v5895_v14 = vpop.f32.mrb[52].mxu0  ;;  %5905 = vmatprep.subr.bf16.mxu1 %v3094_v13 }
 0xa00   : > { %v3080_v3 = vadd.f32 %v5895_v14, %v5410_v54  ;;  %v3071_v15 = vpop.f32.mrb[53].mxu0  ;;  %5906 = vmatpush3.bf16.msra.mxu1 %v3094_v13 }
 0xa01   : > { %v5896_v18 = vpop.f32.mrb[54].mxu0  ;;  %5907 = vmatprep.subr.bf16.mxu1 %v3095_v9  ;;  %v3072_v24 = vadd.f32 %v5410_v54, %v3071_v15 }
 0xa02   : > { %v3083_v19 = vadd.f32 %v5896_v18, %v5410_v54  ;;  %v3074_v20 = vpop.f32.mrb[55].mxu0 }
 0xa03   : > { %v3075_v25 = vadd.f32 %v5410_v54, %v3074_v20 }
 0xa04   : > { %v7137_v28 = vpack.c.bf16 %v3083_v19, %v3080_v3  ;;  %5908 = vmatpush3.bf16.msra.mxu1 %v3095_v9 }
 0xa05   : > { %v7139_v29 = vpack.c.bf16 %v3075_v25, %v3072_v24 }
 0xa07   : > { %5921 = vmatprep.subr.bf16.mxu1 %v7139_v29 }
 0xa08   : > { %v5903_v33 = vpop.f32.mrb[56].mxu1 }
 0xa09   : > { %v3144_v21 = vpop.f32.mrb[57].mxu1  ;;  %v3161_v35 = vmul.f32 0.35355338, %v5903_v33 }
 0xa0a   : > { %v3159_v55 = vmul.f32 0.35355338, %v3144_v21  ;;  %v5904_v26 = vpop.f32.mrb[58].mxu1 }
 0xa0b   : > { %v3147_v57 = vpop.f32.mrb[59].mxu1  ;;  %v3162_v37 = vmul.f32 0.35355338, %v5904_v26  ;;  %v3165_v23 = vadd.f32 %v3161_v35, %v6849_v59 }
 0xa0c   : > { %v3160_v39 = vmul.f32 0.35355338, %v3147_v57  ;;  %v3163_v41 = vadd.f32 %v3159_v55, %v6849_v59 }
 0xa0d   : > { %v3166_v31 = vadd.f32 %v3162_v37, %v6849_v59  ;;  %v3173_v40 = vsel %vm1234_vm2, %v3165_v23, -inf }
 0xa0e   : > { %v3167_v43 = vsel %vm1234_vm2, %v3163_v41, -inf  ;;  %v3164_v49 = vadd.f32 %v3160_v39, %v6849_v59 }
 0xa0f   : > { %3168 = vmax.xlane.f32.xlu0 %v3167_v43  ;;  %v3176_v0 = vsel %vm1234_vm2, %v3166_v31, -inf }
 0xa10   : > { %v5919_v56 = vpop.f32.mrb[56].mxu0  ;;  %v3170_v58 = vsel %vm1234_vm2, %v3164_v49, -inf }
 0xa11   : > { %3171 = vmax.xlane.f32.xlu1 %v3170_v58  ;;  %v3319_v60 = vpop.f32.mrb[57].mxu0  ;;  %v3336_v2 = vmul.f32 0.35355338, %v5919_v56 }
 0xa12   : > { %v3334_v4 = vmul.f32 0.35355338, %v3319_v60  ;;  %v5920_v36 = vpop.f32.mrb[58].mxu0  ;;  %v7167_v60 = vld [vmem:[%s6606_s23 + $0x8] sm:$0xf] }
 0xa13   : > { %3174 = vmax.xlane.f32.xlu0 %v3173_v40  ;;  %v3322_v44 = vpop.f32.mrb[59].mxu0  ;;  %v3337_v6 = vmul.f32 0.35355338, %v5920_v36  ;;  %v3340_v47 = vadd.f32 %v3336_v2, %v6849_v59  ;;  %6091 = vmatprep.subr.msk.bf16.mxu0 %vm2667_vm7, %v7167_v60 }
 0xa14   : > { %v3335_v46 = vmul.f32 0.35355338, %v3322_v44  ;;  %v3338_v27 = vadd.f32 %v3334_v4, %v6849_v59 }
 0xa15   : > { %3177 = vmax.xlane.f32.xlu1 %v3176_v0  ;;  %v3341_v17 = vadd.f32 %v3337_v6, %v6849_v59  ;;  %v3348_v63 = vsel %vm1234_vm2, %v3340_v47, -inf }
 0xa16   : > { %v3342_v12 = vsel %vm1234_vm2, %v3338_v27, -inf  ;;  %v3339_v38 = vadd.f32 %v3335_v46, %v6849_v59 }
 0xa17   : > { %3343 = vmax.xlane.f32.xlu0 %v3342_v12  ;;  %v3351_v48 = vsel %vm1234_vm2, %v3341_v17, -inf }
 0xa18   : > { %v3345_v7 = vsel %vm1234_vm2, %v3339_v38, -inf }
 0xa19   : > { %3346 = vmax.xlane.f32.xlu1 %v3345_v7 }
 0xa1b   : > { %3349 = vmax.xlane.f32.xlu0 %v3348_v63 }
 0xa1d   : > { %3352 = vmax.xlane.f32.xlu1 %v3351_v48 }
 0xa9c   : > { %v3169_v42 = vpop.xlane.xlu0 %3168 }
 0xa9d   : > { %v3179_v16 = vsub.f32 %v3163_v41, %v3169_v42 }
 0xa9e   : > { %v3172_v45 = vpop.xlane.xlu1 %3171 }
 0xa9f   : > { %v3183_v51 = vmul.f32 1.442695, %v3179_v16  ;;  %v3180_v52 = vsub.f32 %v3164_v49, %v3172_v45 }
 0xaa0   : > { %v3175_v53 = vpop.xlane.xlu0 %3174 }
 0xaa1   : > { %6230 = vpow2.f32 %v3183_v51  ;;  %v3185_v10 = vmul.f32 1.442695, %v3180_v52  ;;  %v3181_v54 = vsub.f32 %v3165_v23, %v3175_v53 }
 0xaa2   : > { %v3178_v50 = vpop.xlane.xlu1 %3177 }
 0xaa3   : > { %6232 = vpow2.f32 %v3185_v10  ;;  %v3187_v30 = vmul.f32 1.442695, %v3181_v54  ;;  %v3182_v61 = vsub.f32 %v3166_v31, %v3178_v50 }
 0xaa4   : > { %v3344_v62 = vpop.xlane.xlu0 %3343 }
 0xaa5   : > { %6234 = vpow2.f32 %v3187_v30  ;;  %v3189_v1 = vmul.f32 1.442695, %v3182_v61  ;;  %v3354_v5 = vsub.f32 %v3338_v27, %v3344_v62  ;;  %v6138_v30 = vld [vmem:[%s7736_s7 + $0x30] sm:$0xff]  }
 0xaa6   : > { %v3347_v8 = vpop.xlane.xlu1 %3346 }
 0xaa7   : > { %6236 = vpow2.f32 %v3189_v1  ;;  %v3358_v9 = vmul.f32 1.442695, %v3354_v5  ;;  %v3355_v13 = vsub.f32 %v3339_v38, %v3347_v8  ;;  %v6139_v1 = vld [vmem:[%s7736_s7 + $0x38] sm:$0xff]   ;;  %v6140_v5 = vld [vmem:[%s6591_s8 + $0x30] sm:$0xff]  }
 0xaa8   : > { %v3350_v14 = vpop.xlane.xlu0 %3349  ;;  %v6141_v8 = vld [vmem:[%s6591_s8 + $0x38] sm:$0xff]  }
 0xaa9   : > { %6238 = vpow2.f32 %v3358_v9  ;;  %v3360_v3 = vmul.f32 1.442695, %v3355_v13  ;;  %v3356_v15 = vsub.f32 %v3340_v47, %v3350_v14  ;;  %v6142_v9 = vld [vmem:[%s7737_s30 + $0x30] sm:$0xff]  }
 0xaaa   : > { %v3353_v18 = vpop.xlane.xlu1 %3352 }
 0xaab   : > { %v6231_v19 = vpop.eup %6230  ;;  %6240 = vpow2.f32 %v3360_v3  ;;  %v3362_v20 = vmul.f32 1.442695, %v3356_v15  ;;  %v3357_v24 = vsub.f32 %v3341_v17, %v3353_v18 }
 0xaac   : > { %v3191_v25 = vsel %vm1234_vm2, %v6231_v19, 0.0 }
 0xaad   : > { %v6233_v33 = vpop.eup %6232  ;;  %6242 = vpow2.f32 %v3362_v20  ;;  %v3364_v21 = vmul.f32 1.442695, %v3357_v24  ;;  %3192 = vadd.xlane.f32.xlu0 %v3191_v25  ;;  %v6143_v20 = vld [vmem:[%s7737_s30 + $0x38] sm:$0xff]  }
 0xaae   : > { %v3194_v35 = vsel %vm1234_vm2, %v6233_v33, 0.0 }
 0xaaf   : > { %v6235_v55 = vpop.eup %6234  ;;  %6244 = vpow2.f32 %v3364_v21  ;;  %3195 = vadd.xlane.f32.xlu1 %v3194_v35 }
 0xab0   : > { %v3197_v26 = vsel %vm1234_vm2, %v6235_v55, 0.0 }
 0xab1   : > { %v6237_v57 = vpop.eup %6236  ;;  %3198 = vadd.xlane.f32.xlu0 %v3197_v26  ;;  %v5443_v26 = vld [vmem:[%s7742_s11 + $0x3] ss:$0 sm:$0xff] }
 0xab2   : > { %v3200_v37 = vsel %vm1234_vm2, %v6237_v57, 0.0 }
 0xab3   : > { %v6239_v39 = vpop.eup %6238  ;;  %3201 = vadd.xlane.f32.xlu1 %v3200_v37 }
 0xab4   : > { %v3366_v41 = vsel %vm1234_vm2, %v6239_v39, 0.0 }
 0xab5   : > { %v6241_v43 = vpop.eup %6240  ;;  %3367 = vadd.xlane.f32.xlu0 %v3366_v41 }
 0xab6   : > { %v3369_v49 = vsel %vm1234_vm2, %v6241_v43, 0.0 }
 0xab7   : > { %v6243_v23 = vpop.eup %6242  ;;  %3370 = vadd.xlane.f32.xlu1 %v3369_v49 }
 0xab8   : > { %v3372_v56 = vsel %vm1234_vm2, %v6243_v23, 0.0 }
 0xab9   : > { %v6245_v58 = vpop.eup %6244  ;;  %3373 = vadd.xlane.f32.xlu0 %v3372_v56 }
 0xaba   : > { %v3375_v31 = vsel %vm1234_vm2, %v6245_v58, 0.0 }
 0xabb   : > { %3376 = vadd.xlane.f32.xlu1 %v3375_v31 }
 0xb3a   : > { %v3193_v2 = vpop.xlane.xlu0 %3192 }
 0xb3b   : > { %6246 = vrcp.f32 %v3193_v2 }
 0xb3c   : > { %v3196_v4 = vpop.xlane.xlu1 %3195 }
 0xb3d   : > { %6248 = vrcp.f32 %v3196_v4 }
 0xb3e   : > { %v3199_v36 = vpop.xlane.xlu0 %3198 }
 0xb3f   : > { %6250 = vrcp.f32 %v3199_v36 }
 0xb40   : > { %v3202_v40 = vpop.xlane.xlu1 %3201 }
 0xb41   : > { %6252 = vrcp.f32 %v3202_v40 }
 0xb42   : > { %v3368_v44 = vpop.xlane.xlu0 %3367 }
 0xb43   : > { %6254 = vrcp.f32 %v3368_v44 }
 0xb44   : > { %v3371_v6 = vpop.xlane.xlu1 %3370 }
 0xb45   : > { %v6247_v46 = vpop.eup %6246  ;;  %6256 = vrcp.f32 %v3371_v6 }
 0xb46   : > { %v3374_v0 = vpop.xlane.xlu0 %3373  ;;  %v3204_v27 = vmul.f32 %v6247_v46, %v6231_v19 }
 0xb47   : > { %v6249_v12 = vpop.eup %6248  ;;  %6258 = vrcp.f32 %v3374_v0  ;;  %v5467_v0 = vld [vmem:[%s6596_s26 + $0x3] ss:$0 sm:$0xff]  ;;  %s7743_s26 = scalar_lea.vmem %s7673_s16, %s6556_s9 }
 0xb48   : > { %v3377_v38 = vpop.xlane.xlu1 %3376  ;;  %v3206_v47 = vmul.f32 %v6249_v12, %v6233_v33  ;;  %5419 = vst.msk [vmem:[%s6639_s3 + $0x40] sm:$0xff] %vm1774_vm5, %v3204_v27 }
 0xb49   : > { %v6251_v7 = vpop.eup %6250  ;;  %6260 = vrcp.f32 %v3377_v38 }
 0xb4a   : > { %v3208_v17 = vmul.f32 %v6251_v7, %v6235_v55  ;;  %5420 = vst.msk [vmem:[%s6639_s3 + $0x48] sm:$0xff] %vm1774_vm5, %v3206_v47  ;;  %v3216_v63 = vpack.c.bf16 %v3206_v47, %v3204_v27 }
 0xb4b   : > { %v6253_v48 = vpop.eup %6252 }
 0xb4c   : > { %5421 = vst.msk [vmem:[%s6639_s3 + $0x50] sm:$0xff] %vm1774_vm5, %v3208_v17  ;;  %v3210_v42 = vmul.f32 %v6253_v48, %v6237_v57  ;;  %5909 = vmatprep.mubr.msk.bf16.mxu1 %vm1234_vm2, %v3216_v63 }
 0xb4d   : > { %v6255_v16 = vpop.eup %6254 }
 0xb4e   : > { %5422 = vst.msk [vmem:[%s6639_s3 + $0x58] sm:$0xf] %vm1778_vm6, %v3210_v42  ;;  %v3217_v45 = vpack.c.bf16 %v3210_v42, %v3208_v17  ;;  %v3379_v51 = vmul.f32 %v6255_v16, %v6239_v39 }
 0xb4f   : > { %v6257_v52 = vpop.eup %6256 }
 0xb50   : > { %5910 = vmatmul.mubr.msk.bf16.vlgmr.msra.gmra.mrb[60].mxu1 %vm1234_vm2, %v3217_v45  ;;  %v3381_v53 = vmul.f32 %v6257_v52, %v6241_v43  ;;  %5427 = vst.msk [vmem:[%s6639_s3 + $0xc0] sm:$0xff] %vm1774_vm5, %v3379_v51 }
 0xb51   : > { %v6259_v10 = vpop.eup %6258  ;;  %5922 = vmatpush3.bf16.msra.mxu1 %v7139_v29 }
 0xb52   : > { %v3383_v54 = vmul.f32 %v6259_v10, %v6243_v23  ;;  %5923 = vmatprep.subr.bf16.mxu1 %v7137_v28  ;;  %5428 = vst.msk [vmem:[%s6639_s3 + $0xc8] sm:$0xff] %vm1774_vm5, %v3381_v53  ;;  %v3391_v50 = vpack.c.bf16 %v3381_v53, %v3379_v51 }
 0xb53   : > { %v6261_v61 = vpop.eup %6260 }
 0xb54   : > { %5429 = vst.msk [vmem:[%s6639_s3 + $0xd0] sm:$0xff] %vm1774_vm5, %v3383_v54  ;;  %v3385_v62 = vmul.f32 %v6261_v61, %v6245_v58  ;;  %5925 = vmatprep.mubr.msk.bf16.mxu1 %vm1234_vm2, %v3391_v50 }
 0xb55   : > { %5924 = vmatpush3.bf16.msra.mxu1 %v7137_v28  ;;  %v3467_v28 = vsel %vm2667_vm7, %v7167_v60, 0 }
 0xb56   : > { %5430 = vst.msk [vmem:[%s6639_s3 + $0xd8] sm:$0xf] %vm1778_vm6, %v3385_v62  ;;  %v3392_v29 = vpack.c.bf16 %v3385_v62, %v3383_v54  ;;  %5939 = vmatprep.subr.bf16.mxu1 %v6138_v30  ;;  %5930 = vmatpush3.bf16.msra.mxu0 %v3467_v28  ;;  %v5455_v62 = vld [vmem:[%s6586_s25 + $0x3] ss:$0 sm:$0xff] }
 0xb57   : > { %5951 = vmatprep.subr.bf16.mxu0 %v6142_v9 }
 0xb58   : > { %5926 = vmatmul.mubr.msk.bf16.vlgmr.msra.gmra.mrb[64].mxu1 %vm1234_vm2, %v3392_v29 }
 0xb59   : > { %5940 = vmatpush3.bf16.msra.mxu1 %v6138_v30  ;;  %5943 = vmatprep.mubr.msk.bf16.mxu1 %vm1234_vm2, %v6772_v11 }
 0xb5a   : > { %5941 = vmatprep.subr.bf16.mxu1 %v6139_v1 }
 0xb5d   : > { %5942 = vmatpush3.bf16.msra.mxu1 %v6139_v1 }
 0xb5e   : > { %5963 = vmatprep.subr.bf16.mxu1 %v6140_v5 }
 0xb60   : > { %5944 = vmatmul.mubr.msk.bf16.vlgmr.msra.gmra.mrb[68].mxu1 %vm1234_vm2, %v6780_v34 }
 0xb61   : > { %5947 = vmatprep.mubr.msk.bf16.mxu1 %vm1234_vm2, %v6789_v22  ;;  %5964 = vmatpush3.bf16.msra.mxu1 %v6140_v5 }
 0xb62   : > { %5965 = vmatprep.subr.bf16.mxu1 %v6141_v8 }
 0xb65   : > { %5966 = vmatpush3.bf16.msra.mxu1 %v6141_v8 }
 0xb68   : > { %5948 = vmatmul.mubr.msk.bf16.gmra.mrb[72].mxu1 %vm1234_vm2, %v6795_v32 }
 0xb69   : > { %5967 = vmatprep.mubr.msk.bf16.mxu1 %vm1234_vm2, %v6772_v11 }
 0xb70   : > { %5968 = vmatmul.mubr.msk.bf16.vlgmr.msra.gmra.mrb[76].mxu1 %vm1234_vm2, %v6780_v34 }
 0xb71   : > { %5971 = vmatprep.mubr.msk.bf16.mxu1 %vm1234_vm2, %v6789_v22 }
 0xb78   : > { %5972 = vmatmul.mubr.msk.bf16.gmra.mrb[80].mxu1 %vm1234_vm2, %v6795_v32 }
 0xc23   : > { %v5911_v13 = vpop.f32.mrb[60].mxu1 }
 0xc24   : > { %v3258_v14 = vpop.f32.mrb[61].mxu1 }
 0xc25   : > { %v5912_v3 = vpop.f32.mrb[62].mxu1 }
 0xc26   : > { %v3449_v15 = vpack.c.bf16 %v5912_v3, %v5911_v13  ;;  %v3261_v18 = vpop.f32.mrb[63].mxu1 }
 0xc27   : > { %v3448_v19 = vpack.c.bf16 %v3261_v18, %v3258_v14 }
 0xc29   : > { %5931 = vmatprep.mubr.msk.bf16.mxu0 %vm1660_vm3, %v3448_v19 }
 0xc2a   : > { %5932 = vmatmul.mubr.msk.bf16.vlgmr.msra.gmra.mrb[40].mxu0 %vm1660_vm3, %v3449_v15 }
 0xc2b   : > { %v5927_v24 = vpop.f32.mrb[64].mxu1  ;;  %5952 = vmatpush3.bf16.msra.mxu0 %v6142_v9 }
 0xc2c   : > { %v3433_v25 = vpop.f32.mrb[65].mxu1  ;;  %5953 = vmatprep.subr.bf16.mxu0 %v6143_v20 }
 0xc2d   : > { %v5928_v33 = vpop.f32.mrb[66].mxu1 }
 0xc2e   : > { %v3451_v21 = vpack.c.bf16 %v5928_v33, %v5927_v24  ;;  %v3436_v35 = vpop.f32.mrb[67].mxu1 }
 0xc2f   : > { %v3450_v55 = vpack.c.bf16 %v3436_v35, %v3433_v25  ;;  %5954 = vmatpush3.bf16.msra.mxu0 %v6143_v20 }
 0xc31   : > { %5935 = vmatprep.mubr.msk.bf16.mxu0 %vm1660_vm3, %v3450_v55 }
 0xc32   : > { %5936 = vmatmul.mubr.msk.bf16.gmra.mrb[44].mxu0 %vm1660_vm3, %v3451_v21 }
 0xc33   : > { %v5945_v57 = vpop.f32.mrb[68].mxu1  ;;  %5955 = vmatprep.mubr.msk.bf16.mxu0 %vm1234_vm2, %v6772_v11 }
 0xc34   : > { %v7225_v37 = vadd.f32 %v5945_v57, %v5443_v26  ;;  %v3601_v39 = vpop.f32.mrb[69].mxu1 }
 0xc35   : > { %v5946_v41 = vpop.f32.mrb[70].mxu1  ;;  %v3602_v23 = vadd.f32 %v5443_v26, %v3601_v39 }
 0xc36   : > { %v7227_v43 = vadd.f32 %v5946_v41, %v5443_v26  ;;  %v3604_v49 = vpop.f32.mrb[71].mxu1 }
 0xc37   : > { %v3605_v56 = vadd.f32 %v5443_v26, %v3604_v49 }
 0xc38   : > { %v3813_v58 = vpack.c.bf16 %v7227_v43, %v7225_v37 }
 0xc39   : > { %v3812_v31 = vpack.c.bf16 %v3605_v56, %v3602_v23 }
 0xc3a   : > { %5956 = vmatmul.mubr.msk.bf16.vlgmr.msra.gmra.mrb[60].mxu0 %vm1234_vm2, %v6780_v34 }
 0xc3b   : > { %v5949_v60 = vpop.f32.mrb[72].mxu1  ;;  %5959 = vmatprep.mubr.msk.bf16.mxu0 %vm1234_vm2, %v6789_v22 }
 0xc3c   : > { %v7235_v11 = vadd.f32 %v5949_v60, %v5443_v26  ;;  %v3617_v2 = vpop.f32.mrb[73].mxu1 }
 0xc3d   : > { %v7237_v4 = vadd.f32 %v5443_v26, %v3617_v2  ;;  %v5950_v36 = vpop.f32.mrb[74].mxu1 }
 0xc3e   : > { %v7239_v40 = vadd.f32 %v5950_v36, %v5443_v26  ;;  %v3620_v44 = vpop.f32.mrb[75].mxu1 }
 0xc3f   : > { %v7241_v6 = vadd.f32 %v5443_v26, %v3620_v44 }
 0xc40   : > { %v3815_v46 = vpack.c.bf16 %v7239_v40, %v7235_v11 }
 0xc41   : > { %v3814_v34 = vpack.c.bf16 %v7241_v6, %v7237_v4 }
 0xc42   : > { %5960 = vmatmul.mubr.msk.bf16.gmra.mrb[64].mxu0 %vm1234_vm2, %v6795_v32 }
 0xc43   : > { %v5969_v22 = vpop.f32.mrb[76].mxu1  ;;  %5979 = vmatprep.mubr.msk.bf16.mxu0 %vm1660_vm3, %v3812_v31 }
 0xc44   : > { %v3781_v27 = vpop.f32.mrb[77].mxu1  ;;  %v3790_v38 = vadd.f32 %v5969_v22, %v5467_v0 }
 0xc45   : > { %v5970_v12 = vpop.f32.mrb[78].mxu1  ;;  %v3782_v17 = vadd.f32 %v5467_v0, %v3781_v27 }
 0xc46   : > { %v3793_v47 = vadd.f32 %v5970_v12, %v5467_v0  ;;  %v3784_v7 = vpop.f32.mrb[79].mxu1 }
 0xc47   : > { %v3785_v63 = vadd.f32 %v5467_v0, %v3784_v7 }
 0xc48   : > { %v3821_v48 = vpack.c.bf16 %v3793_v47, %v3790_v38 }
 0xc49   : > { %v3820_v42 = vpack.c.bf16 %v3785_v63, %v3782_v17 }
 0xc4b   : > { %v5973_v16 = vpop.f32.mrb[80].mxu1  ;;  %5983 = vmatprep.subr.bf16.mxu1 %v3820_v42 }
 0xc4c   : > { %v3806_v45 = vadd.f32 %v5973_v16, %v5467_v0  ;;  %v3797_v51 = vpop.f32.mrb[81].mxu1  ;;  %5984 = vmatpush3.bf16.msra.mxu1 %v3820_v42 }
 0xc4d   : > { %v5974_v32 = vpop.f32.mrb[82].mxu1  ;;  %5985 = vmatprep.subr.bf16.mxu1 %v3821_v48  ;;  %v3798_v10 = vadd.f32 %v5467_v0, %v3797_v51 }
 0xc4e   : > { %v3809_v52 = vadd.f32 %v5974_v32, %v5467_v0  ;;  %v3800_v53 = vpop.f32.mrb[83].mxu1 }
 0xc4f   : > { %v3801_v54 = vadd.f32 %v5467_v0, %v3800_v53 }
 0xc50   : > { %v7251_v50 = vpack.c.bf16 %v3809_v52, %v3806_v45  ;;  %5986 = vmatpush3.bf16.msra.mxu1 %v3821_v48 }
 0xc51   : > { %v7253_v30 = vpack.c.bf16 %v3801_v54, %v3798_v10 }
 0xc53   : > { %5999 = vmatprep.subr.bf16.mxu1 %v7253_v30 }
 0xd0d   : > { %v5957_v61 = vpop.f32.mrb[60].mxu0 }
 0xd0e   : > { %v3691_v29 = vpop.f32.mrb[61].mxu0  ;;  %v3700_v5 = vadd.f32 %v5957_v61, %v5455_v62 }
 0xd0f   : > { %v5958_v1 = vpop.f32.mrb[62].mxu0  ;;  %v3692_v9 = vadd.f32 %v5455_v62, %v3691_v29 }
 0xd10   : > { %v3703_v8 = vadd.f32 %v5958_v1, %v5455_v62  ;;  %v3694_v28 = vpop.f32.mrb[63].mxu0 }
 0xd11   : > { %v3695_v13 = vadd.f32 %v5455_v62, %v3694_v28 }
 0xd12   : > { %v3817_v14 = vpack.c.bf16 %v3703_v8, %v3700_v5 }
 0xd13   : > { %v3816_v3 = vpack.c.bf16 %v3695_v13, %v3692_v9 }
 0xd14   : > { %v3834_v57 = vsel %vm1660_vm3, %v3817_v14, 0 }
 0xd15   : > { %v5961_v15 = vpop.f32.mrb[64].mxu0  ;;  %6092 = vmatprep.subr.msk.bf16.mxu0 %vm1660_vm3, %v3816_v3  ;;  %v3831_v18 = vsel %vm1660_vm3, %v3816_v3, 0 }
 0xd16   : > { %v3707_v19 = vpop.f32.mrb[65].mxu0  ;;  %5976 = vmatpush3.bf16.xpose.msra.mxu0 %v3831_v18  ;;  %v3716_v24 = vadd.f32 %v5961_v15, %v5455_v62 }
 0xd17   : > { %v5962_v20 = vpop.f32.mrb[66].mxu0  ;;  %6093 = vmatprep.subr.msk.bf16.mxu0 %vm1660_vm3, %v3817_v14  ;;  %v3708_v21 = vadd.f32 %v5455_v62, %v3707_v19 }
 0xd18   : > { %v3719_v25 = vadd.f32 %v5962_v20, %v5455_v62  ;;  %v3710_v33 = vpop.f32.mrb[67].mxu0 }
 0xd19   : > { %v3711_v35 = vadd.f32 %v5455_v62, %v3710_v33 }
 0xd1a   : > { %v3819_v55 = vpack.c.bf16 %v3719_v25, %v3716_v24 }
 0xd1b   : > { %v3818_v26 = vpack.c.bf16 %v3711_v35, %v3708_v21 }
 0xd1c   : > { %v4009_v41 = vsel %vm1660_vm3, %v3819_v55, 0 }
 0xd1d   : > { %v4006_v39 = vsel %vm1660_vm3, %v3818_v26, 0 }
 0xd1e   : > { %5978 = vmatpush3.bf16.xpose.msra.mxu0 %v3834_v57 }
 0xd1f   : > { %6094 = vmatprep.subr.msk.bf16.mxu0 %vm1660_vm3, %v3818_v26 }
 0xd25   : > { %5980 = vmatmul.mubr.msk.bf16.vlgmr.msra.gmra.mrb[68].mxu0 %vm1660_vm3, %v3813_v58 }
 0xd26   : > { %5992 = vmatpush3.bf16.xpose.msra.mxu0 %v4006_v39  ;;  %5995 = vmatprep.mubr.msk.bf16.mxu0 %vm1660_vm3, %v3814_v34 }
 0xd27   : > { %6095 = vmatprep.subr.msk.bf16.mxu0 %vm1660_vm3, %v3819_v55 }
 0xd2e   : > { %5994 = vmatpush3.bf16.xpose.msra.mxu0 %v4009_v41 }
 0xd35   : > { %5996 = vmatmul.mubr.msk.bf16.vlgmr.msra.gmra.mrb[72].mxu0 %vm1660_vm3, %v3815_v46 }
 0xdf8   : > { %v5981_v49 = vpop.f32.mrb[68].mxu0 }
 0xdf9   : > { %v3870_v23 = vpop.f32.mrb[69].mxu0  ;;  %v3887_v37 = vmul.f32 0.35355338, %v5981_v49 }
 0xdfa   : > { %v3885_v43 = vmul.f32 0.35355338, %v3870_v23  ;;  %v5982_v56 = vpop.f32.mrb[70].mxu0 }
 0xdfb   : > { %v3873_v58 = vpop.f32.mrb[71].mxu0  ;;  %v3888_v31 = vmul.f32 0.35355338, %v5982_v56  ;;  %v3891_v44 = vadd.f32 %v3887_v37, %v6849_v59 }
 0xdfc   : > { %v3886_v60 = vmul.f32 0.35355338, %v3873_v58  ;;  %v3889_v2 = vadd.f32 %v3885_v43, %v6849_v59 }
 0xdfd   : > { %v3892_v40 = vadd.f32 %v3888_v31, %v6849_v59  ;;  %v3899_v6 = vsel %vm1234_vm2, %v3891_v44, -inf }
 0xdfe   : > { %v3893_v4 = vsel %vm1234_vm2, %v3889_v2, -inf  ;;  %v3890_v36 = vadd.f32 %v3886_v60, %v6849_v59 }
 0xdff   : > { %3894 = vmax.xlane.f32.xlu0 %v3893_v4  ;;  %v3902_v46 = vsel %vm1234_vm2, %v3892_v40, -inf }
 0xe00   : > { %v3896_v11 = vsel %vm1234_vm2, %v3890_v36, -inf }
 0xe01   : > { %3897 = vmax.xlane.f32.xlu1 %v3896_v11 }
 0xe03   : > { %3900 = vmax.xlane.f32.xlu0 %v3899_v6 }
 0xe05   : > { %3903 = vmax.xlane.f32.xlu1 %v3902_v46 }
 0xe08   : > { %v5997_v34 = vpop.f32.mrb[72].mxu0 }
 0xe09   : > { %v4045_v22 = vpop.f32.mrb[73].mxu0  ;;  %v4062_v0 = vmul.f32 0.35355338, %v5997_v34 }
 0xe0a   : > { %v4060_v27 = vmul.f32 0.35355338, %v4045_v22  ;;  %v5998_v12 = vpop.f32.mrb[74].mxu0 }
 0xe0b   : > { %v4048_v38 = vpop.f32.mrb[75].mxu0  ;;  %v4063_v47 = vmul.f32 0.35355338, %v5998_v12  ;;  %v4066_v42 = vadd.f32 %v4062_v0, %v6849_v59 }
 0xe0c   : > { %v4061_v7 = vmul.f32 0.35355338, %v4048_v38  ;;  %v4064_v17 = vadd.f32 %v4060_v27, %v6849_v59 }
 0xe0d   : > { %v4067_v45 = vadd.f32 %v4063_v47, %v6849_v59  ;;  %v4074_v51 = vsel %vm1234_vm2, %v4066_v42, -inf }
 0xe0e   : > { %v4068_v63 = vsel %vm1234_vm2, %v4064_v17, -inf  ;;  %v4065_v48 = vadd.f32 %v4061_v7, %v6849_v59 }
 0xe0f   : > { %4069 = vmax.xlane.f32.xlu0 %v4068_v63  ;;  %v4077_v32 = vsel %vm1234_vm2, %v4067_v45, -inf }
 0xe10   : > { %v4071_v16 = vsel %vm1234_vm2, %v4065_v48, -inf }
 0xe11   : > { %4072 = vmax.xlane.f32.xlu1 %v4071_v16 }
 0xe13   : > { %4075 = vmax.xlane.f32.xlu0 %v4074_v51 }
 0xe15   : > { %4078 = vmax.xlane.f32.xlu1 %v4077_v32 }
 0xe8c   : > { %v3895_v52 = vpop.xlane.xlu0 %3894 }
 0xe8d   : > { %v3905_v53 = vsub.f32 %v3889_v2, %v3895_v52 }
 0xe8e   : > { %v3898_v10 = vpop.xlane.xlu1 %3897 }
 0xe8f   : > { %v3909_v54 = vmul.f32 1.442695, %v3905_v53  ;;  %v3906_v61 = vsub.f32 %v3890_v36, %v3898_v10 }
 0xe90   : > { %v3901_v62 = vpop.xlane.xlu0 %3900 }
 0xe91   : > { %6262 = vpow2.f32 %v3909_v54  ;;  %v3911_v29 = vmul.f32 1.442695, %v3906_v61  ;;  %v3907_v1 = vsub.f32 %v3891_v44, %v3901_v62  ;;  %v5490_v61 = vld [vmem:[%s6606_s23 + $0xc] sm:$0xf] }
 0xe92   : > { %v3904_v5 = vpop.xlane.xlu1 %3903  ;;  %6096 = vmatprep.subr.msk.bf16.mxu0 %vm2667_vm7, %v5490_v61  ;;  %v4193_v62 = vsel %vm2667_vm7, %v5490_v61, 0 }
 0xe93   : > { %6264 = vpow2.f32 %v3911_v29  ;;  %v3913_v8 = vmul.f32 1.442695, %v3907_v1  ;;  %v3908_v59 = vsub.f32 %v3892_v40, %v3904_v5  ;;  %6008 = vmatpush3.bf16.msra.mxu0 %v4193_v62 }
 0xe95   : > { %6266 = vpow2.f32 %v3913_v8  ;;  %v3915_v28 = vmul.f32 1.442695, %v3908_v59 }
 0xe97   : > { %6268 = vpow2.f32 %v3915_v28 }
 0xe9b   : > { %v6263_v9 = vpop.eup %6262 }
 0xe9c   : > { %v4070_v13 = vpop.xlane.xlu0 %4069  ;;  %v3917_v14 = vsel %vm1234_vm2, %v6263_v9, 0.0 }
 0xe9d   : > { %v6265_v3 = vpop.eup %6264  ;;  %v4080_v15 = vsub.f32 %v4064_v17, %v4070_v13  ;;  %3918 = vadd.xlane.f32.xlu0 %v3917_v14 }
 0xe9e   : > { %v4073_v18 = vpop.xlane.xlu1 %4072  ;;  %v3920_v19 = vsel %vm1234_vm2, %v6265_v3, 0.0 }
 0xe9f   : > { %v6267_v20 = vpop.eup %6266  ;;  %v4084_v24 = vmul.f32 1.442695, %v4080_v15  ;;  %v4081_v25 = vsub.f32 %v4065_v48, %v4073_v18  ;;  %3921 = vadd.xlane.f32.xlu1 %v3920_v19 }
 0xea0   : > { %v4076_v33 = vpop.xlane.xlu0 %4075  ;;  %v3923_v21 = vsel %vm1234_vm2, %v6267_v20, 0.0 }
 0xea1   : > { %v6269_v35 = vpop.eup %6268  ;;  %6270 = vpow2.f32 %v4084_v24  ;;  %v4086_v55 = vmul.f32 1.442695, %v4081_v25  ;;  %v4082_v26 = vsub.f32 %v4066_v42, %v4076_v33  ;;  %3924 = vadd.xlane.f32.xlu0 %v3923_v21  ;;  %v6342_v25 = vld [vmem:[#allocation2 + $0x10] sm:$0xff]  ;;  %v6343_v21 = vld [vmem:[#allocation2] sm:$0xff] }
 0xea2   : > { %v4079_v57 = vpop.xlane.xlu1 %4078  ;;  %v3926_v39 = vsel %vm1234_vm2, %v6269_v35, 0.0 }
 0xea3   : > { %6272 = vpow2.f32 %v4086_v55  ;;  %v4088_v41 = vmul.f32 1.442695, %v4082_v26  ;;  %v4083_v49 = vsub.f32 %v4067_v45, %v4079_v57  ;;  %3927 = vadd.xlane.f32.xlu1 %v3926_v39  ;;  %v6344_v39 = vld [vmem:[#allocation2 + $0x18] sm:$0xff] }
 0xea5   : > { %6274 = vpow2.f32 %v4088_v41  ;;  %v4090_v23 = vmul.f32 1.442695, %v4083_v49  ;;  %v6345_v49 = vld [vmem:[#allocation2 + $0x8] sm:$0xff] }
 0xea7   : > { %6276 = vpow2.f32 %v4090_v23 }
 0xeab   : > { %v6271_v37 = vpop.eup %6270 }
 0xeac   : > { %v4092_v43 = vsel %vm1234_vm2, %v6271_v37, 0.0 }
 0xead   : > { %v6273_v56 = vpop.eup %6272  ;;  %4093 = vadd.xlane.f32.xlu0 %v4092_v43 }
 0xeae   : > { %v4095_v58 = vsel %vm1234_vm2, %v6273_v56, 0.0 }
 0xeaf   : > { %v6275_v31 = vpop.eup %6274  ;;  %4096 = vadd.xlane.f32.xlu1 %v4095_v58 }
 0xeb0   : > { %v4098_v60 = vsel %vm1234_vm2, %v6275_v31, 0.0 }
 0xeb1   : > { %v6277_v2 = vpop.eup %6276  ;;  %4099 = vadd.xlane.f32.xlu0 %v4098_v60 }
 0xeb2   : > { %v4101_v4 = vsel %vm1234_vm2, %v6277_v2, 0.0 }
 0xeb3   : > { %4102 = vadd.xlane.f32.xlu1 %v4101_v4 }
 0xf2a   : > { %v3919_v36 = vpop.xlane.xlu0 %3918 }
 0xf2b   : > { %6278 = vrcp.f32 %v3919_v36 }
 0xf2c   : > { %v3922_v44 = vpop.xlane.xlu1 %3921 }
 0xf2d   : > { %6280 = vrcp.f32 %v3922_v44  ;;  %v6346_v44 = vld [vmem:[#allocation2 + $0x30] sm:$0xff] }
 0xf2e   : > { %v3925_v11 = vpop.xlane.xlu0 %3924 }
 0xf2f   : > { %6282 = vrcp.f32 %v3925_v11 }
 0xf30   : > { %v3928_v40 = vpop.xlane.xlu1 %3927 }
 0xf31   : > { %6284 = vrcp.f32 %v3928_v40  ;;  %v6347_v40 = vld [vmem:[#allocation2 + $0x20] sm:$0xff] }
 0xf35   : > { %v6279_v6 = vpop.eup %6278 }
 0xf36   : > { %v3930_v46 = vmul.f32 %v6279_v6, %v6263_v9 }
 0xf37   : > { %v6281_v34 = vpop.eup %6280 }
 0xf38   : > { %v3932_v22 = vmul.f32 %v6281_v34, %v6265_v3  ;;  %5476 = vst.msk [vmem:[%s6639_s3 + $0x60] sm:$0xff] %vm1774_vm5, %v3930_v46 }
 0xf39   : > { %v6283_v0 = vpop.eup %6282 }
 0xf3a   : > { %v3934_v27 = vmul.f32 %v6283_v0, %v6267_v20  ;;  %v4094_v12 = vpop.xlane.xlu0 %4093  ;;  %5477 = vst.msk [vmem:[%s6639_s3 + $0x68] sm:$0xff] %vm1774_vm5, %v3932_v22  ;;  %v3942_v38 = vpack.c.bf16 %v3932_v22, %v3930_v46  ;;  %v5495_v20 = vld [vmem:[%s7743_s26] ss:$0 sm:$0xff]  ;;  %v6348_v0 = vld [vmem:[#allocation2 + $0x38] sm:$0xff]  ;;  %s7748_s26 = sld [smem:[#allocation26_spill]] (!%p5514_p5) }
 0xf3b   : > { %v6285_v47 = vpop.eup %6284  ;;  %6286 = vrcp.f32 %v4094_v12  ;;  %v6349_v12 = vld [vmem:[#allocation2 + $0x28] sm:$0xff] }
 0xf3c   : > { %5478 = vst.msk [vmem:[%s6639_s3 + $0x70] sm:$0xff] %vm1774_vm5, %v3934_v27  ;;  %v3936_v7 = vmul.f32 %v6285_v47, %v6269_v35  ;;  %5987 = vmatprep.mubr.msk.bf16.mxu1 %vm1234_vm2, %v3942_v38  ;;  %v4097_v17 = vpop.xlane.xlu1 %4096 }
 0xf3d   : > { %6288 = vrcp.f32 %v4097_v17 }
 0xf3e   : > { %5479 = vst.msk [vmem:[%s6639_s3 + $0x78] sm:$0xf] %vm1778_vm6, %v3936_v7  ;;  %v3943_v63 = vpack.c.bf16 %v3936_v7, %v3934_v27  ;;  %v4100_v48 = vpop.xlane.xlu0 %4099 }
 0xf3f   : > { %6290 = vrcp.f32 %v4100_v48 }
 0xf40   : > { %5988 = vmatmul.mubr.msk.bf16.vlgmr.msra.gmra.mrb[84].mxu1 %vm1234_vm2, %v3943_v63  ;;  %v4103_v42 = vpop.xlane.xlu1 %4102 }
 0xf41   : > { %6000 = vmatpush3.bf16.msra.mxu1 %v7253_v30  ;;  %6292 = vrcp.f32 %v4103_v42 }
 0xf42   : > { %6001 = vmatprep.subr.bf16.mxu1 %v7251_v50 }
 0xf45   : > { %v6287_v16 = vpop.eup %6286  ;;  %6002 = vmatpush3.bf16.msra.mxu1 %v7251_v50 }
 0xf46   : > { %v4105_v45 = vmul.f32 %v6287_v16, %v6271_v37 }
 0xf47   : > { %v6289_v51 = vpop.eup %6288 }
 0xf48   : > { %v4107_v32 = vmul.f32 %v6289_v51, %v6273_v56  ;;  %5484 = vst.msk [vmem:[%s6639_s3 + $0xe0] sm:$0xff] %vm1774_vm5, %v4105_v45 }
 0xf49   : > { %v6291_v52 = vpop.eup %6290 }
 0xf4a   : > { %v4109_v53 = vmul.f32 %v6291_v52, %v6275_v31  ;;  %5485 = vst.msk [vmem:[%s6639_s3 + $0xe8] sm:$0xff] %vm1774_vm5, %v4107_v32  ;;  %v4117_v10 = vpack.c.bf16 %v4107_v32, %v4105_v45 }
 0xf4b   : > { %v6293_v54 = vpop.eup %6292 }
 0xf4c   : > { %5486 = vst.msk [vmem:[%s6639_s3 + $0xf0] sm:$0xff] %vm1774_vm5, %v4109_v53  ;;  %v4111_v30 = vmul.f32 %v6293_v54, %v6277_v2  ;;  %6003 = vmatprep.mubr.msk.bf16.mxu1 %vm1234_vm2, %v4117_v10  ;;  %vm6397_vm5 = vmmov (!%p5514_p5), 0  }
 0xf4e   : > { %5487 = vst.msk [vmem:[%s6639_s3 + $0xf8] sm:$0xf] %vm1778_vm6, %v4111_v30  ;;  %v4118_v50 = vpack.c.bf16 %v4111_v30, %v4109_v53  ;;  %s7744_s3 = scalar_lea.vmem %s7674_s17, %s6556_s9  ;;  %vm5014_vm6 = vcmask (!%p5514_p5), 17408  }
 0xf50   : > { %6004 = vmatmul.mubr.msk.bf16.vlgmr.msra.gmra.mrb[88].mxu1 %vm1234_vm2, %v4118_v50 }
0x1013   : > { %v5989_v29 = vpop.f32.mrb[84].mxu1 }
0x1014   : > { %v3984_v1 = vpop.f32.mrb[85].mxu1 }
0x1015   : > { %v5990_v5 = vpop.f32.mrb[86].mxu1 }
0x1016   : > { %v4175_v8 = vpack.c.bf16 %v5990_v5, %v5989_v29  ;;  %v3987_v59 = vpop.f32.mrb[87].mxu1 }
0x1017   : > { %v4174_v28 = vpack.c.bf16 %v3987_v59, %v3984_v1 }
0x1019   : > { %6009 = vmatprep.mubr.msk.bf16.mxu0 %vm1660_vm3, %v4174_v28 }
0x101a   : > { %6010 = vmatmul.mubr.msk.bf16.vlgmr.msra.gmra.mrb[40].mxu0 %vm1660_vm3, %v4175_v8 }
0x1023   : > { %v6005_v9 = vpop.f32.mrb[88].mxu1 }
0x1024   : > { %v4159_v13 = vpop.f32.mrb[89].mxu1 }
0x1025   : > { %v6006_v14 = vpop.f32.mrb[90].mxu1 }
0x1026   : > { %v4177_v3 = vpack.c.bf16 %v6006_v14, %v6005_v9  ;;  %v4162_v15 = vpop.f32.mrb[91].mxu1 }
0x1027   : > { %v4176_v18 = vpack.c.bf16 %v4162_v15, %v4159_v13 }
0x1029   : > { %6013 = vmatprep.mubr.msk.bf16.mxu0 %vm1660_vm3, %v4176_v18 }
0x102a   : > { %6014 = vmatmul.mubr.msk.bf16.gmra.mrb[44].mxu0 %vm1660_vm3, %v4177_v3  ;;  %vm4915_vm3 = vcmask (!%p5514_p5), 1040384  }
0x10ed   : > { %v6011_v19 = vpop.f32.mrb[40].mxu0 }
0x10ee   : > { %v4229_v24 = vpop.f32.mrb[41].mxu0  ;;  %v4270_v33 = vadd.f32 %v6342_v25, %v6011_v19 }
0x10ef   : > { %v4268_v35 = vadd.f32 %v6343_v21, %v4229_v24  ;;  %v6012_v55 = vpop.f32.mrb[42].mxu0 }
0x10f0   : > { %v4232_v26 = vpop.f32.mrb[43].mxu0  ;;  %v4271_v41 = vadd.f32 %v6344_v39, %v6012_v55  ;;  %v7335_v37 = vadd.f32 %v5495_v20, %v4270_v33 }
0x10f1   : > { %v7333_v57 = vadd.f32 %v5495_v20, %v4268_v35  ;;  %v4269_v23 = vadd.f32 %v6345_v49, %v4232_v26 }
0x10f2   : > { %v7341_v58 = vadd.f32 %v5495_v20, %v4271_v41  ;;  %v4299_v60 = vsel %vm1234_vm2, %v7335_v37, 0.0 }
0x10f3   : > { %v7337_v43 = vadd.f32 %v5495_v20, %v4269_v23  ;;  %v4293_v56 = vsel %vm1234_vm2, %v7333_v57, 0.0 }
0x10f4   : > { %4294 = vadd.xlane.f32.xlu0 %v4293_v56  ;;  %v4302_v2 = vsel %vm1234_vm2, %v7341_v58, 0.0 }
0x10f5   : > { %v4296_v31 = vsel %vm1234_vm2, %v7337_v43, 0.0 }
0x10f6   : > { %4297 = vadd.xlane.f32.xlu1 %v4296_v31 }
0x10f8   : > { %4300 = vadd.xlane.f32.xlu0 %v4299_v60 }
0x10fa   : > { %4303 = vadd.xlane.f32.xlu1 %v4302_v2 }
0x10fd   : > { %v6015_v4 = vpop.f32.mrb[44].mxu0 }
0x10fe   : > { %v4245_v36 = vpop.f32.mrb[45].mxu0  ;;  %v4274_v11 = vadd.f32 %v6346_v44, %v6015_v4  ;;  %v6144_v4 = vld [vmem:[%s6619_s13] sm:$0xff]  }
0x10ff   : > { %v4272_v6 = vadd.f32 %v6347_v40, %v4245_v36  ;;  %v6016_v46 = vpop.f32.mrb[46].mxu0  ;;  %6017 = vmatprep.subr.bf16.mxu1 %v6144_v4  ;;  %v6145_v36 = vld [vmem:[%s6619_s13 + $0x8] sm:$0xff]  }
0x1100   : > { %v4248_v34 = vpop.f32.mrb[47].mxu0  ;;  %v4275_v27 = vadd.f32 %v6348_v0, %v6016_v46  ;;  %v7351_v47 = vadd.f32 %v5495_v20, %v4274_v11  ;;  %6018 = vmatpush3.bf16.msra.mxu1 %v6144_v4 }
0x1101   : > { %v7349_v22 = vadd.f32 %v5495_v20, %v4272_v6  ;;  %v4273_v38 = vadd.f32 %v6349_v12, %v4248_v34  ;;  %6019 = vmatprep.subr.bf16.mxu1 %v6145_v36 }
0x1102   : > { %v7357_v63 = vadd.f32 %v5495_v20, %v4275_v27  ;;  %v4311_v42 = vsel %vm1234_vm2, %v7351_v47, 0.0 }
0x1103   : > { %v7353_v7 = vadd.f32 %v5495_v20, %v4273_v38  ;;  %v4305_v17 = vsel %vm1234_vm2, %v7349_v22, 0.0 }
0x1104   : > { %4306 = vadd.xlane.f32.xlu0 %v4305_v17  ;;  %v4314_v16 = vsel %vm1234_vm2, %v7357_v63, 0.0  ;;  %6020 = vmatpush3.bf16.msra.mxu1 %v6145_v36 }
0x1105   : > { %v4308_v48 = vsel %vm1234_vm2, %v7353_v7, 0.0 }
0x1106   : > { %4309 = vadd.xlane.f32.xlu1 %v4308_v48 }
0x1108   : > { %4312 = vadd.xlane.f32.xlu0 %v4311_v42 }
0x110a   : > { %4315 = vadd.xlane.f32.xlu1 %v4314_v16  ;;  %v5496_v16 = vld [vmem:[%s7744_s3] ss:$0 sm:$0xff]  ;;  %s7749_s3 = sld [smem:[#allocation27_spill]] (!%p5514_p5) }
0x1181   : > { %v4295_v45 = vpop.xlane.xlu0 %4294 }
0x1182   : > { %v4317_v51 = vmul.f32 0.03125, %v4295_v45 }
0x1183   : > { %v4298_v32 = vpop.xlane.xlu1 %4297 }
0x1184   : > { %v7366_v52 = vsub.f32 %v7333_v57, %v4317_v51  ;;  %v4318_v53 = vmul.f32 0.03125, %v4298_v32 }
0x1185   : > { %v4301_v10 = vpop.xlane.xlu0 %4300 }
0x1186   : > { %v7369_v54 = vsub.f32 %v7337_v43, %v4318_v53  ;;  %v4319_v30 = vmul.f32 0.03125, %v4301_v10  ;;  %v4333_v50 = vmul.f32 %v7366_v52, %v7366_v52 }
0x1187   : > { %v4304_v61 = vpop.xlane.xlu1 %4303 }
0x1188   : > { %v7374_v62 = vsub.f32 %v7335_v37, %v4319_v30  ;;  %v4320_v29 = vmul.f32 0.03125, %v4304_v61  ;;  %v4341_v1 = vsel %vm1234_vm2, %v4333_v50, 0.0  ;;  %v4334_v5 = vmul.f32 %v7369_v54, %v7369_v54 }
0x1189   : > { %4342 = vadd.xlane.f32.xlu0 %v4341_v1 }
0x118a   : > { %v7380_v8 = vsub.f32 %v7341_v58, %v4320_v29  ;;  %v4344_v59 = vsel %vm1234_vm2, %v4334_v5, 0.0  ;;  %v4335_v28 = vmul.f32 %v7374_v62, %v7374_v62  ;;  %v5497_v5 = vld [vmem:[%s7745_s0] ss:$0 sm:$0xff]  ;;  %s7750_s0 = sld [smem:[#allocation29_spill]] (!%p5514_p5) }
0x118b   : > { %4345 = vadd.xlane.f32.xlu1 %v4344_v59 }
0x118c   : > { %v4347_v9 = vsel %vm1234_vm2, %v4335_v28, 0.0  ;;  %v4336_v13 = vmul.f32 %v7380_v8, %v7380_v8 }
0x118d   : > { %4348 = vadd.xlane.f32.xlu0 %v4347_v9 }
0x118e   : > { %v4350_v14 = vsel %vm1234_vm2, %v4336_v13, 0.0 }
0x118f   : > { %4351 = vadd.xlane.f32.xlu1 %v4350_v14 }
0x1191   : > { %v4307_v3 = vpop.xlane.xlu0 %4306 }
0x1192   : > { %v4321_v15 = vmul.f32 0.03125, %v4307_v3 }
0x1193   : > { %v4310_v18 = vpop.xlane.xlu1 %4309 }
0x1194   : > { %v7390_v19 = vsub.f32 %v7349_v22, %v4321_v15  ;;  %v4322_v20 = vmul.f32 0.03125, %v4310_v18 }
0x1195   : > { %v4313_v24 = vpop.xlane.xlu0 %4312 }
0x1196   : > { %v7393_v25 = vsub.f32 %v7353_v7, %v4322_v20  ;;  %v4323_v33 = vmul.f32 0.03125, %v4313_v24  ;;  %v4337_v21 = vmul.f32 %v7390_v19, %v7390_v19 }
0x1197   : > { %v4316_v35 = vpop.xlane.xlu1 %4315 }
0x1198   : > { %v7398_v55 = vsub.f32 %v7351_v47, %v4323_v33  ;;  %v4324_v26 = vmul.f32 0.03125, %v4316_v35  ;;  %v4353_v39 = vsel %vm1234_vm2, %v4337_v21, 0.0  ;;  %v4338_v41 = vmul.f32 %v7393_v25, %v7393_v25 }
0x1199   : > { %4354 = vadd.xlane.f32.xlu0 %v4353_v39 }
0x119a   : > { %v7404_v49 = vsub.f32 %v7357_v63, %v4324_v26  ;;  %v4356_v23 = vsel %vm1234_vm2, %v4338_v41, 0.0  ;;  %v4339_v56 = vmul.f32 %v7398_v55, %v7398_v55 }
0x119b   : > { %4357 = vadd.xlane.f32.xlu1 %v4356_v23 }
0x119c   : > { %v4359_v31 = vsel %vm1234_vm2, %v4339_v56, 0.0  ;;  %v4340_v60 = vmul.f32 %v7404_v49, %v7404_v49 }
0x119d   : > { %4360 = vadd.xlane.f32.xlu0 %v4359_v31 }
0x119e   : > { %v4362_v2 = vsel %vm1234_vm2, %v4340_v60, 0.0 }
0x119f   : > { %4363 = vadd.xlane.f32.xlu1 %v4362_v2 }
0x1216   : > { %v4343_v44 = vpop.xlane.xlu0 %4342 }
0x1217   : > { %v4365_v11 = vmul.f32 0.03125, %v4343_v44 }
0x1218   : > { %v4346_v40 = vpop.xlane.xlu1 %4345 }
0x1219   : > { %v4373_v6 = vadd.f32 1e-05, %v4365_v11  ;;  %v4366_v46 = vmul.f32 0.03125, %v4346_v40 }
0x121a   : > { %v4349_v34 = vpop.xlane.xlu0 %4348 }
0x121b   : > { %6294 = vrsqrt.f32 %v4373_v6  ;;  %v4374_v0 = vadd.f32 1e-05, %v4366_v46  ;;  %v4367_v27 = vmul.f32 0.03125, %v4349_v34 }
0x121c   : > { %v4352_v12 = vpop.xlane.xlu1 %4351 }
0x121d   : > { %6296 = vrsqrt.f32 %v4374_v0  ;;  %v4375_v38 = vadd.f32 1e-05, %v4367_v27  ;;  %v4368_v17 = vmul.f32 0.03125, %v4352_v12  ;;  %v6147_v12 = vld [vmem:[%s6629_s15 + $0x8] sm:$0xff]  }
0x121f   : > { %6298 = vrsqrt.f32 %v4375_v38  ;;  %v4376_v48 = vadd.f32 1e-05, %v4368_v17  ;;  %v6149_v38 = vld [vmem:[%s6629_s15 + $0x18] sm:$0xff]   ;;  %v7446_v17 = vld [vmem:[%s1080_s6] ss:$0 sm:$0xff] }
0x1221   : > { %6300 = vrsqrt.f32 %v4376_v48 }
0x1225   : > { %v6295_v42 = vpop.eup %6294 }
0x1226   : > { %v4389_v45 = vmul.f32 %v6295_v42, %v7366_v52  ;;  %v4355_v51 = vpop.xlane.xlu0 %4354 }
0x1227   : > { %v6297_v32 = vpop.eup %6296  ;;  %v4369_v53 = vmul.f32 0.03125, %v4355_v51 }
0x1228   : > { %v4390_v10 = vmul.f32 %v6297_v32, %v7369_v54  ;;  %v4358_v30 = vpop.xlane.xlu1 %4357  ;;  %v4403_v50 = vmul.f32 %v5496_v16, %v4389_v45 }
0x1229   : > { %v6299_v61 = vpop.eup %6298  ;;  %v4377_v29 = vadd.f32 1e-05, %v4369_v53  ;;  %v4370_v1 = vmul.f32 0.03125, %v4358_v30 }
0x122a   : > { %v4391_v59 = vmul.f32 %v6299_v61, %v7374_v62  ;;  %v4361_v28 = vpop.xlane.xlu0 %4360  ;;  %v4404_v9 = vmul.f32 %v5496_v16, %v4390_v10  ;;  %v4417_v18 = vadd.f32 %v5497_v5, %v4403_v50 }
0x122b   : > { %v6301_v52 = vpop.eup %6300  ;;  %6302 = vrsqrt.f32 %v4377_v29  ;;  %v4378_v13 = vadd.f32 1e-05, %v4370_v1  ;;  %v4371_v14 = vmul.f32 0.03125, %v4361_v28 }
0x122c   : > { %v4405_v3 = vmul.f32 %v5496_v16, %v4391_v59  ;;  %v4392_v54 = vmul.f32 %v6301_v52, %v7380_v8  ;;  %v4364_v15 = vpop.xlane.xlu1 %4363  ;;  %v4418_v20 = vadd.f32 %v5497_v5, %v4404_v9 }
0x122d   : > { %6304 = vrsqrt.f32 %v4378_v13  ;;  %v4379_v24 = vadd.f32 1e-05, %v4371_v14  ;;  %v4372_v33 = vmul.f32 0.03125, %v4364_v15 }
0x122e   : > { %v4406_v21 = vmul.f32 %v5496_v16, %v4392_v54  ;;  %v4425_v35 = vpack.c.bf16 %v4418_v20, %v4417_v18  ;;  %v4419_v62 = vadd.f32 %v5497_v5, %v4405_v3 }
0x122f   : > { %6306 = vrsqrt.f32 %v4379_v24  ;;  %v4380_v26 = vadd.f32 1e-05, %v4372_v33 }
0x1230   : > { %6021 = vmatprep.mubr.msk.bf16.mxu1 %vm1234_vm2, %v4425_v35  ;;  %v4420_v39 = vadd.f32 %v5497_v5, %v4406_v21 }
0x1231   : > { %6308 = vrsqrt.f32 %v4380_v26 }
0x1232   : > { %v4426_v41 = vpack.c.bf16 %v4420_v39, %v4419_v62 }
0x1234   : > { %6022 = vmatmul.mubr.msk.bf16.vlgmr.msra.gmra.mrb[92].mxu1 %vm1234_vm2, %v4426_v41 }
0x1235   : > { %v6303_v23 = vpop.eup %6302 }
0x1236   : > { %v4393_v8 = vmul.f32 %v6303_v23, %v7390_v19 }
0x1237   : > { %v6305_v56 = vpop.eup %6304 }
0x1238   : > { %v4394_v31 = vmul.f32 %v6305_v56, %v7393_v25  ;;  %v4407_v60 = vmul.f32 %v5496_v16, %v4393_v8 }
0x1239   : > { %v6307_v2 = vpop.eup %6306 }
0x123a   : > { %v4395_v4 = vmul.f32 %v6307_v2, %v7398_v55  ;;  %v4408_v36 = vmul.f32 %v5496_v16, %v4394_v31  ;;  %v4421_v40 = vadd.f32 %v5497_v5, %v4407_v60  ;;  %v6146_v55 = vld [vmem:[%s6629_s15] sm:$0xff]  }
0x123b   : > { %v6309_v44 = vpop.eup %6308  ;;  %6029 = vmatprep.subr.bf16.mxu1 %v6146_v55 }
0x123c   : > { %v4396_v11 = vmul.f32 %v6309_v44, %v7404_v49  ;;  %v4422_v6 = vadd.f32 %v5497_v5, %v4408_v36  ;;  %v4409_v46 = vmul.f32 %v5496_v16, %v4395_v4  ;;  %6030 = vmatpush3.bf16.msra.mxu1 %v6146_v55  ;;  %v6148_v49 = vld [vmem:[%s6629_s15 + $0x10] sm:$0xff]   ;;  %v6395_v44 = vmov -1.0  }
0x123d   : > { %6031 = vmatprep.subr.bf16.mxu1 %v6147_v12 }
0x123e   : > { %v4427_v34 = vpack.c.bf16 %v4422_v6, %v4421_v40  ;;  %v4410_v19 = vmul.f32 %v5496_v16, %v4396_v11  ;;  %v4423_v25 = vadd.f32 %v5497_v5, %v4409_v46 }
0x1240   : > { %6025 = vmatprep.mubr.msk.bf16.mxu1 %vm1234_vm2, %v4427_v34  ;;  %v4424_v0 = vadd.f32 %v5497_v5, %v4410_v19  ;;  %6032 = vmatpush3.bf16.msra.mxu1 %v6147_v12 }
0x1241   : > { %6033 = vmatprep.subr.bf16.mxu1 %v6148_v49 }
0x1242   : > { %v4428_v27 = vpack.c.bf16 %v4424_v0, %v4423_v25 }
0x1244   : > { %6026 = vmatmul.mubr.msk.bf16.gmra.mrb[96].mxu1 %vm1234_vm2, %v4428_v27 }
0x1245   : > { %6034 = vmatpush3.bf16.msra.mxu1 %v6148_v49 }
0x1246   : > { %6035 = vmatprep.subr.bf16.mxu1 %v6149_v38 }
0x1249   : > { %6036 = vmatpush3.bf16.msra.mxu1 %v6149_v38 }
0x1307   : > { %v6023_v48 = vpop.f32.mrb[92].mxu1 }
0x1308   : > { %v4507_v42 = vadd.f32 %v6023_v48, %v7446_v17  ;;  %v4498_v16 = vpop.f32.mrb[93].mxu1 }
0x1309   : > { %v4499_v45 = vadd.f32 %v7446_v17, %v4498_v16  ;;  %v6024_v51 = vpop.f32.mrb[94].mxu1 }
0x130a   : > { %v4539_v32 = vmul.f32 0.70710677, %v4507_v42  ;;  %v4510_v53 = vadd.f32 %v6024_v51, %v7446_v17  ;;  %v4501_v10 = vpop.f32.mrb[95].mxu1  ;;  %v7467_v41 = vmul.f32 0.5, %v4507_v42 }
0x130b   : > { %v7451_v30 = vmul.f32 0.70710677, %v4499_v45  ;;  %v4502_v29 = vadd.f32 %v7446_v17, %v4501_v10  ;;  %v7475_v60 = vmul.f32 0.5, %v4499_v45 }
0x130c   : > { %v4563_v50 = vand.u32 2147483647, %v4539_v32  ;;  %v7453_v61 = vmul.f32 0.70710677, %v4510_v53  ;;  %vm4547_vm8 = vcmp.ge.f32.partialorder %v4539_v32, 0.0  ;;  %v7477_v2 = vmul.f32 0.5, %v4510_v53 }
0x130d   : > { %v4561_v1 = vand.u32 2147483647, %v7451_v30  ;;  %v7458_v52 = vmul.f32 0.70710677, %v4502_v29  ;;  %v7485_v11 = vsel %vm4547_vm8, 1.0, %v6395_v44  ;;  %v7487_v6 = vmul.f32 0.5, %v4502_v29 }
0x130e   : > { %v4571_v5 = vmul.f32 0.3275911, %v4563_v50  ;;  %v4564_v28 = vand.u32 2147483647, %v7453_v61  ;;  %v4675_v20 = vsub.f32 0.0, %v4563_v50  ;;  %vm4545_vm9 = vcmp.ge.f32.partialorder %v7451_v30, 0.0 }
0x130f   : > { %v4569_v59 = vmul.f32 0.3275911, %v4561_v1  ;;  %v4562_v3 = vand.u32 2147483647, %v7458_v52  ;;  %v4673_v33 = vsub.f32 0.0, %v4561_v1  ;;  %vm4548_vm10 = vcmp.ge.f32.partialorder %v7453_v61, 0.0 }
0x1310   : > { %v4579_v9 = vadd.f32 1.0, %v4571_v5  ;;  %v4572_v14 = vmul.f32 0.3275911, %v4564_v28  ;;  %v4676_v26 = vsub.f32 0.0, %v4564_v28  ;;  %v4683_v31 = vmul.f32 %v4675_v20, %v4563_v50 }
0x1311   : > { %v4577_v13 = vadd.f32 1.0, %v4569_v59  ;;  %v4570_v15 = vmul.f32 0.3275911, %v4562_v3  ;;  %v4681_v40 = vmul.f32 %v4673_v33, %v4561_v1  ;;  %v4674_v0 = vsub.f32 0.0, %v4562_v3 }
0x1312   : > { %6310 = vrcp.f32 %v4579_v9  ;;  %v4580_v54 = vadd.f32 1.0, %v4572_v14  ;;  %v4684_v25 = vmul.f32 %v4676_v26, %v4564_v28  ;;  %v4693_v48 = vmul.f32 1.442695, %v4683_v31 }
0x1313   : > { %6312 = vrcp.f32 %v4577_v13  ;;  %v4578_v18 = vadd.f32 1.0, %v4570_v15  ;;  %v4689_v51 = vmul.f32 1.442695, %v4681_v40  ;;  %v4682_v59 = vmul.f32 %v4674_v0, %v4562_v3 }
0x1314   : > { %6314 = vrcp.f32 %v4580_v54  ;;  %v4695_v50 = vmul.f32 1.442695, %v4684_v25  ;;  %vm4546_vm11 = vcmp.ge.f32.partialorder %v7458_v52, 0.0 }
0x1315   : > { %6316 = vrcp.f32 %v4578_v18 }
0x1317   : > { %v6027_v24 = vpop.f32.mrb[96].mxu1 }
0x1318   : > { %v7462_v21 = vadd.f32 %v6027_v24, %v7446_v17  ;;  %v4514_v35 = vpop.f32.mrb[97].mxu1 }
0x1319   : > { %v7465_v62 = vadd.f32 %v7446_v17, %v4514_v35  ;;  %v6028_v39 = vpop.f32.mrb[98].mxu1  ;;  %v4691_v35 = vmul.f32 1.442695, %v4682_v59 }
0x131a   : > { %v7470_v23 = vmul.f32 0.70710677, %v7462_v21  ;;  %v7473_v8 = vadd.f32 %v6028_v39, %v7446_v17  ;;  %v4517_v56 = vpop.f32.mrb[99].mxu1 }
0x131b   : > { %v7480_v4 = vmul.f32 0.70710677, %v7465_v62  ;;  %v7510_v18 = vadd.f32 %v7446_v17, %v4517_v56 }
0x131c   : > { %v7482_v36 = vpop.eup %6310  ;;  %v4567_v46 = vand.u32 2147483647, %v7470_v23  ;;  %v7497_v49 = vmul.f32 0.70710677, %v7473_v8  ;;  %vm4551_vm13 = vcmp.ge.f32.partialorder %v7470_v23, 0.0 }
0x131d   : > { %v7490_v34 = vpop.eup %6312  ;;  %v4603_v19 = vmul.f32 1.0614054, %v7482_v36  ;;  %v4565_v27 = vand.u32 2147483647, %v7480_v4  ;;  %v7517_v17 = vmul.f32 0.70710677, %v7510_v18 }
0x131e   : > { %v4601_v55 = vmul.f32 1.0614054, %v7490_v34  ;;  %v4575_v12 = vmul.f32 0.3275911, %v4567_v46  ;;  %v7499_v16 = vpop.eup %6314  ;;  %v4568_v28 = vand.u32 2147483647, %v7497_v49 }
0x131f   : > { %v4611_v38 = vadd.f32 -1.4531521, %v4603_v19  ;;  %v4573_v42 = vmul.f32 0.3275911, %v4565_v27  ;;  %v4604_v10 = vmul.f32 1.0614054, %v7499_v16  ;;  %v7504_v1 = vpop.eup %6316 }
0x1320   : > { %v4609_v45 = vadd.f32 -1.4531521, %v4601_v55  ;;  %v4583_v32 = vadd.f32 1.0, %v4575_v12  ;;  %v4602_v14 = vmul.f32 1.0614054, %v7504_v1  ;;  %v4679_v26 = vsub.f32 0.0, %v4567_v46 }
0x1321   : > { %v4619_v53 = vmul.f32 %v7482_v36, %v4611_v38  ;;  %v4581_v29 = vadd.f32 1.0, %v4573_v42  ;;  %v4612_v13 = vadd.f32 -1.4531521, %v4604_v10  ;;  %v4576_v15 = vmul.f32 0.3275911, %v4568_v28 }
0x1322   : > { %v4617_v5 = vmul.f32 %v7490_v34, %v4609_v45  ;;  %6318 = vrcp.f32 %v4583_v32  ;;  %v4610_v3 = vadd.f32 -1.4531521, %v4602_v14  ;;  %v4677_v0 = vsub.f32 0.0, %v4565_v27 }
0x1323   : > { %v4627_v9 = vadd.f32 1.4214138, %v4619_v53  ;;  %6320 = vrcp.f32 %v4581_v29  ;;  %v4620_v24 = vmul.f32 %v7499_v16, %v4612_v13  ;;  %v4584_v39 = vadd.f32 1.0, %v4576_v15 }
0x1324   : > { %6322 = vpow2.f32 %v4693_v48  ;;  %v4625_v54 = vadd.f32 1.4214138, %v4617_v5  ;;  %v4618_v19 = vmul.f32 %v7504_v1, %v4610_v3  ;;  %v4553_v55 = vsel %vm4545_vm9, 1.0, %v6395_v44 }
0x1325   : > { %v4635_v20 = vmul.f32 %v7482_v36, %v4627_v9  ;;  %6324 = vpow2.f32 %v4689_v51  ;;  %v4628_v40 = vadd.f32 1.4214138, %v4620_v24  ;;  %v4687_v42 = vmul.f32 %v4679_v26, %v4567_v46 }
0x1326   : > { %v4633_v33 = vmul.f32 %v7490_v34, %v4625_v54  ;;  %6326 = vpow2.f32 %v4695_v50  ;;  %v4626_v38 = vadd.f32 1.4214138, %v4618_v19  ;;  %v7526_v45 = vand.u32 2147483647, %v7517_v17 }
0x1327   : > { %v4643_v31 = vadd.f32 -0.28449672, %v4635_v20  ;;  %6328 = vrcp.f32 %v4584_v39  ;;  %v4636_v12 = vmul.f32 %v7499_v16, %v4628_v40  ;;  %v4556_v32 = vsel %vm4548_vm10, 1.0, %v6395_v44 }
0x1328   : > { %v4641_v25 = vadd.f32 -0.28449672, %v4633_v33  ;;  %6330 = vpow2.f32 %v4691_v35  ;;  %v4634_v10 = vmul.f32 %v7504_v1, %v4626_v38  ;;  %v4685_v29 = vmul.f32 %v4677_v0, %v4565_v27 }
0x1329   : > { %v4651_v56 = vmul.f32 %v7482_v36, %v4643_v31  ;;  %v4644_v53 = vadd.f32 -0.28449672, %v4636_v12  ;;  %v4680_v5 = vsub.f32 0.0, %v4568_v28  ;;  %v4574_v59 = vmul.f32 0.3275911, %v7526_v45 }
0x132a   : > { %v4649_v48 = vmul.f32 %v7490_v34, %v4641_v25  ;;  %v4642_v14 = vadd.f32 -0.28449672, %v4634_v10  ;;  %v4701_v20 = vmul.f32 1.442695, %v4687_v42  ;;  %vm4552_vm14 = vcmp.ge.f32.partialorder %v7497_v49, 0.0 }
0x132b   : > { %v4659_v51 = vadd.f32 0.2548296, %v4651_v56  ;;  %v4652_v13 = vmul.f32 %v7499_v16, %v4644_v53  ;;  %v4582_v3 = vadd.f32 1.0, %v4574_v59  ;;  %v4688_v40 = vmul.f32 %v4680_v5, %v4568_v28 }
0x132c   : > { %v7532_v30 = vpop.eup %6318  ;;  %v4657_v50 = vadd.f32 0.2548296, %v4649_v48  ;;  %v4650_v26 = vmul.f32 %v7504_v1, %v4642_v14  ;;  %v4697_v5 = vmul.f32 1.442695, %v4685_v29  ;;  %vm4549_vm15 = vcmp.ge.f32.partialorder %v7480_v4, 0.0 }
0x132d   : > { %v7535_v9 = vpop.eup %6320  ;;  %v4667_v46 = vmul.f32 %v7482_v36, %v4659_v51  ;;  %v4607_v61 = vmul.f32 1.0614054, %v7532_v30  ;;  %v4660_v35 = vadd.f32 0.2548296, %v4652_v13  ;;  %6332 = vrcp.f32 %v4582_v3 }
0x132e   : > { %v6323_v54 = vpop.eup %6322  ;;  %v4665_v15 = vmul.f32 %v7490_v34, %v4657_v50  ;;  %v4605_v24 = vmul.f32 1.0614054, %v7535_v9  ;;  %v4658_v56 = vadd.f32 0.2548296, %v4650_v26  ;;  %6334 = vpow2.f32 %v4701_v20 }
0x132f   : > { %v6325_v27 = vpop.eup %6324  ;;  %v4707_v33 = vmul.f32 %v6323_v54, %v4667_v46  ;;  %v4615_v39 = vadd.f32 -1.4531521, %v4607_v61  ;;  %v4668_v0 = vmul.f32 %v7499_v16, %v4660_v35  ;;  %v4703_v61 = vmul.f32 1.442695, %v4688_v40 }
0x1330   : > { %v4705_v31 = vmul.f32 %v6325_v27, %v4665_v15  ;;  %v4613_v36 = vadd.f32 -1.4531521, %v4605_v24  ;;  %v6327_v19 = vpop.eup %6326  ;;  %v4666_v28 = vmul.f32 %v7504_v1, %v4658_v56  ;;  %v4554_v1 = vsel %vm4546_vm11, 1.0, %v6395_v44 }
0x1331   : > { %v4715_v25 = vsub.f32 1.0, %v4707_v33  ;;  %v4623_v34 = vmul.f32 %v7532_v30, %v4615_v39  ;;  %v7545_v12 = vpop.eup %6328  ;;  %v4708_v51 = vmul.f32 %v6327_v19, %v4668_v0  ;;  %6336 = vpow2.f32 %v4697_v5 }
0x1332   : > { %v4713_v38 = vsub.f32 1.0, %v4705_v31  ;;  %v4621_v48 = vmul.f32 %v7535_v9, %v4613_v36  ;;  %v6331_v10 = vpop.eup %6330  ;;  %v4608_v59 = vmul.f32 1.0614054, %v7545_v12  ;;  %6338 = vpow2.f32 %v4703_v61 }
0x1333   : > { %v4723_v42 = vmul.f32 %v4715_v25, %v7485_v11  ;;  %v4631_v53 = vadd.f32 1.4214138, %v4623_v34  ;;  %v4716_v46 = vsub.f32 1.0, %v4708_v51  ;;  %v4706_v13 = vmul.f32 %v6331_v10, %v4666_v28 }
0x1334   : > { %v4721_v50 = vmul.f32 %v4713_v38, %v4553_v55  ;;  %v4629_v16 = vadd.f32 1.4214138, %v4621_v48  ;;  %v4616_v20 = vadd.f32 -1.4531521, %v4608_v59  ;;  %v4678_v11 = vsub.f32 0.0, %v7526_v45 }
0x1335   : > { %v4639_v14 = vmul.f32 %v7532_v30, %v4631_v53  ;;  %v4731_v54 = vadd.f32 1.0, %v4723_v42  ;;  %v4724_v24 = vmul.f32 %v4716_v46, %v4556_v32  ;;  %v4714_v55 = vsub.f32 1.0, %v4706_v13 }
0x1336   : > { %v4637_v15 = vmul.f32 %v7535_v9, %v4629_v16  ;;  %v4729_v3 = vadd.f32 1.0, %v4721_v50  ;;  %v4624_v33 = vmul.f32 %v7545_v12, %v4616_v20  ;;  %v4686_v52 = vmul.f32 %v4678_v11, %v7526_v45 }
0x1337   : > { %v4647_v29 = vadd.f32 -0.28449672, %v4639_v14  ;;  %v4732_v35 = vadd.f32 1.0, %v4724_v24  ;;  %v4722_v26 = vmul.f32 %v4714_v55, %v4554_v1  ;;  %v6333_v31 = vpop.eup %6332  ;;  %v4739_v36 = vmul.f32 %v4731_v54, %v7467_v41 }
0x1338   : > { %v4645_v27 = vadd.f32 -0.28449672, %v4637_v15  ;;  %v4632_v40 = vadd.f32 1.4214138, %v4624_v33  ;;  %v4606_v56 = vmul.f32 1.0614054, %v6333_v31  ;;  %v6335_v34 = vpop.eup %6334  ;;  %v4737_v38 = vmul.f32 %v4729_v3, %v7475_v60 }
0x1339   : > { %v4655_v39 = vmul.f32 %v7532_v30, %v4647_v29  ;;  %v4740_v19 = vmul.f32 %v4732_v35, %v7477_v2  ;;  %v4730_v25 = vadd.f32 1.0, %v4722_v26  ;;  %v4699_v50 = vmul.f32 1.442695, %v4686_v52 }
0x133a   : > { %v4653_v32 = vmul.f32 %v7535_v9, %v4645_v27  ;;  %v4640_v42 = vmul.f32 %v7545_v12, %v4632_v40  ;;  %v4614_v53 = vadd.f32 -1.4531521, %v4606_v56  ;;  %v4559_v54 = vsel %vm4551_vm13, 1.0, %v6395_v44 }
0x133b   : > { %v4663_v0 = vadd.f32 0.2548296, %v4655_v39  ;;  %v4746_v51 = vpack.c.bf16 %v4740_v19, %v4739_v36  ;;  %v4738_v28 = vmul.f32 %v4730_v25, %v7487_v6  ;;  %v6337_v46 = vpop.eup %6336  ;;  %6340 = vpow2.f32 %v4699_v50 }
0x133c   : > { %v4661_v48 = vadd.f32 0.2548296, %v4653_v32  ;;  %v4648_v10 = vadd.f32 -0.28449672, %v4640_v42  ;;  %v4622_v16 = vmul.f32 %v6333_v31, %v4614_v53  ;;  %v4560_v55 = vsel %vm4552_vm14, 1.0, %v6395_v44 }
0x133d   : > { %v4671_v41 = vmul.f32 %v7532_v30, %v4663_v0  ;;  %v4745_v45 = vpack.c.bf16 %v4738_v28, %v4737_v38  ;;  %v6339_v30 = vpop.eup %6338  ;;  %v4535_v35 = vmul.f32 0.5, %v7462_v21  ;;  %v4557_v26 = vsel %vm4549_vm15, 1.0, %v6395_v44 }
0x133e   : > { %v4656_v5 = vmul.f32 %v7545_v12, %v4648_v10  ;;  %v4669_v59 = vmul.f32 %v7535_v9, %v4661_v48  ;;  %v4630_v60 = vadd.f32 1.4214138, %v4622_v16  ;;  %v4536_v39 = vmul.f32 0.5, %v7473_v8 }
0x133f   : > { %v4711_v2 = vmul.f32 %v6335_v34, %v4671_v41  ;;  %6037 = vmatprep.mubr.msk.bf16.mxu1 %vm4788_vm12, %v4745_v45  ;;  %vm4550_vm0 = vcmp.ge.f32.partialorder %v7517_v17, 0.0  ;;  %v4533_v21 = vmul.f32 0.5, %v7465_v62  ;;  %v4534_v56 = vmul.f32 0.5, %v7510_v18  ;;  %v5505_v17 = vld [vmem:[%s7746_s4] ss:$0 sm:$0xff] }
0x1340   : > { %v4664_v13 = vadd.f32 0.2548296, %v4656_v5  ;;  %6038 = vmatmul.mubr.msk.bf16.vlgmr.msra.gmra.mrb[100].mxu1 %vm4788_vm12, %v4746_v51  ;;  %v4638_v14 = vmul.f32 %v6333_v31, %v4630_v60  ;;  %v4709_v15 = vmul.f32 %v6337_v46, %v4669_v59  ;;  %v4558_v25 = vsel %vm4550_vm0, 1.0, %v6395_v44 }
0x1341   : > { %v4719_v6 = vsub.f32 1.0, %v4711_v2 }
0x1342   : > { %v4672_v61 = vmul.f32 %v7545_v12, %v4664_v13  ;;  %v4646_v20 = vadd.f32 -0.28449672, %v4638_v14  ;;  %v4717_v23 = vsub.f32 1.0, %v4709_v15 }
0x1343   : > { %v4727_v9 = vmul.f32 %v4719_v6, %v4559_v54 }
0x1344   : > { %v4712_v11 = vmul.f32 %v6339_v30, %v4672_v61  ;;  %v4654_v24 = vmul.f32 %v6333_v31, %v4646_v20  ;;  %v4725_v36 = vmul.f32 %v4717_v23, %v4557_v26 }
0x1345   : > { %v4735_v3 = vadd.f32 1.0, %v4727_v9  ;;  %v6341_v12 = vpop.eup %6340 }
0x1346   : > { %v4720_v1 = vsub.f32 1.0, %v4712_v11  ;;  %v4662_v29 = vadd.f32 0.2548296, %v4654_v24 }
0x1347   : > { %v4743_v4 = vmul.f32 %v4735_v3, %v4535_v35 }
0x1348   : > { %v4728_v27 = vmul.f32 %v4720_v1, %v4560_v55  ;;  %v4670_v33 = vmul.f32 %v6333_v31, %v4662_v29  ;;  %v4733_v31 = vadd.f32 1.0, %v4725_v36 }
0x134a   : > { %v4736_v49 = vadd.f32 1.0, %v4728_v27  ;;  %v4710_v32 = vmul.f32 %v6341_v12, %v4670_v33  ;;  %v4741_v8 = vmul.f32 %v4733_v31, %v4533_v21 }
0x134c   : > { %v4744_v40 = vmul.f32 %v4736_v49, %v4536_v39  ;;  %v4718_v52 = vsub.f32 1.0, %v4710_v32 }
0x134e   : > { %v4748_v19 = vpack.c.bf16 %v4744_v40, %v4743_v4  ;;  %v4726_v0 = vmul.f32 %v4718_v52, %v4558_v25 }
0x1350   : > { %v4734_v34 = vadd.f32 1.0, %v4726_v0 }
0x1352   : > { %v4742_v38 = vmul.f32 %v4734_v34, %v4534_v56  ;;  %v6350_v34 = vld [vmem:[%s7747_s27] sm:$0xff] (!%p5514_p5)  }
0x1354   : > { %v4747_v48 = vpack.c.bf16 %v4742_v38, %v4741_v8  ;;  %v6396_v8 = vmov (!%p5514_p5), 0.0   ;;  %v6351_v38 = vld [vmem:[%s7747_s27 + $0x8] sm:$0xff] (!%p5514_p5)  }
0x1355   : > { %6045 = vmatprep.subr.bf16.mxu0 (!%p5514_p5), %v6396_v8  ;;  %6049 = vmatprep.mubr.msk.bf16.mxu0 (!%p5514_p5), %vm6397_vm5, %v6396_v8 }
0x1356   : > { %6041 = vmatprep.mubr.msk.bf16.mxu1 %vm4788_vm12, %v4747_v48  ;;  %6046 = vmatpush3.bf16.msra.mxu0 (!%p5514_p5), %v6350_v34 }
0x1357   : > { %6042 = vmatmul.mubr.msk.bf16.gmra.mrb[104].mxu1 %vm4788_vm12, %v4748_v19  ;;  %6047 = vmatprep.subr.bf16.mxu0 (!%p5514_p5), %v6396_v8 }
0x135a   : > { %6048 = vmatpush3.bf16.msra.mxu0 (!%p5514_p5), %v6351_v38 }
0x1413   : > { %v6039_v44 = vpop.f32.mrb[100].mxu1 }
0x1414   : > { %v4844_v42 = vadd.f32 %v6039_v44, %v5505_v17  ;;  %v4835_v51 = vpop.f32.mrb[101].mxu1 }
0x1415   : > { %v4836_v28 = vadd.f32 %v5505_v17, %v4835_v51  ;;  %v6040_v62 = vpop.f32.mrb[102].mxu1  ;;  %v5515_v51 = vld [vmem:[%s7748_s26] ss:$0 sm:$0xff] (!%p5514_p5) }
0x1416   : > { %v4868_v18 = vadd.f32 %v4844_v42, %v7335_v37  ;;  %v4847_v41 = vadd.f32 %v6040_v62, %v5505_v17  ;;  %v4838_v53 = vpop.f32.mrb[103].mxu1  ;;  %v5516_v62 = vld [vmem:[%s7749_s3] ss:$0 sm:$0xff] (!%p5514_p5) }
0x1417   : > { %v4866_v10 = vadd.f32 %v4836_v28, %v7333_v57  ;;  %v4839_v50 = vadd.f32 %v5505_v17, %v4838_v53 }
0x1418   : > { %4876 = vst.msk [vmem:[#allocation2 + $0x10] sm:$0xff] %vm1234_vm2, %v4868_v18  ;;  %v4869_v45 = vadd.f32 %v4847_v41, %v7341_v58  ;;  %v4889_v14 = vsel (!%p5514_p5), %vm1234_vm2, %v4868_v18, 0.0 }
0x1419   : > { %4874 = vst.msk [vmem:[#allocation2] sm:$0xff] %vm1234_vm2, %v4866_v10  ;;  %v4867_v2 = vadd.f32 %v4839_v50, %v7337_v43 }
0x141a   : > { %4877 = vst.msk [vmem:[#allocation2 + $0x18] sm:$0xff] %vm1234_vm2, %v4869_v45 }
0x141b   : > { %4875 = vst.msk [vmem:[#allocation2 + $0x8] sm:$0xff] %vm1234_vm2, %v4867_v2 }
0x142a   : > { %v6043_v16 = vpop.f32.mrb[104].mxu1 }
0x142b   : > { %v4860_v5 = vadd.f32 %v6043_v16, %v5505_v17  ;;  %v4851_v37 = vpop.f32.mrb[105].mxu1 }
0x142c   : > { %v4852_v59 = vadd.f32 %v5505_v17, %v4851_v37  ;;  %v6044_v60 = vpop.f32.mrb[106].mxu1  ;;  %4885 = sbr.rel (%p5514_p5) target bundleno = 5722 (0x165a), region = 136 }
0x142d   : > { %v4872_v57 = vadd.f32 %v4860_v5, %v7351_v47  ;;  %v4863_v46 = vadd.f32 %v6044_v60, %v5505_v17  ;;  %v4854_v6 = vpop.f32.mrb[107].mxu1  ;;  %v4886_v47 = vsel (!%p5514_p5), %vm1234_vm2, %v4866_v10, 0.0  ;;  %v5517_v10 = vld [vmem:[%s7750_s0] ss:$0 sm:$0xff] (!%p5514_p5) }
0x142e   : > { %v4870_v13 = vadd.f32 %v4852_v59, %v7349_v22  ;;  %v4855_v58 = vadd.f32 %v5505_v17, %v4854_v6  ;;  %v4887_v22 = vsel (!%p5514_p5), %vm1234_vm2, %v4867_v2, 0.0 }
0x142f   : > { %4880 = vst.msk [vmem:[#allocation2 + $0x30] sm:$0xff] %vm1234_vm2, %v4872_v57  ;;  %v4873_v43 = vadd.f32 %v4863_v46, %v7357_v63  ;;  %v4888_v61 = vadd.f32 (!%p5514_p5), %v4887_v22, %v4886_v47  ;;  %v4904_v20 = vsel (!%p5514_p5), %vm1234_vm2, %v4872_v57, 0.0 }
0x1430   : > { %4878 = vst.msk [vmem:[#allocation2 + $0x20] sm:$0xff] %vm1234_vm2, %v4870_v13  ;;  %v4871_v30 = vadd.f32 %v4855_v58, %v7353_v7  ;;  %v4901_v63 = vsel (!%p5514_p5), %vm1234_vm2, %v4870_v13, 0.0  ;;  %v4892_v7 = vsel (!%p5514_p5), %vm4891_vm1, %v4869_v45, 0.0 }
0x1431   : > { %4881 = vst.msk [vmem:[#allocation2 + $0x38] sm:$0xff] %vm1234_vm2, %v4873_v43  ;;  %v4890_v9 = vadd.f32 (!%p5514_p5), %v4889_v14, %v4888_v61  ;;  %v4906_v11 = vsel (!%p5514_p5), %vm4891_vm1, %v4873_v43, 0.0 }
0x1432   : > { %4879 = vst.msk [vmem:[#allocation2 + $0x28] sm:$0xff] %vm1234_vm2, %v4871_v30  ;;  %v4902_v54 = vsel (!%p5514_p5), %vm1234_vm2, %v4871_v30, 0.0 }
0x1433   : > { %v4903_v15 = vadd.f32 %v4902_v54, %v4901_v63  ;;  %v4893_v1 = vadd.f32 %v4892_v7, %v4890_v9 }
0x1435   : > { %v4905_v24 = vadd.f32 %v4904_v20, %v4903_v15  ;;  %v4894_v55 = vrot.slane %v4893_v1, 4 }
0x1437   : > { %v4907_v23 = vadd.f32 %v4906_v11, %v4905_v24  ;;  %v4895_v3 = vadd.f32 %v4894_v55, %v4893_v1 }
0x1439   : > { %v4908_v29 = vrot.slane %v4907_v23, 4  ;;  %v4896_v33 = vrot.slane %v4895_v3, 2 }
0x143b   : > { %v4909_v27 = vadd.f32 %v4908_v29, %v4907_v23  ;;  %v4897_v35 = vadd.f32 %v4896_v33, %v4895_v3 }
0x143d   : > { %v4910_v12 = vrot.slane %v4909_v27, 2  ;;  %v4898_v39 = vrot.slane %v4897_v35, 1 }
0x143f   : > { %v4911_v26 = vadd.f32 %v4910_v12, %v4909_v27  ;;  %v4899_v36 = vadd.f32 %v4898_v39, %v4897_v35 }
0x1441   : > { %v4912_v49 = vrot.slane %v4911_v26, 1  ;;  %v4900_v4 = vmul.f32 0.035714287, %v4899_v36 }
0x1443   : > { %v4913_v32 = vadd.f32 %v4912_v49, %v4911_v26 }
0x1445   : > { %v4914_v40 = vmul.f32 0.035714287, %v4913_v32 }
0x1447   : > { %v4916_v52 = vsel %vm4915_vm3, %v4900_v4, %v4914_v40 }
0x1448   : > { %v4920_v19 = vsel %vm4919_vm4, %v4916_v52, 0.0 }
0x1449   : > { %4921 = vadd.xlane.f32.xlu0 %v4920_v19 }
0x14d6   : > { %v4922_v25 = vpop.xlane.xlu0 %4921 }
0x14d7   : > { %v4923_v31 = vmul.f32 0.03125, %v4922_v25 }
0x14d9   : > { %v4924_v0 = vsub.f32 %v4916_v52, %v4923_v31 }
0x14db   : > { %v4925_v21 = vmul.f32 %v4924_v0, %v4924_v0 }
0x14dd   : > { %v4926_v56 = vsel %vm4919_vm4, %v4925_v21, 0.0 }
0x14de   : > { %4927 = vadd.xlane.f32.xlu0 %v4926_v56 }
0x156b   : > { %v4928_v48 = vpop.xlane.xlu0 %4927 }
0x156c   : > { %v4929_v17 = vmul.f32 0.03125, %v4928_v48 }
0x156e   : > { %v4930_v44 = vadd.f32 1e-05, %v4929_v17 }
0x1570   : > { %6352 = vrsqrt.f32 %v4930_v44 }
0x157a   : > { %v6353_v42 = vpop.eup %6352 }
0x157b   : > { %v4932_v28 = vmul.f32 %v6353_v42, %v4924_v0 }
0x157d   : > { %v4939_v18 = vmul.f32 %v5515_v51, %v4932_v28 }
0x157f   : > { %v4946_v41 = vadd.f32 %v5516_v62, %v4939_v18 }
0x1581   : > { %v4947_v53 = vpack.c.bf16 %v4946_v41, %v4946_v41 }
0x1583   : > { %6050 = vmatmul.mubr.msk.bf16.vlgmr.msra.gmra.mrb[0].mxu0 %vm1234_vm2, %v4947_v53 }
0x1656   : > { %v5008_v50 = vpop.f32.mrb[0].mxu0 }
0x1657   : > { %v5009_v45 = vadd.f32 %v5517_v10, %v5008_v50  ;;  %v6051_v2 = vpop.f32.mrb[1].mxu0 }
0x1658   : > { %v5011_v16 = vpop.f32.mrb[2].mxu0 }
0x1659   : > { %5015 = vst.msk [vmem:[#allocation3] sm:$0x3] %vm5014_vm6, %v5009_v45  ;;  %v6052_v5 = vpop.f32.mrb[3].mxu0 }
0x165a PF: > { %p6101_p6 = scmp.eq.s32.totalorder %s6550_s5, 1  ;;  %s6398_s2 = smov [#allocation3]  }
0x165b   : > { %s5028_s29 = sshll.u32 %s6398_s2, 4  ;;  %s5029_s29 = int_to_ptr.vmem [resolvable:$true] %s5028_s29 }
0x165c   : > { %s6354_s15 = scalar_lea.vmem %s5029_s29, 32  ;;  %p6361_p10 = scmp.lt.s32.totalorder %s5029_s29, %s5029_s29 }
0x165d   : > { %p6355_p7 = scmp.ne.s32.totalorder %s5029_s29, %s6354_s15  ;;  %p6362_p11 = scmp.lt.s32.totalorder %s6354_s15, %s6354_s15 }
0x165f   : > { %p6356_p8 = pnand %p6355_p7, %p6101_p6  ;;  %p6363_p12 = por %p6362_p11, %p6361_p10 }
0x1661   : > { %p6357_p9 = pneg %p6356_p8 }
0x1663   : > { %p6364_p13 = pnand %p6363_p12, %p6357_p9 }
0x1665   : > { %6367 = shalt.err (!%p6364_p13)
}
0x1666   : > { %s7751_s9 = sld [smem:[#allocation30_spill]] }
0x166c   : > { %s6368_s12 = scalar_lea.hbm %s7751_s9, 32 }
0x166d   : > { %p6369_p0 = scmp.ne.s32.totalorder %s7751_s9, %s6368_s12  ;;  %p6374_p3 = scmp.lt.u32.totalorder %s6368_s12, %s7751_s9 }
0x166f   : > { %p6370_p1 = pnand %p6369_p0, %p6101_p6 }
0x1671   : > { %p6371_p2 = pneg %p6370_p1 }
0x1673   : > { %p6376_p4 = pnand %p6374_p3, %p6371_p2 }
0x1675   : > { %6379 = shalt.err (!%p6376_p4)
}
0x1676   : > { %6098 = dma.vmem_to_hbm [thread:$0]  (%p6101_p6), %s5029_s29, 32, %s7751_s9, [#allocation4]  }
0x1677   : > { %6385 = dma.done.wait (%p6101_p6), [#allocation4], 32  }
0x1678   : > { %6387 = vsyncadd (%p6101_p6), [#allocation4], 4294967264 }
0x1679 PF: > { %s7752_s23 = sld [smem:[#allocation6_spill]] }
0x167f   : > { %s40_s8 = sadd.s32 1, %s7752_s23  }
0x1680   : > { %p37_p5 = scmp.ge.s32.totalorder %s40_s8, 4  }
0x1682   :  { %39 = sbr.rel (!%p37_p5) target bundleno = 23 (0x17), region = 250 }
0x1689   :  { %5052 = vsyncpa [#allocation4], 1 }
0x168a   :  { %5054 = vsyncpa [#allocation4 + $0x1], 1 }

</bundles_post_ra>
